<compile_context>
chip_gen: v6e
topology: v6e:2x2x1
jax: 0.10.0
libtpu: 0.0.40
codegen_flags: <defaults>
</compile_context>

<pallas_src>
import functools

import jax
import jax.numpy as jnp
from jax.experimental import pallas as pl
from jax.experimental.pallas import tpu as pltpu


# ----------------------------- Pallas kernels -----------------------------

def _conv_row_kernel(x_ref, w_ref, bias_ref, *rest, taps, row_tile, relu,
                     has_res, n_row_tiles):
    """One (batch, row-tile) step of a stride-1 'valid' conv in banded-matmul form.

    x_ref    : (1, Hi, Wi*Ci)        padded input rows for this batch item (f32)
    w_ref    : (taps, Wi*Ci, Wo*Co)  banded weights, BN scale folded in (bf16)
    bias_ref : (1, Wo*Co)            per-channel bias tiled over Wo (f32)
    res_ref  : (1, row_tile, Wo*Co)  optional fused residual (f32)
    o_ref    : (1, row_tile, Wo*Co)  output rows (f32)

    out[ty, ox*Co+co] = sum_dy sum_{dx,ci} x[row0+ty+dy, (ox+dx)*Ci+ci] * w[dy,dx,ci,co]
    realised as `taps` lane-dense MXU matmuls (bf16 operands, f32 accumulation).
    """
    if has_res:
        res_ref, o_ref = rest
    else:
        (o_ref,) = rest

    acc = None
    if n_row_tiles == 1:
        for dy in range(taps):                       # fully static slices
            lhs = x_ref[0, dy:dy + row_tile, :]
            d = jnp.dot(lhs.astype(jnp.bfloat16), w_ref[dy],
                        preferred_element_type=jnp.float32)
            acc = d if acc is None else acc + d
    else:
        row0 = pl.multiple_of(pl.program_id(1) * row_tile, row_tile)
        for dy in range(taps):
            lhs = x_ref[0, pl.ds(row0 + dy, row_tile), :]
            d = jnp.dot(lhs.astype(jnp.bfloat16), w_ref[dy],
                        preferred_element_type=jnp.float32)
            acc = d if acc is None else acc + d

    y = acc + bias_ref[...]                          # folded-BN bias (f32 epilogue)
    if has_res:
        y = y + res_ref[0]                           # fused residual add
    if relu:
        y = jnp.maximum(y, 0.0)
    o_ref[0] = y


def _maxpool9_kernel(x_ref, o_ref, *, Ho, Wo, PH):
    """3x3 / stride-2 / pad-1 max pool over 4 precomputed stride-2 phases.

    x_ref : (1, 4*PH, PW, C) — phases (py,px) of the -inf padded input, stacked
            along H.  Tap (ky,kx) lives in phase (ky%2, kx%2) at offset (ky//2, kx//2).
    o_ref : (1, Ho, Wo, C)
    """
    out = None
    for ky in range(3):
        for kx in range(3):
            ph = (ky % 2) * 2 + (kx % 2)
            dy, dx = ky // 2, kx // 2
            tap = x_ref[0, ph * PH + dy:ph * PH + dy + Ho, dx:dx + Wo, :]
            out = tap if out is None else jnp.maximum(out, tap)
    o_ref[0] = out


# ----------------------------- layout helpers (wrapper glue) -----------------------------

def _space_to_depth2(xp):
    """(B, Hp, Wp, C) -> (B, ceil(Hp/2), ceil(Wp/2), 4*C), channel order (py, px, c)."""
    B, Hp, Wp, C = xp.shape
    He, We = -(-Hp // 2) * 2, -(-Wp // 2) * 2
    if (He, We) != (Hp, Wp):
        xp = jnp.pad(xp, ((0, 0), (0, He - Hp), (0, We - Wp), (0, 0)))
    x = xp.reshape(B, He // 2, 2, We // 2, 2, C).transpose(0, 1, 3, 2, 4, 5)
    return x.reshape(B, He // 2, We // 2, 4 * C)


def _weight_s2d(w):
    """(K, K, Ci, Co) stride-2 kernel -> equivalent stride-1 kernel (Kc, Kc, 4*Ci, Co)."""
    K, _, Ci, Co = w.shape
    Kc = (K + 1) // 2
    wp = jnp.pad(w, ((0, 2 * Kc - K), (0, 2 * Kc - K), (0, 0), (0, 0)))
    wp = wp.reshape(Kc, 2, Kc, 2, Ci, Co).transpose(0, 2, 1, 3, 4, 5)
    return wp.reshape(Kc, Kc, 4 * Ci, Co)


def _banded_weight(w, Wi, Wo):
    """(Kc, Kc, Ci, Co) -> (Kc, Wi*Ci, Wo*Co) banded per-row matmul weights."""
    Kc, _, Ci, Co = w.shape
    j = jnp.arange(Wi * Ci)
    n = jnp.arange(Wo * Co)
    wpos, ci = j // Ci, j % Ci
    ox, co = n // Co, n % Co
    dx = wpos[:, None] - ox[None, :]
    valid = (dx >= 0) & (dx < Kc)
    dxc = jnp.clip(dx, 0, Kc - 1)
    g = w[:, dxc, ci[:, None], co[None, :]]           # (Kc, Wi*Ci, Wo*Co)
    return jnp.where(valid[None], g, 0.0)


def _row_tile(n, target=128):
    for t in range(min(n, target), 0, -1):
        if n % t == 0:
            return t
    return n


# ----------------------------- conv / pool wrappers -----------------------------

def conv_bn(x, w, scale, bias, *, stride, relu, residual=None):
    """Conv(KxK, stride, pad=(K-1)//2) + folded-BN + optional fused residual + ReLU.

    Stride-2 convs are rewritten as stride-1 convs over a space-to-depth input so
    only strided output positions are computed; the activation is read from HBM
    exactly once (no im2col materialisation).
    """
    B, H, W, Cin = x.shape
    K, _, _, Cout = w.shape
    pad = (K - 1) // 2

    w = w * scale.reshape(1, 1, 1, Cout)              # fold BN scale into the weights
    xp = jnp.pad(x, ((0, 0), (pad, pad), (pad, pad), (0, 0))) if pad else x
    if stride == 2:
        xp, w = _space_to_depth2(xp), _weight_s2d(w)
    elif stride != 1:
        raise ValueError("only stride 1/2 supported")

    _, Hi, Wi, Ci = xp.shape
    Kc = w.shape[0]
    Ho, Wo = Hi - Kc + 1, Wi - Kc + 1
    nlanes = Wo * Cout                                # lane-dense output width

    wb = _banded_weight(w, Wi, Wo).astype(jnp.bfloat16)   # (Kc, Wi*Ci, Wo*Cout)
    bias_row = jnp.tile(bias.reshape(1, Cout), (1, Wo))   # (1, Wo*Cout)

    x3 = xp.reshape(B, Hi, Wi * Ci)                   # free reshape: W,C merged on lanes
    th = _row_tile(Ho)
    nrt = Ho // th

    in_specs = [
        pl.BlockSpec((1, Hi, Wi * Ci), lambda b, r: (b, 0, 0)),     # refetched only when b changes
        pl.BlockSpec((Kc, Wi * Ci, nlanes), lambda b, r: (0, 0, 0)),
        pl.BlockSpec((1, nlanes), lambda b, r: (0, 0)),
    ]
    args = [x3, wb, bias_row]
    if residual is not None:
        in_specs.append(pl.BlockSpec((1, th, nlanes), lambda b, r: (b, r, 0)))
        args.append(residual.reshape(B, Ho, nlanes))

    y = pl.pallas_call(
        functools.partial(_conv_row_kernel, taps=Kc, row_tile=th, relu=relu,
                          has_res=residual is not None, n_row_tiles=nrt),
        out_shape=jax.ShapeDtypeStruct((B, Ho, nlanes), jnp.float32),
        grid=(B, nrt),
        in_specs=in_specs,
        out_specs=pl.BlockSpec((1, th, nlanes), lambda b, r: (b, r, 0)),
        compiler_params=pltpu.CompilerParams(
            dimension_semantics=("parallel", "parallel")),
    )(*args)
    return y.reshape(B, Ho, Wo, Cout)


def maxpool_3x3_s2_p1(x):
    """MaxPool (3,3)/(2,2)/pad 1 per frame (== MaxPool3d((1,3,3),(1,2,2),(0,1,1)) with T folded).

    Reads the input once (as 4 stride-2 phases) and writes only the pooled output.
    """
    B, H, W, C = x.shape
    Ho, Wo = (H - 1) // 2 + 1, (W - 1) // 2 + 1
    PH, PW = Ho + 1, Wo + 1
    xp = jnp.pad(x, ((0, 0), (1, 1), (1, 1), (0, 0)), constant_values=-jnp.inf)

    phases = []
    for py in range(2):
        for px in range(2):
            p = xp[:, py::2, px::2, :][:, :PH, :PW, :]
            dh, dw = PH - p.shape[1], PW - p.shape[2]
            if dh or dw:
                p = jnp.pad(p, ((0, 0), (0, dh), (0, dw), (0, 0)),
                            constant_values=-jnp.inf)
            phases.append(p)
    xph = jnp.concatenate(phases, axis=1)             # (B, 4*PH, PW, C)

    return pl.pallas_call(
        functools.partial(_maxpool9_kernel, Ho=Ho, Wo=Wo, PH=PH),
        out_shape=jax.ShapeDtypeStruct((B, Ho, Wo, C), jnp.float32),
        grid=(B,),
        in_specs=[pl.BlockSpec((1, 4 * PH, PW, C), lambda b: (b, 0, 0, 0))],
        out_specs=pl.BlockSpec((1, Ho, Wo, C), lambda b: (b, 0, 0, 0)),
        compiler_params=pltpu.CompilerParams(dimension_semantics=("parallel",)),
    )(xph)


# ----------------------------- parameters -----------------------------

def _init_conv_bn(key, k, cin, cout):
    kw, ks, kb = jax.random.split(key, 3)
    fan_in = k * k * cin
    w = jax.random.normal(kw, (k, k, cin, cout), jnp.float32) / jnp.sqrt(fan_in)
    # TODO(synk): BatchNorm is represented by its inference-time folded affine
    # (scale, bias); training-mode batch statistics are not modeled.
    scale = 1.0 + 0.1 * jax.random.normal(ks, (1, cout), jnp.float32)
    bias = 0.1 * jax.random.normal(kb, (1, cout), jnp.float32)
    return w, scale, bias


def _init_block(key, cin, cout, downsample):
    k1, k2, k3 = jax.random.split(key, 3)
    p = {}
    p['w1'], p['s1'], p['b1'] = _init_conv_bn(k1, 3, cin, cout)
    p['w2'], p['s2'], p['b2'] = _init_conv_bn(k2, 3, cout, cout)
    if downsample:
        p['wd'], p['sd'], p['bd'] = _init_conv_bn(k3, 1, cin, cout)
    return p


def init_encoder_params(key):
    k0, k1, k2, k3, k4 = jax.random.split(key, 5)
    stem_w = 8
    widths = [8, 16, 32, 64]          # backbone.layer_widths[1:]
    return {
        'stem': _init_conv_bn(k0, 7, 3, stem_w),
        'layer1': _init_block(k1, stem_w, widths[0], downsample=False),
        'layer2': _init_block(k2, widths[0], widths[1], downsample=True),
        'layer3': _init_block(k3, widths[1], widths[2], downsample=True),
        'layer4': _init_block(k4, widths[2], widths[3], downsample=True),
    }


# ----------------------------- forward -----------------------------

def basic_block(x, p, *, stride):
    if 'wd' in p:
        identity = conv_bn(x, p['wd'], p['sd'], p['bd'], stride=stride, relu=False)
    else:
        identity = x
    out = conv_bn(x, p['w1'], p['s1'], p['b1'], stride=stride, relu=True)
    # conv2 + BN + residual-add + ReLU all fused in one kernel epilogue.
    return conv_bn(out, p['w2'], p['s2'], p['b2'], stride=1, relu=True,
                   residual=identity)


def encoder_forward(x, params):
    # x: (N, C, T, H, W) — PyTorch NCTHW video tensor; temporal ops are identity,
    # so fold T into the batch and run per-frame.
    N, C, T, H, W = x.shape
    xb = jnp.transpose(x, (0, 2, 3, 4, 1)).reshape(N * T, H, W, C)

    # stem: conv7x7/2 + BN + ReLU + MaxPool3d((1,3,3),(1,2,2),(0,1,1))
    sw, ss, sb = params['stem']
    f = conv_bn(xb, sw, ss, sb, stride=2, relu=True)
    f = maxpool_3x3_s2_p1(f)

    e1 = basic_block(f, params['layer1'], stride=1)
    e2 = basic_block(e1, params['layer2'], stride=2)
    e3 = basic_block(e2, params['layer3'], stride=2)
    e4 = basic_block(e3, params['layer4'], stride=2)

    def to_ncthw(y):
        b, h, w, c = y.shape
        return jnp.transpose(y.reshape(N, T, h, w, c), (0, 4, 1, 2, 3))

    return tuple(to_ncthw(e) for e in (e1, e2, e3, e4))


if __name__ == "__main__":
    key = jax.random.PRNGKey(0)
    kx, kp = jax.random.split(key)
    x = jax.random.normal(kx, (2, 3, 2, 32, 32), jnp.float32)  # (N, C, T, H, W)
    params = init_encoder_params(kp)

    fwd = jax.jit(encoder_forward)
    e1, e2, e3, e4 = fwd(x, params)
    for e in (e1, e2, e3, e4):
        jax.block_until_ready(e)

    assert e1.shape == (2, 8, 2, 8, 8)
    assert e2.shape == (2, 16, 2, 4, 4)
    assert e3.shape == (2, 32, 2, 2, 2)
    assert e4.shape == (2, 64, 2, 1, 1)
    assert all(bool(jnp.isfinite(e).all()) for e in (e1, e2, e3, e4))
    print("KERNEL_OK")
</pallas_src>

<mosaic_0001>
module attributes {stable_mosaic.version = 11 : i64} {
  func.func @_conv_row_kernel(%arg0: i32, %arg1: i32, %arg2: memref<1x19x228xf32, #tpu.memory_space<vmem>>, %arg3: memref<4x228x128xbf16, #tpu.memory_space<vmem>>, %arg4: memref<1x128xf32, #tpu.memory_space<vmem>>, %arg5: memref<1x16x128xf32, #tpu.memory_space<vmem>>) attributes {dimension_semantics = [#tpu.dimension_semantics<parallel>, #tpu.dimension_semantics<parallel>], iteration_bounds = array<i64: 4, 1>, scalar_prefetch = 0 : i64, scratch_operands = 0 : i64, tpu.core_type = #tpu.core_type<tc>, window_params = [{transform_indices = @transform_0, window_bounds = array<i64: 1, 19, 228>}, {pipeline_mode = #tpu.pipeline_mode<synchronous>, transform_indices = @transform_1, window_bounds = array<i64: 4, 228, 128>}, {pipeline_mode = #tpu.pipeline_mode<synchronous>, transform_indices = @transform_2, window_bounds = array<i64: 1, 128>}, {transform_indices = @transform_3, window_bounds = array<i64: 1, 16, 128>}]} {
    %c0 = arith.constant 0 : index
    %c0_0 = arith.constant 0 : index
    %c0_1 = arith.constant 0 : index
    %0 = vector.load %arg2[%c0, %c0_0, %c0_1] : memref<1x19x228xf32, #tpu.memory_space<vmem>>, vector<1x16x228xf32>
    %1 = vector.shape_cast %0 : vector<1x16x228xf32> to vector<16x228xf32>
    %2 = arith.truncf %1 : vector<16x228xf32> to vector<16x228xbf16>
    %c0_2 = arith.constant 0 : index
    %c0_3 = arith.constant 0 : index
    %c0_4 = arith.constant 0 : index
    %3 = vector.load %arg3[%c0_2, %c0_3, %c0_4] : memref<4x228x128xbf16, #tpu.memory_space<vmem>>, vector<1x228x128xbf16>
    %4 = vector.shape_cast %3 : vector<1x228x128xbf16> to vector<228x128xbf16>
    %cst = arith.constant dense<0.000000e+00> : vector<16x128xf32>
    %5 = tpu.matmul %2, %4, %cst {dimension_numbers = #tpu.dot_dimension_numbers<[1], [0], [0], [1], [0, 0, 1, 1], [], []>} : vector<16x228xbf16>, vector<228x128xbf16>, vector<16x128xf32> -> vector<16x128xf32>
    %c0_5 = arith.constant 0 : index
    %c1 = arith.constant 1 : index
    %c0_6 = arith.constant 0 : index
    %6 = vector.load %arg2[%c0_5, %c1, %c0_6] : memref<1x19x228xf32, #tpu.memory_space<vmem>>, vector<1x16x228xf32>
    %7 = vector.shape_cast %6 : vector<1x16x228xf32> to vector<16x228xf32>
    %8 = arith.truncf %7 : vector<16x228xf32> to vector<16x228xbf16>
    %c1_7 = arith.constant 1 : index
    %c0_8 = arith.constant 0 : index
    %c0_9 = arith.constant 0 : index
    %9 = vector.load %arg3[%c1_7, %c0_8, %c0_9] : memref<4x228x128xbf16, #tpu.memory_space<vmem>>, vector<1x228x128xbf16>
    %10 = vector.shape_cast %9 : vector<1x228x128xbf16> to vector<228x128xbf16>
    %cst_10 = arith.constant dense<0.000000e+00> : vector<16x128xf32>
    %11 = tpu.matmul %8, %10, %cst_10 {dimension_numbers = #tpu.dot_dimension_numbers<[1], [0], [0], [1], [0, 0, 1, 1], [], []>} : vector<16x228xbf16>, vector<228x128xbf16>, vector<16x128xf32> -> vector<16x128xf32>
    %12 = arith.addf %5, %11 : vector<16x128xf32>
    %c0_11 = arith.constant 0 : index
    %c2 = arith.constant 2 : index
    %c0_12 = arith.constant 0 : index
    %13 = vector.load %arg2[%c0_11, %c2, %c0_12] : memref<1x19x228xf32, #tpu.memory_space<vmem>>, vector<1x16x228xf32>
    %14 = vector.shape_cast %13 : vector<1x16x228xf32> to vector<16x228xf32>
    %15 = arith.truncf %14 : vector<16x228xf32> to vector<16x228xbf16>
    %c2_13 = arith.constant 2 : index
    %c0_14 = arith.constant 0 : index
    %c0_15 = arith.constant 0 : index
    %16 = vector.load %arg3[%c2_13, %c0_14, %c0_15] : memref<4x228x128xbf16, #tpu.memory_space<vmem>>, vector<1x228x128xbf16>
    %17 = vector.shape_cast %16 : vector<1x228x128xbf16> to vector<228x128xbf16>
    %cst_16 = arith.constant dense<0.000000e+00> : vector<16x128xf32>
    %18 = tpu.matmul %15, %17, %cst_16 {dimension_numbers = #tpu.dot_dimension_numbers<[1], [0], [0], [1], [0, 0, 1, 1], [], []>} : vector<16x228xbf16>, vector<228x128xbf16>, vector<16x128xf32> -> vector<16x128xf32>
    %19 = arith.addf %12, %18 : vector<16x128xf32>
    %c0_17 = arith.constant 0 : index
    %c3 = arith.constant 3 : index
    %c0_18 = arith.constant 0 : index
    %20 = vector.load %arg2[%c0_17, %c3, %c0_18] : memref<1x19x228xf32, #tpu.memory_space<vmem>>, vector<1x16x228xf32>
    %21 = vector.shape_cast %20 : vector<1x16x228xf32> to vector<16x228xf32>
    %22 = arith.truncf %21 : vector<16x228xf32> to vector<16x228xbf16>
    %c3_19 = arith.constant 3 : index
    %c0_20 = arith.constant 0 : index
    %c0_21 = arith.constant 0 : index
    %23 = vector.load %arg3[%c3_19, %c0_20, %c0_21] : memref<4x228x128xbf16, #tpu.memory_space<vmem>>, vector<1x228x128xbf16>
    %24 = vector.shape_cast %23 : vector<1x228x128xbf16> to vector<228x128xbf16>
    %cst_22 = arith.constant dense<0.000000e+00> : vector<16x128xf32>
    %25 = tpu.matmul %22, %24, %cst_22 {dimension_numbers = #tpu.dot_dimension_numbers<[1], [0], [0], [1], [0, 0, 1, 1], [], []>} : vector<16x228xbf16>, vector<228x128xbf16>, vector<16x128xf32> -> vector<16x128xf32>
    %26 = arith.addf %19, %25 : vector<16x128xf32>
    %c0_23 = arith.constant 0 : index
    %c0_24 = arith.constant 0 : index
    %27 = vector.load %arg4[%c0_23, %c0_24] : memref<1x128xf32, #tpu.memory_space<vmem>>, vector<1x128xf32>
    %28 = vector.broadcast %27 : vector<1x128xf32> to vector<16x128xf32>
    %29 = arith.addf %26, %28 : vector<16x128xf32>
    %cst_25 = arith.constant 0.000000e+00 : f32
    %30 = vector.broadcast %cst_25 : f32 to vector<16x128xf32>
    %31 = arith.maximumf %29, %30 : vector<16x128xf32>
    %c0_26 = arith.constant 0 : index
    %c0_27 = arith.constant 0 : index
    %c0_28 = arith.constant 0 : index
    %32 = vector.load %arg5[%c0_26, %c0_27, %c0_28] : memref<1x16x128xf32, #tpu.memory_space<vmem>>, vector<1x16x128xf32>
    %33 = vector.shape_cast %32 : vector<1x16x128xf32> to vector<16x128xf32>
    %34 = vector.shape_cast %31 : vector<16x128xf32> to vector<1x16x128xf32>
    tpu.vector_store %arg5[%c0_26, %c0_27, %c0_28], %34 {strides = array<i32>} : memref<1x16x128xf32, #tpu.memory_space<vmem>>, vector<1x16x128xf32>,
    return
  }
  func.func @transform_0(%arg0: i32, %arg1: i32) -> (i32, i32, i32) {
    %c0_i32 = arith.constant 0 : i32
    %c0_i32_0 = arith.constant 0 : i32
    %c0_i32_1 = arith.constant 0 : i32
    return %arg0, %c0_i32, %c0_i32_0 : i32, i32, i32
  }
  func.func @transform_1(%arg0: i32, %arg1: i32) -> (i32, i32, i32) {
    %c0_i32 = arith.constant 0 : i32
    %c0_i32_0 = arith.constant 0 : i32
    %c0_i32_1 = arith.constant 0 : i32
    %c0_i32_2 = arith.constant 0 : i32
    return %c0_i32, %c0_i32_0, %c0_i32_1 : i32, i32, i32
  }
  func.func @transform_2(%arg0: i32, %arg1: i32) -> (i32, i32) {
    %c0_i32 = arith.constant 0 : i32
    %c0_i32_0 = arith.constant 0 : i32
    %c0_i32_1 = arith.constant 0 : i32
    return %c0_i32, %c0_i32_0 : i32, i32
  }
  func.func @transform_3(%arg0: i32, %arg1: i32) -> (i32, i32, i32) {
    %c0_i32 = arith.constant 0 : i32
    %c0_i32_0 = arith.constant 0 : i32
    return %arg0, %arg1, %c0_i32 : i32, i32, i32
  }
}

module attributes {stable_mosaic.version = 11 : i64} {
  func.func @_maxpool9_kernel(%arg0: i32, %arg1: memref<1x36x9x8xf32, #tpu.memory_space<vmem>>, %arg2: memref<1x8x8x8xf32, #tpu.memory_space<vmem>>) attributes {dimension_semantics = [#tpu.dimension_semantics<parallel>], iteration_bounds = array<i64: 4>, scalar_prefetch = 0 : i64, scratch_operands = 0 : i64, tpu.core_type = #tpu.core_type<tc>, window_params = [{transform_indices = @transform_0, window_bounds = array<i64: 1, 36, 9, 8>}, {transform_indices = @transform_1, window_bounds = array<i64: 1, 8, 8, 8>}]} {
    %c0 = arith.constant 0 : index
    %c0_0 = arith.constant 0 : index
    %c0_1 = arith.constant 0 : index
    %c0_2 = arith.constant 0 : index
    %0 = vector.load %arg1[%c0, %c0_0, %c0_1, %c0_2] : memref<1x36x9x8xf32, #tpu.memory_space<vmem>>, vector<1x8x8x8xf32>
    %1 = vector.shape_cast %0 : vector<1x8x8x8xf32> to vector<8x8x8xf32>
    %c0_3 = arith.constant 0 : index
    %c9 = arith.constant 9 : index
    %c0_4 = arith.constant 0 : index
    %c0_5 = arith.constant 0 : index
    %2 = vector.load %arg1[%c0_3, %c9, %c0_4, %c0_5] : memref<1x36x9x8xf32, #tpu.memory_space<vmem>>, vector<1x8x8x8xf32>
    %3 = vector.shape_cast %2 : vector<1x8x8x8xf32> to vector<8x8x8xf32>
    %4 = arith.maximumf %1, %3 : vector<8x8x8xf32>
    %c0_6 = arith.constant 0 : index
    %c0_7 = arith.constant 0 : index
    %c1 = arith.constant 1 : index
    %c0_8 = arith.constant 0 : index
    %5 = vector.load %arg1[%c0_6, %c0_7, %c1, %c0_8] : memref<1x36x9x8xf32, #tpu.memory_space<vmem>>, vector<1x8x8x8xf32>
    %6 = vector.shape_cast %5 : vector<1x8x8x8xf32> to vector<8x8x8xf32>
    %7 = arith.maximumf %4, %6 : vector<8x8x8xf32>
    %c0_9 = arith.constant 0 : index
    %c18 = arith.constant 18 : index
    %c0_10 = arith.constant 0 : index
    %c0_11 = arith.constant 0 : index
    %8 = vector.load %arg1[%c0_9, %c18, %c0_10, %c0_11] : memref<1x36x9x8xf32, #tpu.memory_space<vmem>>, vector<1x8x8x8xf32>
    %9 = vector.shape_cast %8 : vector<1x8x8x8xf32> to vector<8x8x8xf32>
    %10 = arith.maximumf %7, %9 : vector<8x8x8xf32>
    %c0_12 = arith.constant 0 : index
    %c27 = arith.constant 27 : index
    %c0_13 = arith.constant 0 : index
    %c0_14 = arith.constant 0 : index
    %11 = vector.load %arg1[%c0_12, %c27, %c0_13, %c0_14] : memref<1x36x9x8xf32, #tpu.memory_space<vmem>>, vector<1x8x8x8xf32>
    %12 = vector.shape_cast %11 : vector<1x8x8x8xf32> to vector<8x8x8xf32>
    %13 = arith.maximumf %10, %12 : vector<8x8x8xf32>
    %c0_15 = arith.constant 0 : index
    %c18_16 = arith.constant 18 : index
    %c1_17 = arith.constant 1 : index
    %c0_18 = arith.constant 0 : index
    %14 = vector.load %arg1[%c0_15, %c18_16, %c1_17, %c0_18] : memref<1x36x9x8xf32, #tpu.memory_space<vmem>>, vector<1x8x8x8xf32>
    %15 = vector.shape_cast %14 : vector<1x8x8x8xf32> to vector<8x8x8xf32>
    %16 = arith.maximumf %13, %15 : vector<8x8x8xf32>
    %c0_19 = arith.constant 0 : index
    %c1_20 = arith.constant 1 : index
    %c0_21 = arith.constant 0 : index
    %c0_22 = arith.constant 0 : index
    %17 = vector.load %arg1[%c0_19, %c1_20, %c0_21, %c0_22] : memref<1x36x9x8xf32, #tpu.memory_space<vmem>>, vector<1x8x8x8xf32>
    %18 = vector.shape_cast %17 : vector<1x8x8x8xf32> to vector<8x8x8xf32>
    %19 = arith.maximumf %16, %18 : vector<8x8x8xf32>
    %c0_23 = arith.constant 0 : index
    %c10 = arith.constant 10 : index
    %c0_24 = arith.constant 0 : index
    %c0_25 = arith.constant 0 : index
    %20 = vector.load %arg1[%c0_23, %c10, %c0_24, %c0_25] : memref<1x36x9x8xf32, #tpu.memory_space<vmem>>, vector<1x8x8x8xf32>
    %21 = vector.shape_cast %20 : vector<1x8x8x8xf32> to vector<8x8x8xf32>
    %22 = arith.maximumf %19, %21 : vector<8x8x8xf32>
    %c0_26 = arith.constant 0 : index
    %c1_27 = arith.constant 1 : index
    %c1_28 = arith.constant 1 : index
    %c0_29 = arith.constant 0 : index
    %23 = vector.load %arg1[%c0_26, %c1_27, %c1_28, %c0_29] : memref<1x36x9x8xf32, #tpu.memory_space<vmem>>, vector<1x8x8x8xf32>
    %24 = vector.shape_cast %23 : vector<1x8x8x8xf32> to vector<8x8x8xf32>
    %25 = arith.maximumf %22, %24 : vector<8x8x8xf32>
    %c0_30 = arith.constant 0 : index
    %c0_31 = arith.constant 0 : index
    %c0_32 = arith.constant 0 : index
    %c0_33 = arith.constant 0 : index
    %26 = vector.load %arg2[%c0_30, %c0_31, %c0_32, %c0_33] : memref<1x8x8x8xf32, #tpu.memory_space<vmem>>, vector<1x8x8x8xf32>
    %27 = vector.shape_cast %26 : vector<1x8x8x8xf32> to vector<8x8x8xf32>
    %28 = vector.shape_cast %25 : vector<8x8x8xf32> to vector<1x8x8x8xf32>
    tpu.vector_store %arg2[%c0_30, %c0_31, %c0_32, %c0_33], %28 {strides = array<i32>} : memref<1x8x8x8xf32, #tpu.memory_space<vmem>>, vector<1x8x8x8xf32>,
    return
  }
  func.func @transform_0(%arg0: i32) -> (i32, i32, i32, i32) {
    %c0_i32 = arith.constant 0 : i32
    %c0_i32_0 = arith.constant 0 : i32
    %c0_i32_1 = arith.constant 0 : i32
    %c0_i32_2 = arith.constant 0 : i32
    return %arg0, %c0_i32, %c0_i32_0, %c0_i32_1 : i32, i32, i32, i32
  }
  func.func @transform_1(%arg0: i32) -> (i32, i32, i32, i32) {
    %c0_i32 = arith.constant 0 : i32
    %c0_i32_0 = arith.constant 0 : i32
    %c0_i32_1 = arith.constant 0 : i32
    %c0_i32_2 = arith.constant 0 : i32
    return %arg0, %c0_i32, %c0_i32_0, %c0_i32_1 : i32, i32, i32, i32
  }
}

module attributes {stable_mosaic.version = 11 : i64} {
  func.func @_conv_row_kernel(%arg0: i32, %arg1: i32, %arg2: memref<1x10x80xf32, #tpu.memory_space<vmem>>, %arg3: memref<3x80x64xbf16, #tpu.memory_space<vmem>>, %arg4: memref<1x64xf32, #tpu.memory_space<vmem>>, %arg5: memref<1x8x64xf32, #tpu.memory_space<vmem>>) attributes {dimension_semantics = [#tpu.dimension_semantics<parallel>, #tpu.dimension_semantics<parallel>], iteration_bounds = array<i64: 4, 1>, scalar_prefetch = 0 : i64, scratch_operands = 0 : i64, tpu.core_type = #tpu.core_type<tc>, window_params = [{transform_indices = @transform_0, window_bounds = array<i64: 1, 10, 80>}, {pipeline_mode = #tpu.pipeline_mode<synchronous>, transform_indices = @transform_1, window_bounds = array<i64: 3, 80, 64>}, {pipeline_mode = #tpu.pipeline_mode<synchronous>, transform_indices = @transform_2, window_bounds = array<i64: 1, 64>}, {transform_indices = @transform_3, window_bounds = array<i64: 1, 8, 64>}]} {
    %c0 = arith.constant 0 : index
    %c0_0 = arith.constant 0 : index
    %c0_1 = arith.constant 0 : index
    %0 = vector.load %arg2[%c0, %c0_0, %c0_1] : memref<1x10x80xf32, #tpu.memory_space<vmem>>, vector<1x8x80xf32>
    %1 = vector.shape_cast %0 : vector<1x8x80xf32> to vector<8x80xf32>
    %2 = arith.truncf %1 : vector<8x80xf32> to vector<8x80xbf16>
    %c0_2 = arith.constant 0 : index
    %c0_3 = arith.constant 0 : index
    %c0_4 = arith.constant 0 : index
    %3 = vector.load %arg3[%c0_2, %c0_3, %c0_4] : memref<3x80x64xbf16, #tpu.memory_space<vmem>>, vector<1x80x64xbf16>
    %4 = vector.shape_cast %3 : vector<1x80x64xbf16> to vector<80x64xbf16>
    %cst = arith.constant dense<0.000000e+00> : vector<8x64xf32>
    %5 = tpu.matmul %2, %4, %cst {dimension_numbers = #tpu.dot_dimension_numbers<[1], [0], [0], [1], [0, 0, 1, 1], [], []>} : vector<8x80xbf16>, vector<80x64xbf16>, vector<8x64xf32> -> vector<8x64xf32>
    %c0_5 = arith.constant 0 : index
    %c1 = arith.constant 1 : index
    %c0_6 = arith.constant 0 : index
    %6 = vector.load %arg2[%c0_5, %c1, %c0_6] : memref<1x10x80xf32, #tpu.memory_space<vmem>>, vector<1x8x80xf32>
    %7 = vector.shape_cast %6 : vector<1x8x80xf32> to vector<8x80xf32>
    %8 = arith.truncf %7 : vector<8x80xf32> to vector<8x80xbf16>
    %c1_7 = arith.constant 1 : index
    %c0_8 = arith.constant 0 : index
    %c0_9 = arith.constant 0 : index
    %9 = vector.load %arg3[%c1_7, %c0_8, %c0_9] : memref<3x80x64xbf16, #tpu.memory_space<vmem>>, vector<1x80x64xbf16>
    %10 = vector.shape_cast %9 : vector<1x80x64xbf16> to vector<80x64xbf16>
    %cst_10 = arith.constant dense<0.000000e+00> : vector<8x64xf32>
    %11 = tpu.matmul %8, %10, %cst_10 {dimension_numbers = #tpu.dot_dimension_numbers<[1], [0], [0], [1], [0, 0, 1, 1], [], []>} : vector<8x80xbf16>, vector<80x64xbf16>, vector<8x64xf32> -> vector<8x64xf32>
    %12 = arith.addf %5, %11 : vector<8x64xf32>
    %c0_11 = arith.constant 0 : index
    %c2 = arith.constant 2 : index
    %c0_12 = arith.constant 0 : index
    %13 = vector.load %arg2[%c0_11, %c2, %c0_12] : memref<1x10x80xf32, #tpu.memory_space<vmem>>, vector<1x8x80xf32>
    %14 = vector.shape_cast %13 : vector<1x8x80xf32> to vector<8x80xf32>
    %15 = arith.truncf %14 : vector<8x80xf32> to vector<8x80xbf16>
    %c2_13 = arith.constant 2 : index
    %c0_14 = arith.constant 0 : index
    %c0_15 = arith.constant 0 : index
    %16 = vector.load %arg3[%c2_13, %c0_14, %c0_15] : memref<3x80x64xbf16, #tpu.memory_space<vmem>>, vector<1x80x64xbf16>
    %17 = vector.shape_cast %16 : vector<1x80x64xbf16> to vector<80x64xbf16>
    %cst_16 = arith.constant dense<0.000000e+00> : vector<8x64xf32>
    %18 = tpu.matmul %15, %17, %cst_16 {dimension_numbers = #tpu.dot_dimension_numbers<[1], [0], [0], [1], [0, 0, 1, 1], [], []>} : vector<8x80xbf16>, vector<80x64xbf16>, vector<8x64xf32> -> vector<8x64xf32>
    %19 = arith.addf %12, %18 : vector<8x64xf32>
    %c0_17 = arith.constant 0 : index
    %c0_18 = arith.constant 0 : index
    %20 = vector.load %arg4[%c0_17, %c0_18] : memref<1x64xf32, #tpu.memory_space<vmem>>, vector<1x64xf32>
    %21 = vector.broadcast %20 : vector<1x64xf32> to vector<8x64xf32>
    %22 = arith.addf %19, %21 : vector<8x64xf32>
    %cst_19 = arith.constant 0.000000e+00 : f32
    %23 = vector.broadcast %cst_19 : f32 to vector<8x64xf32>
    %24 = arith.maximumf %22, %23 : vector<8x64xf32>
    %c0_20 = arith.constant 0 : index
    %c0_21 = arith.constant 0 : index
    %c0_22 = arith.constant 0 : index
    %25 = vector.load %arg5[%c0_20, %c0_21, %c0_22] : memref<1x8x64xf32, #tpu.memory_space<vmem>>, vector<1x8x64xf32>
    %26 = vector.shape_cast %25 : vector<1x8x64xf32> to vector<8x64xf32>
    %27 = vector.shape_cast %24 : vector<8x64xf32> to vector<1x8x64xf32>
    tpu.vector_store %arg5[%c0_20, %c0_21, %c0_22], %27 {strides = array<i32>} : memref<1x8x64xf32, #tpu.memory_space<vmem>>, vector<1x8x64xf32>,
    return
  }
  func.func @transform_0(%arg0: i32, %arg1: i32) -> (i32, i32, i32) {
    %c0_i32 = arith.constant 0 : i32
    %c0_i32_0 = arith.constant 0 : i32
    %c0_i32_1 = arith.constant 0 : i32
    return %arg0, %c0_i32, %c0_i32_0 : i32, i32, i32
  }
  func.func @transform_1(%arg0: i32, %arg1: i32) -> (i32, i32, i32) {
    %c0_i32 = arith.constant 0 : i32
    %c0_i32_0 = arith.constant 0 : i32
    %c0_i32_1 = arith.constant 0 : i32
    %c0_i32_2 = arith.constant 0 : i32
    return %c0_i32, %c0_i32_0, %c0_i32_1 : i32, i32, i32
  }
  func.func @transform_2(%arg0: i32, %arg1: i32) -> (i32, i32) {
    %c0_i32 = arith.constant 0 : i32
    %c0_i32_0 = arith.constant 0 : i32
    %c0_i32_1 = arith.constant 0 : i32
    return %c0_i32, %c0_i32_0 : i32, i32
  }
  func.func @transform_3(%arg0: i32, %arg1: i32) -> (i32, i32, i32) {
    %c0_i32 = arith.constant 0 : i32
    %c0_i32_0 = arith.constant 0 : i32
    return %arg0, %arg1, %c0_i32 : i32, i32, i32
  }
}

module attributes {stable_mosaic.version = 11 : i64} {
  func.func @_conv_row_kernel(%arg0: i32, %arg1: i32, %arg2: memref<1x10x80xf32, #tpu.memory_space<vmem>>, %arg3: memref<3x80x64xbf16, #tpu.memory_space<vmem>>, %arg4: memref<1x64xf32, #tpu.memory_space<vmem>>, %arg5: memref<1x8x64xf32, #tpu.memory_space<vmem>>, %arg6: memref<1x8x64xf32, #tpu.memory_space<vmem>>) attributes {dimension_semantics = [#tpu.dimension_semantics<parallel>, #tpu.dimension_semantics<parallel>], iteration_bounds = array<i64: 4, 1>, scalar_prefetch = 0 : i64, scratch_operands = 0 : i64, tpu.core_type = #tpu.core_type<tc>, window_params = [{transform_indices = @transform_0, window_bounds = array<i64: 1, 10, 80>}, {pipeline_mode = #tpu.pipeline_mode<synchronous>, transform_indices = @transform_1, window_bounds = array<i64: 3, 80, 64>}, {pipeline_mode = #tpu.pipeline_mode<synchronous>, transform_indices = @transform_2, window_bounds = array<i64: 1, 64>}, {transform_indices = @transform_3, window_bounds = array<i64: 1, 8, 64>}, {transform_indices = @transform_4, window_bounds = array<i64: 1, 8, 64>}]} {
    %c0 = arith.constant 0 : index
    %c0_0 = arith.constant 0 : index
    %c0_1 = arith.constant 0 : index
    %0 = vector.load %arg2[%c0, %c0_0, %c0_1] : memref<1x10x80xf32, #tpu.memory_space<vmem>>, vector<1x8x80xf32>
    %1 = vector.shape_cast %0 : vector<1x8x80xf32> to vector<8x80xf32>
    %2 = arith.truncf %1 : vector<8x80xf32> to vector<8x80xbf16>
    %c0_2 = arith.constant 0 : index
    %c0_3 = arith.constant 0 : index
    %c0_4 = arith.constant 0 : index
    %3 = vector.load %arg3[%c0_2, %c0_3, %c0_4] : memref<3x80x64xbf16, #tpu.memory_space<vmem>>, vector<1x80x64xbf16>
    %4 = vector.shape_cast %3 : vector<1x80x64xbf16> to vector<80x64xbf16>
    %cst = arith.constant dense<0.000000e+00> : vector<8x64xf32>
    %5 = tpu.matmul %2, %4, %cst {dimension_numbers = #tpu.dot_dimension_numbers<[1], [0], [0], [1], [0, 0, 1, 1], [], []>} : vector<8x80xbf16>, vector<80x64xbf16>, vector<8x64xf32> -> vector<8x64xf32>
    %c0_5 = arith.constant 0 : index
    %c1 = arith.constant 1 : index
    %c0_6 = arith.constant 0 : index
    %6 = vector.load %arg2[%c0_5, %c1, %c0_6] : memref<1x10x80xf32, #tpu.memory_space<vmem>>, vector<1x8x80xf32>
    %7 = vector.shape_cast %6 : vector<1x8x80xf32> to vector<8x80xf32>
    %8 = arith.truncf %7 : vector<8x80xf32> to vector<8x80xbf16>
    %c1_7 = arith.constant 1 : index
    %c0_8 = arith.constant 0 : index
    %c0_9 = arith.constant 0 : index
    %9 = vector.load %arg3[%c1_7, %c0_8, %c0_9] : memref<3x80x64xbf16, #tpu.memory_space<vmem>>, vector<1x80x64xbf16>
    %10 = vector.shape_cast %9 : vector<1x80x64xbf16> to vector<80x64xbf16>
    %cst_10 = arith.constant dense<0.000000e+00> : vector<8x64xf32>
    %11 = tpu.matmul %8, %10, %cst_10 {dimension_numbers = #tpu.dot_dimension_numbers<[1], [0], [0], [1], [0, 0, 1, 1], [], []>} : vector<8x80xbf16>, vector<80x64xbf16>, vector<8x64xf32> -> vector<8x64xf32>
    %12 = arith.addf %5, %11 : vector<8x64xf32>
    %c0_11 = arith.constant 0 : index
    %c2 = arith.constant 2 : index
    %c0_12 = arith.constant 0 : index
    %13 = vector.load %arg2[%c0_11, %c2, %c0_12] : memref<1x10x80xf32, #tpu.memory_space<vmem>>, vector<1x8x80xf32>
    %14 = vector.shape_cast %13 : vector<1x8x80xf32> to vector<8x80xf32>
    %15 = arith.truncf %14 : vector<8x80xf32> to vector<8x80xbf16>
    %c2_13 = arith.constant 2 : index
    %c0_14 = arith.constant 0 : index
    %c0_15 = arith.constant 0 : index
    %16 = vector.load %arg3[%c2_13, %c0_14, %c0_15] : memref<3x80x64xbf16, #tpu.memory_space<vmem>>, vector<1x80x64xbf16>
    %17 = vector.shape_cast %16 : vector<1x80x64xbf16> to vector<80x64xbf16>
    %cst_16 = arith.constant dense<0.000000e+00> : vector<8x64xf32>
    %18 = tpu.matmul %15, %17, %cst_16 {dimension_numbers = #tpu.dot_dimension_numbers<[1], [0], [0], [1], [0, 0, 1, 1], [], []>} : vector<8x80xbf16>, vector<80x64xbf16>, vector<8x64xf32> -> vector<8x64xf32>
    %19 = arith.addf %12, %18 : vector<8x64xf32>
    %c0_17 = arith.constant 0 : index
    %c0_18 = arith.constant 0 : index
    %20 = vector.load %arg4[%c0_17, %c0_18] : memref<1x64xf32, #tpu.memory_space<vmem>>, vector<1x64xf32>
    %21 = vector.broadcast %20 : vector<1x64xf32> to vector<8x64xf32>
    %22 = arith.addf %19, %21 : vector<8x64xf32>
    %c0_19 = arith.constant 0 : index
    %c0_20 = arith.constant 0 : index
    %c0_21 = arith.constant 0 : index
    %23 = vector.load %arg5[%c0_19, %c0_20, %c0_21] : memref<1x8x64xf32, #tpu.memory_space<vmem>>, vector<1x8x64xf32>
    %24 = vector.shape_cast %23 : vector<1x8x64xf32> to vector<8x64xf32>
    %25 = arith.addf %22, %24 : vector<8x64xf32>
    %cst_22 = arith.constant 0.000000e+00 : f32
    %26 = vector.broadcast %cst_22 : f32 to vector<8x64xf32>
    %27 = arith.maximumf %25, %26 : vector<8x64xf32>
    %c0_23 = arith.constant 0 : index
    %c0_24 = arith.constant 0 : index
    %c0_25 = arith.constant 0 : index
    %28 = vector.load %arg6[%c0_23, %c0_24, %c0_25] : memref<1x8x64xf32, #tpu.memory_space<vmem>>, vector<1x8x64xf32>
    %29 = vector.shape_cast %28 : vector<1x8x64xf32> to vector<8x64xf32>
    %30 = vector.shape_cast %27 : vector<8x64xf32> to vector<1x8x64xf32>
    tpu.vector_store %arg6[%c0_23, %c0_24, %c0_25], %30 {strides = array<i32>} : memref<1x8x64xf32, #tpu.memory_space<vmem>>, vector<1x8x64xf32>,
    return
  }
  func.func @transform_0(%arg0: i32, %arg1: i32) -> (i32, i32, i32) {
    %c0_i32 = arith.constant 0 : i32
    %c0_i32_0 = arith.constant 0 : i32
    %c0_i32_1 = arith.constant 0 : i32
    return %arg0, %c0_i32, %c0_i32_0 : i32, i32, i32
  }
  func.func @transform_1(%arg0: i32, %arg1: i32) -> (i32, i32, i32) {
    %c0_i32 = arith.constant 0 : i32
    %c0_i32_0 = arith.constant 0 : i32
    %c0_i32_1 = arith.constant 0 : i32
    %c0_i32_2 = arith.constant 0 : i32
    return %c0_i32, %c0_i32_0, %c0_i32_1 : i32, i32, i32
  }
  func.func @transform_2(%arg0: i32, %arg1: i32) -> (i32, i32) {
    %c0_i32 = arith.constant 0 : i32
    %c0_i32_0 = arith.constant 0 : i32
    %c0_i32_1 = arith.constant 0 : i32
    return %c0_i32, %c0_i32_0 : i32, i32
  }
  func.func @transform_3(%arg0: i32, %arg1: i32) -> (i32, i32, i32) {
    %c0_i32 = arith.constant 0 : i32
    %c0_i32_0 = arith.constant 0 : i32
    return %arg0, %arg1, %c0_i32 : i32, i32, i32
  }
  func.func @transform_4(%arg0: i32, %arg1: i32) -> (i32, i32, i32) {
    %c0_i32 = arith.constant 0 : i32
    %c0_i32_0 = arith.constant 0 : i32
    return %arg0, %arg1, %c0_i32 : i32, i32, i32
  }
}

module attributes {stable_mosaic.version = 11 : i64} {
  func.func @_conv_row_kernel(%arg0: i32, %arg1: i32, %arg2: memref<1x4x128xf32, #tpu.memory_space<vmem>>, %arg3: memref<1x128x64xbf16, #tpu.memory_space<vmem>>, %arg4: memref<1x64xf32, #tpu.memory_space<vmem>>, %arg5: memref<1x4x64xf32, #tpu.memory_space<vmem>>) attributes {dimension_semantics = [#tpu.dimension_semantics<parallel>, #tpu.dimension_semantics<parallel>], iteration_bounds = array<i64: 4, 1>, scalar_prefetch = 0 : i64, scratch_operands = 0 : i64, tpu.core_type = #tpu.core_type<tc>, window_params = [{transform_indices = @transform_0, window_bounds = array<i64: 1, 4, 128>}, {pipeline_mode = #tpu.pipeline_mode<synchronous>, transform_indices = @transform_1, window_bounds = array<i64: 1, 128, 64>}, {pipeline_mode = #tpu.pipeline_mode<synchronous>, transform_indices = @transform_2, window_bounds = array<i64: 1, 64>}, {transform_indices = @transform_3, window_bounds = array<i64: 1, 4, 64>}]} {
    %c0 = arith.constant 0 : index
    %c0_0 = arith.constant 0 : index
    %c0_1 = arith.constant 0 : index
    %0 = vector.load %arg2[%c0, %c0_0, %c0_1] : memref<1x4x128xf32, #tpu.memory_space<vmem>>, vector<1x4x128xf32>
    %1 = vector.shape_cast %0 : vector<1x4x128xf32> to vector<4x128xf32>
    %2 = arith.truncf %1 : vector<4x128xf32> to vector<4x128xbf16>
    %c0_2 = arith.constant 0 : index
    %c0_3 = arith.constant 0 : index
    %c0_4 = arith.constant 0 : index
    %3 = vector.load %arg3[%c0_2, %c0_3, %c0_4] : memref<1x128x64xbf16, #tpu.memory_space<vmem>>, vector<1x128x64xbf16>
    %4 = vector.shape_cast %3 : vector<1x128x64xbf16> to vector<128x64xbf16>
    %cst = arith.constant dense<0.000000e+00> : vector<4x64xf32>
    %5 = tpu.matmul %2, %4, %cst {dimension_numbers = #tpu.dot_dimension_numbers<[1], [0], [0], [1], [0, 0, 1, 1], [], []>} : vector<4x128xbf16>, vector<128x64xbf16>, vector<4x64xf32> -> vector<4x64xf32>
    %c0_5 = arith.constant 0 : index
    %c0_6 = arith.constant 0 : index
    %6 = vector.load %arg4[%c0_5, %c0_6] : memref<1x64xf32, #tpu.memory_space<vmem>>, vector<1x64xf32>
    %7 = vector.broadcast %6 : vector<1x64xf32> to vector<4x64xf32>
    %8 = arith.addf %5, %7 : vector<4x64xf32>
    %c0_7 = arith.constant 0 : index
    %c0_8 = arith.constant 0 : index
    %c0_9 = arith.constant 0 : index
    %9 = vector.load %arg5[%c0_7, %c0_8, %c0_9] : memref<1x4x64xf32, #tpu.memory_space<vmem>>, vector<1x4x64xf32>
    %10 = vector.shape_cast %9 : vector<1x4x64xf32> to vector<4x64xf32>
    %11 = vector.shape_cast %8 : vector<4x64xf32> to vector<1x4x64xf32>
    tpu.vector_store %arg5[%c0_7, %c0_8, %c0_9], %11 {strides = array<i32>} : memref<1x4x64xf32, #tpu.memory_space<vmem>>, vector<1x4x64xf32>,
    return
  }
  func.func @transform_0(%arg0: i32, %arg1: i32) -> (i32, i32, i32) {
    %c0_i32 = arith.constant 0 : i32
    %c0_i32_0 = arith.constant 0 : i32
    %c0_i32_1 = arith.constant 0 : i32
    return %arg0, %c0_i32, %c0_i32_0 : i32, i32, i32
  }
  func.func @transform_1(%arg0: i32, %arg1: i32) -> (i32, i32, i32) {
    %c0_i32 = arith.constant 0 : i32
    %c0_i32_0 = arith.constant 0 : i32
    %c0_i32_1 = arith.constant 0 : i32
    %c0_i32_2 = arith.constant 0 : i32
    return %c0_i32, %c0_i32_0, %c0_i32_1 : i32, i32, i32
  }
  func.func @transform_2(%arg0: i32, %arg1: i32) -> (i32, i32) {
    %c0_i32 = arith.constant 0 : i32
    %c0_i32_0 = arith.constant 0 : i32
    %c0_i32_1 = arith.constant 0 : i32
    return %c0_i32, %c0_i32_0 : i32, i32
  }
  func.func @transform_3(%arg0: i32, %arg1: i32) -> (i32, i32, i32) {
    %c0_i32 = arith.constant 0 : i32
    %c0_i32_0 = arith.constant 0 : i32
    return %arg0, %arg1, %c0_i32 : i32, i32, i32
  }
}

module attributes {stable_mosaic.version = 11 : i64} {
  func.func @_conv_row_kernel(%arg0: i32, %arg1: i32, %arg2: memref<1x5x160xf32, #tpu.memory_space<vmem>>, %arg3: memref<2x160x64xbf16, #tpu.memory_space<vmem>>, %arg4: memref<1x64xf32, #tpu.memory_space<vmem>>, %arg5: memref<1x4x64xf32, #tpu.memory_space<vmem>>) attributes {dimension_semantics = [#tpu.dimension_semantics<parallel>, #tpu.dimension_semantics<parallel>], iteration_bounds = array<i64: 4, 1>, scalar_prefetch = 0 : i64, scratch_operands = 0 : i64, tpu.core_type = #tpu.core_type<tc>, window_params = [{transform_indices = @transform_0, window_bounds = array<i64: 1, 5, 160>}, {pipeline_mode = #tpu.pipeline_mode<synchronous>, transform_indices = @transform_1, window_bounds = array<i64: 2, 160, 64>}, {pipeline_mode = #tpu.pipeline_mode<synchronous>, transform_indices = @transform_2, window_bounds = array<i64: 1, 64>}, {transform_indices = @transform_3, window_bounds = array<i64: 1, 4, 64>}]} {
    %c0 = arith.constant 0 : index
    %c0_0 = arith.constant 0 : index
    %c0_1 = arith.constant 0 : index
    %0 = vector.load %arg2[%c0, %c0_0, %c0_1] : memref<1x5x160xf32, #tpu.memory_space<vmem>>, vector<1x4x160xf32>
    %1 = vector.shape_cast %0 : vector<1x4x160xf32> to vector<4x160xf32>
    %2 = arith.truncf %1 : vector<4x160xf32> to vector<4x160xbf16>
    %c0_2 = arith.constant 0 : index
    %c0_3 = arith.constant 0 : index
    %c0_4 = arith.constant 0 : index
    %3 = vector.load %arg3[%c0_2, %c0_3, %c0_4] : memref<2x160x64xbf16, #tpu.memory_space<vmem>>, vector<1x160x64xbf16>
    %4 = vector.shape_cast %3 : vector<1x160x64xbf16> to vector<160x64xbf16>
    %cst = arith.constant dense<0.000000e+00> : vector<4x64xf32>
    %5 = tpu.matmul %2, %4, %cst {dimension_numbers = #tpu.dot_dimension_numbers<[1], [0], [0], [1], [0, 0, 1, 1], [], []>} : vector<4x160xbf16>, vector<160x64xbf16>, vector<4x64xf32> -> vector<4x64xf32>
    %c0_5 = arith.constant 0 : index
    %c1 = arith.constant 1 : index
    %c0_6 = arith.constant 0 : index
    %6 = vector.load %arg2[%c0_5, %c1, %c0_6] : memref<1x5x160xf32, #tpu.memory_space<vmem>>, vector<1x4x160xf32>
    %7 = vector.shape_cast %6 : vector<1x4x160xf32> to vector<4x160xf32>
    %8 = arith.truncf %7 : vector<4x160xf32> to vector<4x160xbf16>
    %c1_7 = arith.constant 1 : index
    %c0_8 = arith.constant 0 : index
    %c0_9 = arith.constant 0 : index
    %9 = vector.load %arg3[%c1_7, %c0_8, %c0_9] : memref<2x160x64xbf16, #tpu.memory_space<vmem>>, vector<1x160x64xbf16>
    %10 = vector.shape_cast %9 : vector<1x160x64xbf16> to vector<160x64xbf16>
    %cst_10 = arith.constant dense<0.000000e+00> : vector<4x64xf32>
    %11 = tpu.matmul %8, %10, %cst_10 {dimension_numbers = #tpu.dot_dimension_numbers<[1], [0], [0], [1], [0, 0, 1, 1], [], []>} : vector<4x160xbf16>, vector<160x64xbf16>, vector<4x64xf32> -> vector<4x64xf32>
    %12 = arith.addf %5, %11 : vector<4x64xf32>
    %c0_11 = arith.constant 0 : index
    %c0_12 = arith.constant 0 : index
    %13 = vector.load %arg4[%c0_11, %c0_12] : memref<1x64xf32, #tpu.memory_space<vmem>>, vector<1x64xf32>
    %14 = vector.broadcast %13 : vector<1x64xf32> to vector<4x64xf32>
    %15 = arith.addf %12, %14 : vector<4x64xf32>
    %cst_13 = arith.constant 0.000000e+00 : f32
    %16 = vector.broadcast %cst_13 : f32 to vector<4x64xf32>
    %17 = arith.maximumf %15, %16 : vector<4x64xf32>
    %c0_14 = arith.constant 0 : index
    %c0_15 = arith.constant 0 : index
    %c0_16 = arith.constant 0 : index
    %18 = vector.load %arg5[%c0_14, %c0_15, %c0_16] : memref<1x4x64xf32, #tpu.memory_space<vmem>>, vector<1x4x64xf32>
    %19 = vector.shape_cast %18 : vector<1x4x64xf32> to vector<4x64xf32>
    %20 = vector.shape_cast %17 : vector<4x64xf32> to vector<1x4x64xf32>
    tpu.vector_store %arg5[%c0_14, %c0_15, %c0_16], %20 {strides = array<i32>} : memref<1x4x64xf32, #tpu.memory_space<vmem>>, vector<1x4x64xf32>,
    return
  }
  func.func @transform_0(%arg0: i32, %arg1: i32) -> (i32, i32, i32) {
    %c0_i32 = arith.constant 0 : i32
    %c0_i32_0 = arith.constant 0 : i32
    %c0_i32_1 = arith.constant 0 : i32
    return %arg0, %c0_i32, %c0_i32_0 : i32, i32, i32
  }
  func.func @transform_1(%arg0: i32, %arg1: i32) -> (i32, i32, i32) {
    %c0_i32 = arith.constant 0 : i32
    %c0_i32_0 = arith.constant 0 : i32
    %c0_i32_1 = arith.constant 0 : i32
    %c0_i32_2 = arith.constant 0 : i32
    return %c0_i32, %c0_i32_0, %c0_i32_1 : i32, i32, i32
  }
  func.func @transform_2(%arg0: i32, %arg1: i32) -> (i32, i32) {
    %c0_i32 = arith.constant 0 : i32
    %c0_i32_0 = arith.constant 0 : i32
    %c0_i32_1 = arith.constant 0 : i32
    return %c0_i32, %c0_i32_0 : i32, i32
  }
  func.func @transform_3(%arg0: i32, %arg1: i32) -> (i32, i32, i32) {
    %c0_i32 = arith.constant 0 : i32
    %c0_i32_0 = arith.constant 0 : i32
    return %arg0, %arg1, %c0_i32 : i32, i32, i32
  }
}

module attributes {stable_mosaic.version = 11 : i64} {
  func.func @_conv_row_kernel(%arg0: i32, %arg1: i32, %arg2: memref<1x6x96xf32, #tpu.memory_space<vmem>>, %arg3: memref<3x96x64xbf16, #tpu.memory_space<vmem>>, %arg4: memref<1x64xf32, #tpu.memory_space<vmem>>, %arg5: memref<1x4x64xf32, #tpu.memory_space<vmem>>, %arg6: memref<1x4x64xf32, #tpu.memory_space<vmem>>) attributes {dimension_semantics = [#tpu.dimension_semantics<parallel>, #tpu.dimension_semantics<parallel>], iteration_bounds = array<i64: 4, 1>, scalar_prefetch = 0 : i64, scratch_operands = 0 : i64, tpu.core_type = #tpu.core_type<tc>, window_params = [{transform_indices = @transform_0, window_bounds = array<i64: 1, 6, 96>}, {pipeline_mode = #tpu.pipeline_mode<synchronous>, transform_indices = @transform_1, window_bounds = array<i64: 3, 96, 64>}, {pipeline_mode = #tpu.pipeline_mode<synchronous>, transform_indices = @transform_2, window_bounds = array<i64: 1, 64>}, {transform_indices = @transform_3, window_bounds = array<i64: 1, 4, 64>}, {transform_indices = @transform_4, window_bounds = array<i64: 1, 4, 64>}]} {
    %c0 = arith.constant 0 : index
    %c0_0 = arith.constant 0 : index
    %c0_1 = arith.constant 0 : index
    %0 = vector.load %arg2[%c0, %c0_0, %c0_1] : memref<1x6x96xf32, #tpu.memory_space<vmem>>, vector<1x4x96xf32>
    %1 = vector.shape_cast %0 : vector<1x4x96xf32> to vector<4x96xf32>
    %2 = arith.truncf %1 : vector<4x96xf32> to vector<4x96xbf16>
    %c0_2 = arith.constant 0 : index
    %c0_3 = arith.constant 0 : index
    %c0_4 = arith.constant 0 : index
    %3 = vector.load %arg3[%c0_2, %c0_3, %c0_4] : memref<3x96x64xbf16, #tpu.memory_space<vmem>>, vector<1x96x64xbf16>
    %4 = vector.shape_cast %3 : vector<1x96x64xbf16> to vector<96x64xbf16>
    %cst = arith.constant dense<0.000000e+00> : vector<4x64xf32>
    %5 = tpu.matmul %2, %4, %cst {dimension_numbers = #tpu.dot_dimension_numbers<[1], [0], [0], [1], [0, 0, 1, 1], [], []>} : vector<4x96xbf16>, vector<96x64xbf16>, vector<4x64xf32> -> vector<4x64xf32>
    %c0_5 = arith.constant 0 : index
    %c1 = arith.constant 1 : index
    %c0_6 = arith.constant 0 : index
    %6 = vector.load %arg2[%c0_5, %c1, %c0_6] : memref<1x6x96xf32, #tpu.memory_space<vmem>>, vector<1x4x96xf32>
    %7 = vector.shape_cast %6 : vector<1x4x96xf32> to vector<4x96xf32>
    %8 = arith.truncf %7 : vector<4x96xf32> to vector<4x96xbf16>
    %c1_7 = arith.constant 1 : index
    %c0_8 = arith.constant 0 : index
    %c0_9 = arith.constant 0 : index
    %9 = vector.load %arg3[%c1_7, %c0_8, %c0_9] : memref<3x96x64xbf16, #tpu.memory_space<vmem>>, vector<1x96x64xbf16>
    %10 = vector.shape_cast %9 : vector<1x96x64xbf16> to vector<96x64xbf16>
    %cst_10 = arith.constant dense<0.000000e+00> : vector<4x64xf32>
    %11 = tpu.matmul %8, %10, %cst_10 {dimension_numbers = #tpu.dot_dimension_numbers<[1], [0], [0], [1], [0, 0, 1, 1], [], []>} : vector<4x96xbf16>, vector<96x64xbf16>, vector<4x64xf32> -> vector<4x64xf32>
    %12 = arith.addf %5, %11 : vector<4x64xf32>
    %c0_11 = arith.constant 0 : index
    %c2 = arith.constant 2 : index
    %c0_12 = arith.constant 0 : index
    %13 = vector.load %arg2[%c0_11, %c2, %c0_12] : memref<1x6x96xf32, #tpu.memory_space<vmem>>, vector<1x4x96xf32>
    %14 = vector.shape_cast %13 : vector<1x4x96xf32> to vector<4x96xf32>
    %15 = arith.truncf %14 : vector<4x96xf32> to vector<4x96xbf16>
    %c2_13 = arith.constant 2 : index
    %c0_14 = arith.constant 0 : index
    %c0_15 = arith.constant 0 : index
    %16 = vector.load %arg3[%c2_13, %c0_14, %c0_15] : memref<3x96x64xbf16, #tpu.memory_space<vmem>>, vector<1x96x64xbf16>
    %17 = vector.shape_cast %16 : vector<1x96x64xbf16> to vector<96x64xbf16>
    %cst_16 = arith.constant dense<0.000000e+00> : vector<4x64xf32>
    %18 = tpu.matmul %15, %17, %cst_16 {dimension_numbers = #tpu.dot_dimension_numbers<[1], [0], [0], [1], [0, 0, 1, 1], [], []>} : vector<4x96xbf16>, vector<96x64xbf16>, vector<4x64xf32> -> vector<4x64xf32>
    %19 = arith.addf %12, %18 : vector<4x64xf32>
    %c0_17 = arith.constant 0 : index
    %c0_18 = arith.constant 0 : index
    %20 = vector.load %arg4[%c0_17, %c0_18] : memref<1x64xf32, #tpu.memory_space<vmem>>, vector<1x64xf32>
    %21 = vector.broadcast %20 : vector<1x64xf32> to vector<4x64xf32>
    %22 = arith.addf %19, %21 : vector<4x64xf32>
    %c0_19 = arith.constant 0 : index
    %c0_20 = arith.constant 0 : index
    %c0_21 = arith.constant 0 : index
    %23 = vector.load %arg5[%c0_19, %c0_20, %c0_21] : memref<1x4x64xf32, #tpu.memory_space<vmem>>, vector<1x4x64xf32>
    %24 = vector.shape_cast %23 : vector<1x4x64xf32> to vector<4x64xf32>
    %25 = arith.addf %22, %24 : vector<4x64xf32>
    %cst_22 = arith.constant 0.000000e+00 : f32
    %26 = vector.broadcast %cst_22 : f32 to vector<4x64xf32>
    %27 = arith.maximumf %25, %26 : vector<4x64xf32>
    %c0_23 = arith.constant 0 : index
    %c0_24 = arith.constant 0 : index
    %c0_25 = arith.constant 0 : index
    %28 = vector.load %arg6[%c0_23, %c0_24, %c0_25] : memref<1x4x64xf32, #tpu.memory_space<vmem>>, vector<1x4x64xf32>
    %29 = vector.shape_cast %28 : vector<1x4x64xf32> to vector<4x64xf32>
    %30 = vector.shape_cast %27 : vector<4x64xf32> to vector<1x4x64xf32>
    tpu.vector_store %arg6[%c0_23, %c0_24, %c0_25], %30 {strides = array<i32>} : memref<1x4x64xf32, #tpu.memory_space<vmem>>, vector<1x4x64xf32>,
    return
  }
  func.func @transform_0(%arg0: i32, %arg1: i32) -> (i32, i32, i32) {
    %c0_i32 = arith.constant 0 : i32
    %c0_i32_0 = arith.constant 0 : i32
    %c0_i32_1 = arith.constant 0 : i32
    return %arg0, %c0_i32, %c0_i32_0 : i32, i32, i32
  }
  func.func @transform_1(%arg0: i32, %arg1: i32) -> (i32, i32, i32) {
    %c0_i32 = arith.constant 0 : i32
    %c0_i32_0 = arith.constant 0 : i32
    %c0_i32_1 = arith.constant 0 : i32
    %c0_i32_2 = arith.constant 0 : i32
    return %c0_i32, %c0_i32_0, %c0_i32_1 : i32, i32, i32
  }
  func.func @transform_2(%arg0: i32, %arg1: i32) -> (i32, i32) {
    %c0_i32 = arith.constant 0 : i32
    %c0_i32_0 = arith.constant 0 : i32
    %c0_i32_1 = arith.constant 0 : i32
    return %c0_i32, %c0_i32_0 : i32, i32
  }
  func.func @transform_3(%arg0: i32, %arg1: i32) -> (i32, i32, i32) {
    %c0_i32 = arith.constant 0 : i32
    %c0_i32_0 = arith.constant 0 : i32
    return %arg0, %arg1, %c0_i32 : i32, i32, i32
  }
  func.func @transform_4(%arg0: i32, %arg1: i32) -> (i32, i32, i32) {
    %c0_i32 = arith.constant 0 : i32
    %c0_i32_0 = arith.constant 0 : i32
    return %arg0, %arg1, %c0_i32 : i32, i32, i32
  }
}

module attributes {stable_mosaic.version = 11 : i64} {
  func.func @_conv_row_kernel(%arg0: i32, %arg1: i32, %arg2: memref<1x3x192xf32, #tpu.memory_space<vmem>>, %arg3: memref<2x192x64xbf16, #tpu.memory_space<vmem>>, %arg4: memref<1x64xf32, #tpu.memory_space<vmem>>, %arg5: memref<1x2x64xf32, #tpu.memory_space<vmem>>) attributes {dimension_semantics = [#tpu.dimension_semantics<parallel>, #tpu.dimension_semantics<parallel>], iteration_bounds = array<i64: 4, 1>, scalar_prefetch = 0 : i64, scratch_operands = 0 : i64, tpu.core_type = #tpu.core_type<tc>, window_params = [{transform_indices = @transform_0, window_bounds = array<i64: 1, 3, 192>}, {pipeline_mode = #tpu.pipeline_mode<synchronous>, transform_indices = @transform_1, window_bounds = array<i64: 2, 192, 64>}, {pipeline_mode = #tpu.pipeline_mode<synchronous>, transform_indices = @transform_2, window_bounds = array<i64: 1, 64>}, {transform_indices = @transform_3, window_bounds = array<i64: 1, 2, 64>}]} {
    %c0 = arith.constant 0 : index
    %c0_0 = arith.constant 0 : index
    %c0_1 = arith.constant 0 : index
    %0 = vector.load %arg2[%c0, %c0_0, %c0_1] : memref<1x3x192xf32, #tpu.memory_space<vmem>>, vector<1x2x192xf32>
    %1 = vector.shape_cast %0 : vector<1x2x192xf32> to vector<2x192xf32>
    %2 = arith.truncf %1 : vector<2x192xf32> to vector<2x192xbf16>
    %c0_2 = arith.constant 0 : index
    %c0_3 = arith.constant 0 : index
    %c0_4 = arith.constant 0 : index
    %3 = vector.load %arg3[%c0_2, %c0_3, %c0_4] : memref<2x192x64xbf16, #tpu.memory_space<vmem>>, vector<1x192x64xbf16>
    %4 = vector.shape_cast %3 : vector<1x192x64xbf16> to vector<192x64xbf16>
    %cst = arith.constant dense<0.000000e+00> : vector<2x64xf32>
    %5 = tpu.matmul %2, %4, %cst {dimension_numbers = #tpu.dot_dimension_numbers<[1], [0], [0], [1], [0, 0, 1, 1], [], []>} : vector<2x192xbf16>, vector<192x64xbf16>, vector<2x64xf32> -> vector<2x64xf32>
    %c0_5 = arith.constant 0 : index
    %c1 = arith.constant 1 : index
    %c0_6 = arith.constant 0 : index
    %6 = vector.load %arg2[%c0_5, %c1, %c0_6] : memref<1x3x192xf32, #tpu.memory_space<vmem>>, vector<1x2x192xf32>
    %7 = vector.shape_cast %6 : vector<1x2x192xf32> to vector<2x192xf32>
    %8 = arith.truncf %7 : vector<2x192xf32> to vector<2x192xbf16>
    %c1_7 = arith.constant 1 : index
    %c0_8 = arith.constant 0 : index
    %c0_9 = arith.constant 0 : index
    %9 = vector.load %arg3[%c1_7, %c0_8, %c0_9] : memref<2x192x64xbf16, #tpu.memory_space<vmem>>, vector<1x192x64xbf16>
    %10 = vector.shape_cast %9 : vector<1x192x64xbf16> to vector<192x64xbf16>
    %cst_10 = arith.constant dense<0.000000e+00> : vector<2x64xf32>
    %11 = tpu.matmul %8, %10, %cst_10 {dimension_numbers = #tpu.dot_dimension_numbers<[1], [0], [0], [1], [0, 0, 1, 1], [], []>} : vector<2x192xbf16>, vector<192x64xbf16>, vector<2x64xf32> -> vector<2x64xf32>
    %12 = arith.addf %5, %11 : vector<2x64xf32>
    %c0_11 = arith.constant 0 : index
    %c0_12 = arith.constant 0 : index
    %13 = vector.load %arg4[%c0_11, %c0_12] : memref<1x64xf32, #tpu.memory_space<vmem>>, vector<1x64xf32>
    %14 = vector.broadcast %13 : vector<1x64xf32> to vector<2x64xf32>
    %15 = arith.addf %12, %14 : vector<2x64xf32>
    %cst_13 = arith.constant 0.000000e+00 : f32
    %16 = vector.broadcast %cst_13 : f32 to vector<2x64xf32>
    %17 = arith.maximumf %15, %16 : vector<2x64xf32>
    %c0_14 = arith.constant 0 : index
    %c0_15 = arith.constant 0 : index
    %c0_16 = arith.constant 0 : index
    %18 = vector.load %arg5[%c0_14, %c0_15, %c0_16] : memref<1x2x64xf32, #tpu.memory_space<vmem>>, vector<1x2x64xf32>
    %19 = vector.shape_cast %18 : vector<1x2x64xf32> to vector<2x64xf32>
    %20 = vector.shape_cast %17 : vector<2x64xf32> to vector<1x2x64xf32>
    tpu.vector_store %arg5[%c0_14, %c0_15, %c0_16], %20 {strides = array<i32>} : memref<1x2x64xf32, #tpu.memory_space<vmem>>, vector<1x2x64xf32>,
    return
  }
  func.func @transform_0(%arg0: i32, %arg1: i32) -> (i32, i32, i32) {
    %c0_i32 = arith.constant 0 : i32
    %c0_i32_0 = arith.constant 0 : i32
    %c0_i32_1 = arith.constant 0 : i32
    return %arg0, %c0_i32, %c0_i32_0 : i32, i32, i32
  }
  func.func @transform_1(%arg0: i32, %arg1: i32) -> (i32, i32, i32) {
    %c0_i32 = arith.constant 0 : i32
    %c0_i32_0 = arith.constant 0 : i32
    %c0_i32_1 = arith.constant 0 : i32
    %c0_i32_2 = arith.constant 0 : i32
    return %c0_i32, %c0_i32_0, %c0_i32_1 : i32, i32, i32
  }
  func.func @transform_2(%arg0: i32, %arg1: i32) -> (i32, i32) {
    %c0_i32 = arith.constant 0 : i32
    %c0_i32_0 = arith.constant 0 : i32
    %c0_i32_1 = arith.constant 0 : i32
    return %c0_i32, %c0_i32_0 : i32, i32
  }
  func.func @transform_3(%arg0: i32, %arg1: i32) -> (i32, i32, i32) {
    %c0_i32 = arith.constant 0 : i32
    %c0_i32_0 = arith.constant 0 : i32
    return %arg0, %arg1, %c0_i32 : i32, i32, i32
  }
}

module attributes {stable_mosaic.version = 11 : i64} {
  func.func @_conv_row_kernel(%arg0: i32, %arg1: i32, %arg2: memref<1x2x128xf32, #tpu.memory_space<vmem>>, %arg3: memref<1x128x64xbf16, #tpu.memory_space<vmem>>, %arg4: memref<1x64xf32, #tpu.memory_space<vmem>>, %arg5: memref<1x2x64xf32, #tpu.memory_space<vmem>>) attributes {dimension_semantics = [#tpu.dimension_semantics<parallel>, #tpu.dimension_semantics<parallel>], iteration_bounds = array<i64: 4, 1>, scalar_prefetch = 0 : i64, scratch_operands = 0 : i64, tpu.core_type = #tpu.core_type<tc>, window_params = [{transform_indices = @transform_0, window_bounds = array<i64: 1, 2, 128>}, {pipeline_mode = #tpu.pipeline_mode<synchronous>, transform_indices = @transform_1, window_bounds = array<i64: 1, 128, 64>}, {pipeline_mode = #tpu.pipeline_mode<synchronous>, transform_indices = @transform_2, window_bounds = array<i64: 1, 64>}, {transform_indices = @transform_3, window_bounds = array<i64: 1, 2, 64>}]} {
    %c0 = arith.constant 0 : index
    %c0_0 = arith.constant 0 : index
    %c0_1 = arith.constant 0 : index
    %0 = vector.load %arg2[%c0, %c0_0, %c0_1] : memref<1x2x128xf32, #tpu.memory_space<vmem>>, vector<1x2x128xf32>
    %1 = vector.shape_cast %0 : vector<1x2x128xf32> to vector<2x128xf32>
    %2 = arith.truncf %1 : vector<2x128xf32> to vector<2x128xbf16>
    %c0_2 = arith.constant 0 : index
    %c0_3 = arith.constant 0 : index
    %c0_4 = arith.constant 0 : index
    %3 = vector.load %arg3[%c0_2, %c0_3, %c0_4] : memref<1x128x64xbf16, #tpu.memory_space<vmem>>, vector<1x128x64xbf16>
    %4 = vector.shape_cast %3 : vector<1x128x64xbf16> to vector<128x64xbf16>
    %cst = arith.constant dense<0.000000e+00> : vector<2x64xf32>
    %5 = tpu.matmul %2, %4, %cst {dimension_numbers = #tpu.dot_dimension_numbers<[1], [0], [0], [1], [0, 0, 1, 1], [], []>} : vector<2x128xbf16>, vector<128x64xbf16>, vector<2x64xf32> -> vector<2x64xf32>
    %c0_5 = arith.constant 0 : index
    %c0_6 = arith.constant 0 : index
    %6 = vector.load %arg4[%c0_5, %c0_6] : memref<1x64xf32, #tpu.memory_space<vmem>>, vector<1x64xf32>
    %7 = vector.broadcast %6 : vector<1x64xf32> to vector<2x64xf32>
    %8 = arith.addf %5, %7 : vector<2x64xf32>
    %c0_7 = arith.constant 0 : index
    %c0_8 = arith.constant 0 : index
    %c0_9 = arith.constant 0 : index
    %9 = vector.load %arg5[%c0_7, %c0_8, %c0_9] : memref<1x2x64xf32, #tpu.memory_space<vmem>>, vector<1x2x64xf32>
    %10 = vector.shape_cast %9 : vector<1x2x64xf32> to vector<2x64xf32>
    %11 = vector.shape_cast %8 : vector<2x64xf32> to vector<1x2x64xf32>
    tpu.vector_store %arg5[%c0_7, %c0_8, %c0_9], %11 {strides = array<i32>} : memref<1x2x64xf32, #tpu.memory_space<vmem>>, vector<1x2x64xf32>,
    return
  }
  func.func @transform_0(%arg0: i32, %arg1: i32) -> (i32, i32, i32) {
    %c0_i32 = arith.constant 0 : i32
    %c0_i32_0 = arith.constant 0 : i32
    %c0_i32_1 = arith.constant 0 : i32
    return %arg0, %c0_i32, %c0_i32_0 : i32, i32, i32
  }
  func.func @transform_1(%arg0: i32, %arg1: i32) -> (i32, i32, i32) {
    %c0_i32 = arith.constant 0 : i32
    %c0_i32_0 = arith.constant 0 : i32
    %c0_i32_1 = arith.constant 0 : i32
    %c0_i32_2 = arith.constant 0 : i32
    return %c0_i32, %c0_i32_0, %c0_i32_1 : i32, i32, i32
  }
  func.func @transform_2(%arg0: i32, %arg1: i32) -> (i32, i32) {
    %c0_i32 = arith.constant 0 : i32
    %c0_i32_0 = arith.constant 0 : i32
    %c0_i32_1 = arith.constant 0 : i32
    return %c0_i32, %c0_i32_0 : i32, i32
  }
  func.func @transform_3(%arg0: i32, %arg1: i32) -> (i32, i32, i32) {
    %c0_i32 = arith.constant 0 : i32
    %c0_i32_0 = arith.constant 0 : i32
    return %arg0, %arg1, %c0_i32 : i32, i32, i32
  }
}

module attributes {stable_mosaic.version = 11 : i64} {
  func.func @_conv_row_kernel(%arg0: i32, %arg1: i32, %arg2: memref<1x4x128xf32, #tpu.memory_space<vmem>>, %arg3: memref<3x128x64xbf16, #tpu.memory_space<vmem>>, %arg4: memref<1x64xf32, #tpu.memory_space<vmem>>, %arg5: memref<1x2x64xf32, #tpu.memory_space<vmem>>, %arg6: memref<1x2x64xf32, #tpu.memory_space<vmem>>) attributes {dimension_semantics = [#tpu.dimension_semantics<parallel>, #tpu.dimension_semantics<parallel>], iteration_bounds = array<i64: 4, 1>, scalar_prefetch = 0 : i64, scratch_operands = 0 : i64, tpu.core_type = #tpu.core_type<tc>, window_params = [{transform_indices = @transform_0, window_bounds = array<i64: 1, 4, 128>}, {pipeline_mode = #tpu.pipeline_mode<synchronous>, transform_indices = @transform_1, window_bounds = array<i64: 3, 128, 64>}, {pipeline_mode = #tpu.pipeline_mode<synchronous>, transform_indices = @transform_2, window_bounds = array<i64: 1, 64>}, {transform_indices = @transform_3, window_bounds = array<i64: 1, 2, 64>}, {transform_indices = @transform_4, window_bounds = array<i64: 1, 2, 64>}]} {
    %c0 = arith.constant 0 : index
    %c0_0 = arith.constant 0 : index
    %c0_1 = arith.constant 0 : index
    %0 = vector.load %arg2[%c0, %c0_0, %c0_1] : memref<1x4x128xf32, #tpu.memory_space<vmem>>, vector<1x2x128xf32>
    %1 = vector.shape_cast %0 : vector<1x2x128xf32> to vector<2x128xf32>
    %2 = arith.truncf %1 : vector<2x128xf32> to vector<2x128xbf16>
    %c0_2 = arith.constant 0 : index
    %c0_3 = arith.constant 0 : index
    %c0_4 = arith.constant 0 : index
    %3 = vector.load %arg3[%c0_2, %c0_3, %c0_4] : memref<3x128x64xbf16, #tpu.memory_space<vmem>>, vector<1x128x64xbf16>
    %4 = vector.shape_cast %3 : vector<1x128x64xbf16> to vector<128x64xbf16>
    %cst = arith.constant dense<0.000000e+00> : vector<2x64xf32>
    %5 = tpu.matmul %2, %4, %cst {dimension_numbers = #tpu.dot_dimension_numbers<[1], [0], [0], [1], [0, 0, 1, 1], [], []>} : vector<2x128xbf16>, vector<128x64xbf16>, vector<2x64xf32> -> vector<2x64xf32>
    %c0_5 = arith.constant 0 : index
    %c1 = arith.constant 1 : index
    %c0_6 = arith.constant 0 : index
    %6 = vector.load %arg2[%c0_5, %c1, %c0_6] : memref<1x4x128xf32, #tpu.memory_space<vmem>>, vector<1x2x128xf32>
    %7 = vector.shape_cast %6 : vector<1x2x128xf32> to vector<2x128xf32>
    %8 = arith.truncf %7 : vector<2x128xf32> to vector<2x128xbf16>
    %c1_7 = arith.constant 1 : index
    %c0_8 = arith.constant 0 : index
    %c0_9 = arith.constant 0 : index
    %9 = vector.load %arg3[%c1_7, %c0_8, %c0_9] : memref<3x128x64xbf16, #tpu.memory_space<vmem>>, vector<1x128x64xbf16>
    %10 = vector.shape_cast %9 : vector<1x128x64xbf16> to vector<128x64xbf16>
    %cst_10 = arith.constant dense<0.000000e+00> : vector<2x64xf32>
    %11 = tpu.matmul %8, %10, %cst_10 {dimension_numbers = #tpu.dot_dimension_numbers<[1], [0], [0], [1], [0, 0, 1, 1], [], []>} : vector<2x128xbf16>, vector<128x64xbf16>, vector<2x64xf32> -> vector<2x64xf32>
    %12 = arith.addf %5, %11 : vector<2x64xf32>
    %c0_11 = arith.constant 0 : index
    %c2 = arith.constant 2 : index
    %c0_12 = arith.constant 0 : index
    %13 = vector.load %arg2[%c0_11, %c2, %c0_12] : memref<1x4x128xf32, #tpu.memory_space<vmem>>, vector<1x2x128xf32>
    %14 = vector.shape_cast %13 : vector<1x2x128xf32> to vector<2x128xf32>
    %15 = arith.truncf %14 : vector<2x128xf32> to vector<2x128xbf16>
    %c2_13 = arith.constant 2 : index
    %c0_14 = arith.constant 0 : index
    %c0_15 = arith.constant 0 : index
    %16 = vector.load %arg3[%c2_13, %c0_14, %c0_15] : memref<3x128x64xbf16, #tpu.memory_space<vmem>>, vector<1x128x64xbf16>
    %17 = vector.shape_cast %16 : vector<1x128x64xbf16> to vector<128x64xbf16>
    %cst_16 = arith.constant dense<0.000000e+00> : vector<2x64xf32>
    %18 = tpu.matmul %15, %17, %cst_16 {dimension_numbers = #tpu.dot_dimension_numbers<[1], [0], [0], [1], [0, 0, 1, 1], [], []>} : vector<2x128xbf16>, vector<128x64xbf16>, vector<2x64xf32> -> vector<2x64xf32>
    %19 = arith.addf %12, %18 : vector<2x64xf32>
    %c0_17 = arith.constant 0 : index
    %c0_18 = arith.constant 0 : index
    %20 = vector.load %arg4[%c0_17, %c0_18] : memref<1x64xf32, #tpu.memory_space<vmem>>, vector<1x64xf32>
    %21 = vector.broadcast %20 : vector<1x64xf32> to vector<2x64xf32>
    %22 = arith.addf %19, %21 : vector<2x64xf32>
    %c0_19 = arith.constant 0 : index
    %c0_20 = arith.constant 0 : index
    %c0_21 = arith.constant 0 : index
    %23 = vector.load %arg5[%c0_19, %c0_20, %c0_21] : memref<1x2x64xf32, #tpu.memory_space<vmem>>, vector<1x2x64xf32>
    %24 = vector.shape_cast %23 : vector<1x2x64xf32> to vector<2x64xf32>
    %25 = arith.addf %22, %24 : vector<2x64xf32>
    %cst_22 = arith.constant 0.000000e+00 : f32
    %26 = vector.broadcast %cst_22 : f32 to vector<2x64xf32>
    %27 = arith.maximumf %25, %26 : vector<2x64xf32>
    %c0_23 = arith.constant 0 : index
    %c0_24 = arith.constant 0 : index
    %c0_25 = arith.constant 0 : index
    %28 = vector.load %arg6[%c0_23, %c0_24, %c0_25] : memref<1x2x64xf32, #tpu.memory_space<vmem>>, vector<1x2x64xf32>
    %29 = vector.shape_cast %28 : vector<1x2x64xf32> to vector<2x64xf32>
    %30 = vector.shape_cast %27 : vector<2x64xf32> to vector<1x2x64xf32>
    tpu.vector_store %arg6[%c0_23, %c0_24, %c0_25], %30 {strides = array<i32>} : memref<1x2x64xf32, #tpu.memory_space<vmem>>, vector<1x2x64xf32>,
    return
  }
  func.func @transform_0(%arg0: i32, %arg1: i32) -> (i32, i32, i32) {
    %c0_i32 = arith.constant 0 : i32
    %c0_i32_0 = arith.constant 0 : i32
    %c0_i32_1 = arith.constant 0 : i32
    return %arg0, %c0_i32, %c0_i32_0 : i32, i32, i32
  }
  func.func @transform_1(%arg0: i32, %arg1: i32) -> (i32, i32, i32) {
    %c0_i32 = arith.constant 0 : i32
    %c0_i32_0 = arith.constant 0 : i32
    %c0_i32_1 = arith.constant 0 : i32
    %c0_i32_2 = arith.constant 0 : i32
    return %c0_i32, %c0_i32_0, %c0_i32_1 : i32, i32, i32
  }
  func.func @transform_2(%arg0: i32, %arg1: i32) -> (i32, i32) {
    %c0_i32 = arith.constant 0 : i32
    %c0_i32_0 = arith.constant 0 : i32
    %c0_i32_1 = arith.constant 0 : i32
    return %c0_i32, %c0_i32_0 : i32, i32
  }
  func.func @transform_3(%arg0: i32, %arg1: i32) -> (i32, i32, i32) {
    %c0_i32 = arith.constant 0 : i32
    %c0_i32_0 = arith.constant 0 : i32
    return %arg0, %arg1, %c0_i32 : i32, i32, i32
  }
  func.func @transform_4(%arg0: i32, %arg1: i32) -> (i32, i32, i32) {
    %c0_i32 = arith.constant 0 : i32
    %c0_i32_0 = arith.constant 0 : i32
    return %arg0, %arg1, %c0_i32 : i32, i32, i32
  }
}

module attributes {stable_mosaic.version = 11 : i64} {
  func.func @_conv_row_kernel(%arg0: i32, %arg1: i32, %arg2: memref<1x2x256xf32, #tpu.memory_space<vmem>>, %arg3: memref<2x256x64xbf16, #tpu.memory_space<vmem>>, %arg4: memref<1x64xf32, #tpu.memory_space<vmem>>, %arg5: memref<1x1x64xf32, #tpu.memory_space<vmem>>) attributes {dimension_semantics = [#tpu.dimension_semantics<parallel>, #tpu.dimension_semantics<parallel>], iteration_bounds = array<i64: 4, 1>, scalar_prefetch = 0 : i64, scratch_operands = 0 : i64, tpu.core_type = #tpu.core_type<tc>, window_params = [{transform_indices = @transform_0, window_bounds = array<i64: 1, 2, 256>}, {pipeline_mode = #tpu.pipeline_mode<synchronous>, transform_indices = @transform_1, window_bounds = array<i64: 2, 256, 64>}, {pipeline_mode = #tpu.pipeline_mode<synchronous>, transform_indices = @transform_2, window_bounds = array<i64: 1, 64>}, {transform_indices = @transform_3, window_bounds = array<i64: 1, 1, 64>}]} {
    %c0 = arith.constant 0 : index
    %c0_0 = arith.constant 0 : index
    %c0_1 = arith.constant 0 : index
    %0 = vector.load %arg2[%c0, %c0_0, %c0_1] : memref<1x2x256xf32, #tpu.memory_space<vmem>>, vector<1x1x256xf32>
    %1 = vector.shape_cast %0 : vector<1x1x256xf32> to vector<1x256xf32>
    %2 = arith.truncf %1 : vector<1x256xf32> to vector<1x256xbf16>
    %c0_2 = arith.constant 0 : index
    %c0_3 = arith.constant 0 : index
    %c0_4 = arith.constant 0 : index
    %3 = vector.load %arg3[%c0_2, %c0_3, %c0_4] : memref<2x256x64xbf16, #tpu.memory_space<vmem>>, vector<1x256x64xbf16>
    %4 = vector.shape_cast %3 : vector<1x256x64xbf16> to vector<256x64xbf16>
    %cst = arith.constant dense<0.000000e+00> : vector<1x64xf32>
    %5 = tpu.matmul %2, %4, %cst {dimension_numbers = #tpu.dot_dimension_numbers<[1], [0], [0], [1], [0, 0, 1, 1], [], []>} : vector<1x256xbf16>, vector<256x64xbf16>, vector<1x64xf32> -> vector<1x64xf32>
    %c0_5 = arith.constant 0 : index
    %c1 = arith.constant 1 : index
    %c0_6 = arith.constant 0 : index
    %6 = vector.load %arg2[%c0_5, %c1, %c0_6] : memref<1x2x256xf32, #tpu.memory_space<vmem>>, vector<1x1x256xf32>
    %7 = vector.shape_cast %6 : vector<1x1x256xf32> to vector<1x256xf32>
    %8 = arith.truncf %7 : vector<1x256xf32> to vector<1x256xbf16>
    %c1_7 = arith.constant 1 : index
    %c0_8 = arith.constant 0 : index
    %c0_9 = arith.constant 0 : index
    %9 = vector.load %arg3[%c1_7, %c0_8, %c0_9] : memref<2x256x64xbf16, #tpu.memory_space<vmem>>, vector<1x256x64xbf16>
    %10 = vector.shape_cast %9 : vector<1x256x64xbf16> to vector<256x64xbf16>
    %cst_10 = arith.constant dense<0.000000e+00> : vector<1x64xf32>
    %11 = tpu.matmul %8, %10, %cst_10 {dimension_numbers = #tpu.dot_dimension_numbers<[1], [0], [0], [1], [0, 0, 1, 1], [], []>} : vector<1x256xbf16>, vector<256x64xbf16>, vector<1x64xf32> -> vector<1x64xf32>
    %12 = arith.addf %5, %11 : vector<1x64xf32>
    %c0_11 = arith.constant 0 : index
    %c0_12 = arith.constant 0 : index
    %13 = vector.load %arg4[%c0_11, %c0_12] : memref<1x64xf32, #tpu.memory_space<vmem>>, vector<1x64xf32>
    %14 = arith.addf %12, %13 : vector<1x64xf32>
    %cst_13 = arith.constant 0.000000e+00 : f32
    %15 = vector.broadcast %cst_13 : f32 to vector<1x64xf32>
    %16 = arith.maximumf %14, %15 : vector<1x64xf32>
    %c0_14 = arith.constant 0 : index
    %c0_15 = arith.constant 0 : index
    %c0_16 = arith.constant 0 : index
    %17 = vector.load %arg5[%c0_14, %c0_15, %c0_16] : memref<1x1x64xf32, #tpu.memory_space<vmem>>, vector<1x1x64xf32>
    %18 = vector.shape_cast %17 : vector<1x1x64xf32> to vector<1x64xf32>
    %19 = vector.shape_cast %16 : vector<1x64xf32> to vector<1x1x64xf32>
    tpu.vector_store %arg5[%c0_14, %c0_15, %c0_16], %19 {strides = array<i32>} : memref<1x1x64xf32, #tpu.memory_space<vmem>>, vector<1x1x64xf32>,
    return
  }
  func.func @transform_0(%arg0: i32, %arg1: i32) -> (i32, i32, i32) {
    %c0_i32 = arith.constant 0 : i32
    %c0_i32_0 = arith.constant 0 : i32
    %c0_i32_1 = arith.constant 0 : i32
    return %arg0, %c0_i32, %c0_i32_0 : i32, i32, i32
  }
  func.func @transform_1(%arg0: i32, %arg1: i32) -> (i32, i32, i32) {
    %c0_i32 = arith.constant 0 : i32
    %c0_i32_0 = arith.constant 0 : i32
    %c0_i32_1 = arith.constant 0 : i32
    %c0_i32_2 = arith.constant 0 : i32
    return %c0_i32, %c0_i32_0, %c0_i32_1 : i32, i32, i32
  }
  func.func @transform_2(%arg0: i32, %arg1: i32) -> (i32, i32) {
    %c0_i32 = arith.constant 0 : i32
    %c0_i32_0 = arith.constant 0 : i32
    %c0_i32_1 = arith.constant 0 : i32
    return %c0_i32, %c0_i32_0 : i32, i32
  }
  func.func @transform_3(%arg0: i32, %arg1: i32) -> (i32, i32, i32) {
    %c0_i32 = arith.constant 0 : i32
    %c0_i32_0 = arith.constant 0 : i32
    return %arg0, %arg1, %c0_i32 : i32, i32, i32
  }
}

module attributes {stable_mosaic.version = 11 : i64} {
  func.func @_conv_row_kernel(%arg0: i32, %arg1: i32, %arg2: memref<1x1x128xf32, #tpu.memory_space<vmem>>, %arg3: memref<1x128x64xbf16, #tpu.memory_space<vmem>>, %arg4: memref<1x64xf32, #tpu.memory_space<vmem>>, %arg5: memref<1x1x64xf32, #tpu.memory_space<vmem>>) attributes {dimension_semantics = [#tpu.dimension_semantics<parallel>, #tpu.dimension_semantics<parallel>], iteration_bounds = array<i64: 4, 1>, scalar_prefetch = 0 : i64, scratch_operands = 0 : i64, tpu.core_type = #tpu.core_type<tc>, window_params = [{transform_indices = @transform_0, window_bounds = array<i64: 1, 1, 128>}, {pipeline_mode = #tpu.pipeline_mode<synchronous>, transform_indices = @transform_1, window_bounds = array<i64: 1, 128, 64>}, {pipeline_mode = #tpu.pipeline_mode<synchronous>, transform_indices = @transform_2, window_bounds = array<i64: 1, 64>}, {transform_indices = @transform_3, window_bounds = array<i64: 1, 1, 64>}]} {
    %c0 = arith.constant 0 : index
    %c0_0 = arith.constant 0 : index
    %c0_1 = arith.constant 0 : index
    %0 = vector.load %arg2[%c0, %c0_0, %c0_1] : memref<1x1x128xf32, #tpu.memory_space<vmem>>, vector<1x1x128xf32>
    %1 = vector.shape_cast %0 : vector<1x1x128xf32> to vector<1x128xf32>
    %2 = arith.truncf %1 : vector<1x128xf32> to vector<1x128xbf16>
    %c0_2 = arith.constant 0 : index
    %c0_3 = arith.constant 0 : index
    %c0_4 = arith.constant 0 : index
    %3 = vector.load %arg3[%c0_2, %c0_3, %c0_4] : memref<1x128x64xbf16, #tpu.memory_space<vmem>>, vector<1x128x64xbf16>
    %4 = vector.shape_cast %3 : vector<1x128x64xbf16> to vector<128x64xbf16>
    %cst = arith.constant dense<0.000000e+00> : vector<1x64xf32>
    %5 = tpu.matmul %2, %4, %cst {dimension_numbers = #tpu.dot_dimension_numbers<[1], [0], [0], [1], [0, 0, 1, 1], [], []>} : vector<1x128xbf16>, vector<128x64xbf16>, vector<1x64xf32> -> vector<1x64xf32>
    %c0_5 = arith.constant 0 : index
    %c0_6 = arith.constant 0 : index
    %6 = vector.load %arg4[%c0_5, %c0_6] : memref<1x64xf32, #tpu.memory_space<vmem>>, vector<1x64xf32>
    %7 = arith.addf %5, %6 : vector<1x64xf32>
    %c0_7 = arith.constant 0 : index
    %c0_8 = arith.constant 0 : index
    %c0_9 = arith.constant 0 : index
    %8 = vector.load %arg5[%c0_7, %c0_8, %c0_9] : memref<1x1x64xf32, #tpu.memory_space<vmem>>, vector<1x1x64xf32>
    %9 = vector.shape_cast %8 : vector<1x1x64xf32> to vector<1x64xf32>
    %10 = vector.shape_cast %7 : vector<1x64xf32> to vector<1x1x64xf32>
    tpu.vector_store %arg5[%c0_7, %c0_8, %c0_9], %10 {strides = array<i32>} : memref<1x1x64xf32, #tpu.memory_space<vmem>>, vector<1x1x64xf32>,
    return
  }
  func.func @transform_0(%arg0: i32, %arg1: i32) -> (i32, i32, i32) {
    %c0_i32 = arith.constant 0 : i32
    %c0_i32_0 = arith.constant 0 : i32
    %c0_i32_1 = arith.constant 0 : i32
    return %arg0, %c0_i32, %c0_i32_0 : i32, i32, i32
  }
  func.func @transform_1(%arg0: i32, %arg1: i32) -> (i32, i32, i32) {
    %c0_i32 = arith.constant 0 : i32
    %c0_i32_0 = arith.constant 0 : i32
    %c0_i32_1 = arith.constant 0 : i32
    %c0_i32_2 = arith.constant 0 : i32
    return %c0_i32, %c0_i32_0, %c0_i32_1 : i32, i32, i32
  }
  func.func @transform_2(%arg0: i32, %arg1: i32) -> (i32, i32) {
    %c0_i32 = arith.constant 0 : i32
    %c0_i32_0 = arith.constant 0 : i32
    %c0_i32_1 = arith.constant 0 : i32
    return %c0_i32, %c0_i32_0 : i32, i32
  }
  func.func @transform_3(%arg0: i32, %arg1: i32) -> (i32, i32, i32) {
    %c0_i32 = arith.constant 0 : i32
    %c0_i32_0 = arith.constant 0 : i32
    return %arg0, %arg1, %c0_i32 : i32, i32, i32
  }
}

module attributes {stable_mosaic.version = 11 : i64} {
  func.func @_conv_row_kernel(%arg0: i32, %arg1: i32, %arg2: memref<1x3x192xf32, #tpu.memory_space<vmem>>, %arg3: memref<3x192x64xbf16, #tpu.memory_space<vmem>>, %arg4: memref<1x64xf32, #tpu.memory_space<vmem>>, %arg5: memref<1x1x64xf32, #tpu.memory_space<vmem>>, %arg6: memref<1x1x64xf32, #tpu.memory_space<vmem>>) attributes {dimension_semantics = [#tpu.dimension_semantics<parallel>, #tpu.dimension_semantics<parallel>], iteration_bounds = array<i64: 4, 1>, scalar_prefetch = 0 : i64, scratch_operands = 0 : i64, tpu.core_type = #tpu.core_type<tc>, window_params = [{transform_indices = @transform_0, window_bounds = array<i64: 1, 3, 192>}, {pipeline_mode = #tpu.pipeline_mode<synchronous>, transform_indices = @transform_1, window_bounds = array<i64: 3, 192, 64>}, {pipeline_mode = #tpu.pipeline_mode<synchronous>, transform_indices = @transform_2, window_bounds = array<i64: 1, 64>}, {transform_indices = @transform_3, window_bounds = array<i64: 1, 1, 64>}, {transform_indices = @transform_4, window_bounds = array<i64: 1, 1, 64>}]} {
    %c0 = arith.constant 0 : index
    %c0_0 = arith.constant 0 : index
    %c0_1 = arith.constant 0 : index
    %0 = vector.load %arg2[%c0, %c0_0, %c0_1] : memref<1x3x192xf32, #tpu.memory_space<vmem>>, vector<1x1x192xf32>
    %1 = vector.shape_cast %0 : vector<1x1x192xf32> to vector<1x192xf32>
    %2 = arith.truncf %1 : vector<1x192xf32> to vector<1x192xbf16>
    %c0_2 = arith.constant 0 : index
    %c0_3 = arith.constant 0 : index
    %c0_4 = arith.constant 0 : index
    %3 = vector.load %arg3[%c0_2, %c0_3, %c0_4] : memref<3x192x64xbf16, #tpu.memory_space<vmem>>, vector<1x192x64xbf16>
    %4 = vector.shape_cast %3 : vector<1x192x64xbf16> to vector<192x64xbf16>
    %cst = arith.constant dense<0.000000e+00> : vector<1x64xf32>
    %5 = tpu.matmul %2, %4, %cst {dimension_numbers = #tpu.dot_dimension_numbers<[1], [0], [0], [1], [0, 0, 1, 1], [], []>} : vector<1x192xbf16>, vector<192x64xbf16>, vector<1x64xf32> -> vector<1x64xf32>
    %c0_5 = arith.constant 0 : index
    %c1 = arith.constant 1 : index
    %c0_6 = arith.constant 0 : index
    %6 = vector.load %arg2[%c0_5, %c1, %c0_6] : memref<1x3x192xf32, #tpu.memory_space<vmem>>, vector<1x1x192xf32>
    %7 = vector.shape_cast %6 : vector<1x1x192xf32> to vector<1x192xf32>
    %8 = arith.truncf %7 : vector<1x192xf32> to vector<1x192xbf16>
    %c1_7 = arith.constant 1 : index
    %c0_8 = arith.constant 0 : index
    %c0_9 = arith.constant 0 : index
    %9 = vector.load %arg3[%c1_7, %c0_8, %c0_9] : memref<3x192x64xbf16, #tpu.memory_space<vmem>>, vector<1x192x64xbf16>
    %10 = vector.shape_cast %9 : vector<1x192x64xbf16> to vector<192x64xbf16>
    %cst_10 = arith.constant dense<0.000000e+00> : vector<1x64xf32>
    %11 = tpu.matmul %8, %10, %cst_10 {dimension_numbers = #tpu.dot_dimension_numbers<[1], [0], [0], [1], [0, 0, 1, 1], [], []>} : vector<1x192xbf16>, vector<192x64xbf16>, vector<1x64xf32> -> vector<1x64xf32>
    %12 = arith.addf %5, %11 : vector<1x64xf32>
    %c0_11 = arith.constant 0 : index
    %c2 = arith.constant 2 : index
    %c0_12 = arith.constant 0 : index
    %13 = vector.load %arg2[%c0_11, %c2, %c0_12] : memref<1x3x192xf32, #tpu.memory_space<vmem>>, vector<1x1x192xf32>
    %14 = vector.shape_cast %13 : vector<1x1x192xf32> to vector<1x192xf32>
    %15 = arith.truncf %14 : vector<1x192xf32> to vector<1x192xbf16>
    %c2_13 = arith.constant 2 : index
    %c0_14 = arith.constant 0 : index
    %c0_15 = arith.constant 0 : index
    %16 = vector.load %arg3[%c2_13, %c0_14, %c0_15] : memref<3x192x64xbf16, #tpu.memory_space<vmem>>, vector<1x192x64xbf16>
    %17 = vector.shape_cast %16 : vector<1x192x64xbf16> to vector<192x64xbf16>
    %cst_16 = arith.constant dense<0.000000e+00> : vector<1x64xf32>
    %18 = tpu.matmul %15, %17, %cst_16 {dimension_numbers = #tpu.dot_dimension_numbers<[1], [0], [0], [1], [0, 0, 1, 1], [], []>} : vector<1x192xbf16>, vector<192x64xbf16>, vector<1x64xf32> -> vector<1x64xf32>
    %19 = arith.addf %12, %18 : vector<1x64xf32>
    %c0_17 = arith.constant 0 : index
    %c0_18 = arith.constant 0 : index
    %20 = vector.load %arg4[%c0_17, %c0_18] : memref<1x64xf32, #tpu.memory_space<vmem>>, vector<1x64xf32>
    %21 = arith.addf %19, %20 : vector<1x64xf32>
    %c0_19 = arith.constant 0 : index
    %c0_20 = arith.constant 0 : index
    %c0_21 = arith.constant 0 : index
    %22 = vector.load %arg5[%c0_19, %c0_20, %c0_21] : memref<1x1x64xf32, #tpu.memory_space<vmem>>, vector<1x1x64xf32>
    %23 = vector.shape_cast %22 : vector<1x1x64xf32> to vector<1x64xf32>
    %24 = arith.addf %21, %23 : vector<1x64xf32>
    %cst_22 = arith.constant 0.000000e+00 : f32
    %25 = vector.broadcast %cst_22 : f32 to vector<1x64xf32>
    %26 = arith.maximumf %24, %25 : vector<1x64xf32>
    %c0_23 = arith.constant 0 : index
    %c0_24 = arith.constant 0 : index
    %c0_25 = arith.constant 0 : index
    %27 = vector.load %arg6[%c0_23, %c0_24, %c0_25] : memref<1x1x64xf32, #tpu.memory_space<vmem>>, vector<1x1x64xf32>
    %28 = vector.shape_cast %27 : vector<1x1x64xf32> to vector<1x64xf32>
    %29 = vector.shape_cast %26 : vector<1x64xf32> to vector<1x1x64xf32>
    tpu.vector_store %arg6[%c0_23, %c0_24, %c0_25], %29 {strides = array<i32>} : memref<1x1x64xf32, #tpu.memory_space<vmem>>, vector<1x1x64xf32>,
    return
  }
  func.func @transform_0(%arg0: i32, %arg1: i32) -> (i32, i32, i32) {
    %c0_i32 = arith.constant 0 : i32
    %c0_i32_0 = arith.constant 0 : i32
    %c0_i32_1 = arith.constant 0 : i32
    return %arg0, %c0_i32, %c0_i32_0 : i32, i32, i32
  }
  func.func @transform_1(%arg0: i32, %arg1: i32) -> (i32, i32, i32) {
    %c0_i32 = arith.constant 0 : i32
    %c0_i32_0 = arith.constant 0 : i32
    %c0_i32_1 = arith.constant 0 : i32
    %c0_i32_2 = arith.constant 0 : i32
    return %c0_i32, %c0_i32_0, %c0_i32_1 : i32, i32, i32
  }
  func.func @transform_2(%arg0: i32, %arg1: i32) -> (i32, i32) {
    %c0_i32 = arith.constant 0 : i32
    %c0_i32_0 = arith.constant 0 : i32
    %c0_i32_1 = arith.constant 0 : i32
    return %c0_i32, %c0_i32_0 : i32, i32
  }
  func.func @transform_3(%arg0: i32, %arg1: i32) -> (i32, i32, i32) {
    %c0_i32 = arith.constant 0 : i32
    %c0_i32_0 = arith.constant 0 : i32
    return %arg0, %arg1, %c0_i32 : i32, i32, i32
  }
  func.func @transform_4(%arg0: i32, %arg1: i32) -> (i32, i32, i32) {
    %c0_i32 = arith.constant 0 : i32
    %c0_i32_0 = arith.constant 0 : i32
    return %arg0, %arg1, %c0_i32 : i32, i32, i32
  }
}

</mosaic_0001>

<bundles_post_ra>
// kernel: encoder_forward.13
= control target key start
LH: loop header
LB: loop body
LE: loop exit
PB: predicated region body
PF: predicated region fallthrough
CT: control target
= control target key end

     0   :  { %s1348_s12 = smov 0   ;;  %s1350_s13 = smov 0   ;;  %s1679_s0 = inlined_call_operand.vmem [shape: f32[4,19,228], index: 0, kind: input, shape index: {}]   ;;  %s1680_s1 = inlined_call_operand.vmem [shape: bf16[4,228,128], index: 1, kind: input, shape index: {}]   ;;  %s1681_s2 = inlined_call_operand.vmem [shape: f32[1,128], index: 2, kind: input, shape index: {}]   ;;  %s1682_s3 = inlined_call_operand.vmem [shape: f32[4,16,128], index: 3, kind: output, shape index: {}]  }
   0x1   :  { %s1352_s14 = smov 0  }
   0x2 LB: > { %s25_s15 = sadd.s32 1, %s1321_s13  ;;  %p1058_p0 = scmp.ge.s32.totalorder %s1325_s14, 1  ;;  %s1325_s14 = sphi %s1352_s14, %s13_s14   ;;  %s1321_s13 = sphi %s1350_s13, %s1684_s13   ;;  %s1317_s12 = sphi %s1348_s12, %s1683_s12  }
   0x3   : > { %p27_p1 = scmp.ge.s32.totalorder %s25_s15, 4  ;;  %p151_p2 = scmp.lt.s32.totalorder %s1325_s14, 5 }
   0x5   : > { %s1686_s15 = smov (%p27_p1, %s25_s15), 0  ;;  %p152_p3 = pnand %p1058_p0, %p151_p2 }
   0x6   : > { %p179_p4 = scmp.lt.s32.totalorder (!%p152_p3), %s1317_s12, 3 }
   0x7   : > { %155 = sbr.rel (%p152_p3) target bundleno = 339 (0x153), region = 32 }
   0xc   : > { %v1243_v0 = vld [vmem:[%s1680_s1 + $0xac] sm:$0xff]   ;;  %v1327_v1 = vmov 0   ;;  %v1244_v2 = vld [vmem:[%s1680_s1 + $0x38] sm:$0xff]   ;;  %v1245_v3 = vld [vmem:[%s1680_s1 + $0xa4] sm:$0xff]   ;;  %s1688_s12 = smov (!%p179_p4, %s1317_s12), 3  ;;  %vm385_vm0 = vcmask 1041408  }
   0xd   : > { %389 = vmatprep.subr.bf16.mxu0 %v1327_v1  ;;  %523 = vmatprep.subr.bf16.mxu1 %v1327_v1  ;;  %v1246_v4 = vld [vmem:[%s1680_s1 + $0x30] sm:$0xff]   ;;  %v1247_v5 = vld [vmem:[%s1680_s1 + $0x9c] sm:$0xff]   ;;  %v1248_v6 = vld [vmem:[%s1680_s1 + $0x28] sm:$0xff]   ;;  %s1217_s19 = smul.u32 48, %s1688_s12  ;;  %vm381_vm1 = vcmask 818176   ;;  %vm606_vm3 = vcmask 1046528  }
   0xe   : > { %390 = vmatpush1.bf16.msra.mxu0 %v1243_v0  ;;  %524 = vmatpush1.bf16.msra.mxu1 %v1244_v2  ;;  %v1249_v7 = vld [vmem:[%s1680_s1 + $0x94] sm:$0xff]   ;;  %v1250_v8 = vld [vmem:[%s1680_s1 + $0x20] sm:$0xff]   ;;  %v1251_v9 = vld [vmem:[%s1680_s1 + $0x8c] sm:$0xff]   ;;  %vm268_vm2 = vsmask.f32 7424  ;;  %s1216_s29 = sshll.u32 %s1688_s12, 4 }
   0xf   : > { %391 = vmatprep.subr.bf16.mxu0 %v1327_v1  ;;  %525 = vmatprep.subr.bf16.mxu1 %v1327_v1  ;;  %v1252_v10 = vld [vmem:[%s1680_s1 + $0x18] sm:$0xff]   ;;  %v1253_v11 = vld [vmem:[%s1680_s1 + $0x84] sm:$0xff]   ;;  %v1254_v12 = vld [vmem:[%s1680_s1 + $0x10] sm:$0xff]   ;;  %s1441_s30 = scalar_lea.vmem %s1679_s0, %s1217_s19  ;;  %vm788_vm4 = vsmask.f32 6400  ;;  %s192_s6 = scalar_lea.vmem %s1682_s3, %s1216_s29 }
  0x10   : > { %v1255_v13 = vld [vmem:[%s1680_s1 + $0x7c] sm:$0xff]   ;;  %v1256_v14 = vld [vmem:[%s1680_s1 + $0x8] sm:$0xff]   ;;  %v1259_v15 = vld [vmem:[%s1680_s1 + $0xe4] ss:$0 sps:$4 sm:$0x33]  }
  0x11   : > { %v1260_v16 = vld [vmem:[%s1680_s1 + $0x70] ss:$0 sps:$4 sm:$0x33]   ;;  %v1257_v17 = vld [vmem:[%s1680_s1 + $0x74] sm:$0xff]   ;;  %v1258_v18 = vld [vmem:[%s1680_s1] sm:$0xff]   ;;  %v387_v24 = vsel %vm385_vm0, %v1259_v15, 0 }
  0x12   : > { %392 = vmatpush1.bf16.msra.mxu0 %v1245_v3  ;;  %526 = vmatpush1.bf16.msra.mxu1 %v1246_v4  ;;  %v1449_v19 = vld [vmem:[%s1441_s30 + $0x18] sm:$0xff]  ;;  %v231_v20 = vld [vmem:[%s1441_s30 + $0x8] sm:$0xfe]  ;;  %v233_v21 = vld [vmem:[%s1441_s30 + $0x28] sm:$0x1]  ;;  %v521_v25 = vsel %vm385_vm0, %v1260_v16, 0 }
  0x13   : > { %393 = vmatprep.subr.bf16.mxu0 %v1327_v1  ;;  %527 = vmatprep.subr.bf16.mxu1 %v1327_v1  ;;  %v235_v22 = vpack.c.bf16 %v1449_v19, %v231_v20  ;;  %v196_v23 = vld [vmem:[%s1441_s30 + $0x8] sm:$0xff]  ;;  %v237_v26 = vpack.c.bf16 %v233_v21, %v233_v21  ;;  %v1261_v31 = vld [vmem:[%s1680_s1 + $0xdc] sm:$0xff]   ;;  %v1263_v35 = vld [vmem:[%s1680_s1 + $0xd4] sm:$0xff]  }
  0x14   : > { %v200_v27 = vpack.c.bf16 %v1449_v19, %v196_v23  ;;  %v1262_v33 = vld [vmem:[%s1680_s1 + $0x68] sm:$0xff]   ;;  %v1264_v37 = vld [vmem:[%s1680_s1 + $0x60] sm:$0xff]   ;;  %v1477_v39 = vld [vmem:[%s1441_s30 + $0x10] sm:$0xff] }
  0x15   : > { %v282_v28 = vshrl.u32 %v235_v22, 16  ;;  %v284_v29 = vshll.u32 %v235_v22, 16  ;;  %v289_v30 = vshll.u32 %v237_v26, 16  ;;  %v230_v40 = vld [vmem:[%s1441_s30] sm:$0xfe]  ;;  %v1265_v42 = vld [vmem:[%s1680_s1 + $0xcc] sm:$0xff]  }
  0x16   : > { %394 = vmatpush1.bf16.msra.mxu0 %v1247_v5  ;;  %528 = vmatpush1.bf16.msra.mxu1 %v1248_v6  ;;  %v232_v41 = vld [vmem:[%s1441_s30 + $0x20] sm:$0x1]  ;;  %v234_v43 = vpack.c.bf16 %v1477_v39, %v230_v40  ;;  %v1266_v44 = vld [vmem:[%s1680_s1 + $0x58] sm:$0xff]   ;;  %v1267_v46 = vld [vmem:[%s1680_s1 + $0xc4] sm:$0xff]  }
  0x17   : > { %395 = vmatprep.subr.bf16.mxu0 %v1327_v1  ;;  %529 = vmatprep.subr.bf16.mxu1 %v1327_v1  ;;  %v286_v32 = vrot.slane %v284_v29, 1  ;;  %v291_v34 = vrot.slane %v289_v30, 1  ;;  %v236_v45 = vpack.c.bf16 %v232_v41, %v232_v41  ;;  %v1268_v48 = vld [vmem:[%s1680_s1 + $0x50] sm:$0xff]   ;;  %v1269_v50 = vld [vmem:[%s1680_s1 + $0xbc] sm:$0xff]   ;;  %v1270_v53 = vld [vmem:[%s1680_s1 + $0x48] sm:$0xff]  }
  0x18   : > { %1122 = vmatprep.mubr.msk.bf16.mxu1 %vm381_vm1, %v200_v27  ;;  %v272_v47 = vshll.u32 %v234_v43, 16  ;;  %v270_v51 = vshrl.u32 %v234_v43, 16  ;;  %v1271_v54 = vld [vmem:[%s1680_s1 + $0xb4] sm:$0xff]   ;;  %v1272_v56 = vld [vmem:[%s1680_s1 + $0x40] sm:$0xff]   ;;  %v1276_v0 = vld [vmem:[%s1680_s1 + $0x18c] sm:$0xff]  }
  0x19   : > { %v287_v36 = vor.u32 %v286_v32, %v282_v28  ;;  %v277_v49 = vshll.u32 %v236_v45, 16  ;;  %v195_v58 = vld [vmem:[%s1441_s30] sm:$0xff]  ;;  %v1274_v62 = vld [vmem:[%s1680_s1 + $0x194] sm:$0xff]   ;;  %v565_v2 = vld [vmem:[%s1441_s30 + $0x8] sm:$0xfc] }
  0x1a   : > { %396 = vmatpush1.bf16.msra.mxu0 %v1249_v7  ;;  %530 = vmatpush1.bf16.msra.mxu1 %v1250_v8  ;;  %v274_v52 = vrot.slane %v272_v47, 1  ;;  %v199_v60 = vpack.c.bf16 %v1477_v39, %v195_v58  ;;  %v1273_v61 = vld [vmem:[%s1680_s1 + $0x120] sm:$0xff]   ;;  %v1275_v63 = vld [vmem:[%s1680_s1 + $0x118] sm:$0xff]   ;;  %v567_v3 = vld [vmem:[%s1441_s30 + $0x28] sm:$0x3]  ;;  %v569_v4 = vpack.c.bf16 %v1449_v19, %v565_v2 }
  0x1b   : > { %397 = vmatprep.subr.bf16.mxu0 %v1327_v1  ;;  %531 = vmatprep.subr.bf16.mxu1 %v1327_v1  ;;  %v292_v38 = vsel %vm268_vm2, %v287_v36, %v291_v34  ;;  %v279_v55 = vrot.slane %v277_v49, 1  ;;  %v571_v5 = vpack.c.bf16 %v567_v3, %v567_v3  ;;  %v751_v6 = vld [vmem:[%s1441_s30 + $0x8] sm:$0xf8]  ;;  %v753_v7 = vld [vmem:[%s1441_s30 + $0x28] sm:$0x7]  ;;  %v1277_v16 = vld [vmem:[%s1680_s1 + $0x110] sm:$0xff]  }
  0x1c   : > { %1106 = vmatprep.mubr.msk.bf16.mxu0 %vm381_vm1, %v292_v38  ;;  %v275_v57 = vor.u32 %v274_v52, %v270_v51  ;;  %v564_v8 = vld [vmem:[%s1441_s30] sm:$0xfc]  ;;  %v1279_v30 = vld [vmem:[%s1680_s1 + $0x108] sm:$0xff]   ;;  %v1282_v36 = vld [vmem:[%s1680_s1 + $0x174] sm:$0xff]  }
  0x1d   : > { %v1284_v38 = vld [vmem:[%s1680_s1 + $0x16c] sm:$0xff]   ;;  %v1286_v41 = vld [vmem:[%s1680_s1 + $0x164] sm:$0xff]   ;;  %v1288_v43 = vld [vmem:[%s1680_s1 + $0x15c] sm:$0xff]  }
  0x1e   : > { %398 = vmatpush1.bf16.msra.mxu0 %v1251_v9  ;;  %532 = vmatpush1.bf16.msra.mxu1 %v1252_v10  ;;  %v280_v59 = vsel %vm268_vm2, %v275_v57, %v279_v55  ;;  %v755_v9 = vpack.c.bf16 %v1449_v19, %v751_v6  ;;  %v757_v10 = vpack.c.bf16 %v753_v7, %v753_v7  ;;  %v1278_v19 = vld [vmem:[%s1680_s1 + $0x184] sm:$0xff]   ;;  %v1285_v40 = vld [vmem:[%s1680_s1 + $0xf0] sm:$0xff]   ;;  %v1290_v45 = vld [vmem:[%s1680_s1 + $0x1cc] ss:$0 sps:$4 sm:$0x33]  }
  0x1f   : > { %399 = vmatprep.subr.bf16.mxu0 %v1327_v1  ;;  %533 = vmatprep.subr.bf16.mxu1 %v1327_v1  ;;  %v915_v47 = vsel %vm385_vm0, %v1290_v45, 0  ;;  %v1292_v49 = vld [vmem:[%s1680_s1 + $0x1c4] sm:$0xff]   ;;  %v1294_v51 = vld [vmem:[%s1680_s1 + $0x1bc] sm:$0xff]   ;;  %v1296_v55 = vld [vmem:[%s1680_s1 + $0x1b4] sm:$0xff]  }
  0x20   : > { %v815_v20 = vshrl.u32 %v757_v10, 16  ;;  %v818_v21 = vshll.u32 %v757_v10, 16  ;;  %v750_v52 = vld [vmem:[%s1441_s30] sm:$0xf8]  ;;  %v1297_v58 = vld [vmem:[%s1680_s1 + $0x138] sm:$0xff]   ;;  %v1301_v6 = vld [vmem:[%s1680_s1 + $0x128] sm:$0xff]  }
  0x21   : > { %v1302_v7 = vld [vmem:[%s1680_s1 + $0x19c] sm:$0xff]  }
  0x22   : > { %400 = vmatpush1.bf16.msra.mxu0 %v1253_v11  ;;  %534 = vmatpush1.bf16.msra.mxu1 %v1254_v12  ;;  %v566_v11 = vld [vmem:[%s1441_s30 + $0x20] sm:$0x3]  ;;  %v568_v12 = vpack.c.bf16 %v1477_v39, %v564_v8  ;;  %v817_v27 = vrot.slane %v815_v20, 1  ;;  %v820_v28 = vrot.slane %v818_v21, 2 }
  0x23   : > { %401 = vmatprep.subr.bf16.mxu0 %v1327_v1  ;;  %535 = vmatprep.subr.bf16.mxu1 %v1327_v1  ;;  %v570_v15 = vpack.c.bf16 %v566_v11, %v566_v11 }
  0x24   : > { %v607_v23 = vrot.slane %v568_v12, 1  ;;  %v821_v32 = vor.u32 %v820_v28, %v817_v27 }
  0x26   : > { %402 = vmatpush1.bf16.msra.mxu0 %v1255_v13  ;;  %536 = vmatpush1.bf16.msra.mxu1 %v1256_v14  ;;  %v610_v13 = vrot.slane %v569_v4, 1  ;;  %v611_v14 = vrot.slane %v571_v5, 1 }
  0x27   : > { %403 = vmatprep.subr.bf16.mxu0 %v1327_v1  ;;  %537 = vmatprep.subr.bf16.mxu1 %v1327_v1 }
  0x28   : > { %v612_v22 = vsel %vm606_vm3, %v610_v13, %v611_v14 }
  0x2a   : > { %404 = vmatpush1.bf16.msra.mxu0 %v1257_v17  ;;  %538 = vmatpush1.bf16.msra.mxu1 %v1258_v18  ;;  %v807_v17 = vshrl.u32 %v755_v9, 16  ;;  %v810_v18 = vshll.u32 %v755_v9, 16 }
  0x2b   : > { %407 = vmatprep.subr.bf16.mxu0 %v1327_v1  ;;  %541 = vmatprep.subr.bf16.mxu1 %v1327_v1 }
  0x2c   : > { %v812_v26 = vrot.slane %v810_v18, 2 }
  0x2e   : > { %408 = vmatpush2.bf16.msra.mxu0 %v387_v24  ;;  %542 = vmatpush2.bf16.msra.mxu1 %v521_v25  ;;  %v608_v24 = vrot.slane %v570_v15, 1  ;;  %v809_v25 = vrot.slane %v807_v17, 1 }
  0x2f   : > { %409 = vmatprep.subr.bf16.mxu0 %v1327_v1  ;;  %543 = vmatprep.subr.bf16.mxu1 %v1327_v1 }
  0x30   : > { %v1556_v29 = vsel %vm606_vm3, %v607_v23, %v608_v24 }
  0x32   : > { %410 = vmatpush2.bf16.msra.mxu0 %v1261_v31  ;;  %544 = vmatpush2.bf16.msra.mxu1 %v1262_v33  ;;  %v813_v31 = vor.u32 %v812_v26, %v809_v25  ;;  %v1280_v33 = vld [vmem:[%s1680_s1 + $0x17c] sm:$0xff]  }
  0x33   : > { %411 = vmatprep.subr.bf16.mxu0 %v1327_v1  ;;  %545 = vmatprep.subr.bf16.mxu1 %v1327_v1 }
  0x34   : > { %v822_v34 = vsel %vm788_vm4, %v813_v31, %v821_v32 }
  0x36   : > { %412 = vmatpush2.bf16.msra.mxu0 %v1263_v35  ;;  %546 = vmatpush2.bf16.msra.mxu1 %v1264_v37  ;;  %v1281_v35 = vld [vmem:[%s1680_s1 + $0x100] sm:$0xff]   ;;  %v1283_v37 = vld [vmem:[%s1680_s1 + $0xf8] sm:$0xff]  }
  0x37   : > { %413 = vmatprep.subr.bf16.mxu0 %v1327_v1  ;;  %547 = vmatprep.subr.bf16.mxu1 %v1327_v1 }
  0x3a   : > { %414 = vmatpush2.bf16.msra.mxu0 %v1265_v42  ;;  %548 = vmatpush2.bf16.msra.mxu1 %v1266_v44  ;;  %v1287_v42 = vld [vmem:[%s1680_s1 + $0xe8] sm:$0xff]   ;;  %v1289_v44 = vld [vmem:[%s1680_s1 + $0x158] ss:$0 sps:$4 sm:$0x33]  }
  0x3b   : > { %415 = vmatprep.subr.bf16.mxu0 %v1327_v1  ;;  %549 = vmatprep.subr.bf16.mxu1 %v1327_v1 }
  0x3e   : > { %416 = vmatpush2.bf16.msra.mxu0 %v1267_v46  ;;  %550 = vmatpush2.bf16.msra.mxu1 %v1268_v48  ;;  %v705_v46 = vsel %vm385_vm0, %v1289_v44, 0  ;;  %v1291_v48 = vld [vmem:[%s1680_s1 + $0x150] sm:$0xff]  }
  0x3f   : > { %417 = vmatprep.subr.bf16.mxu0 %v1327_v1  ;;  %551 = vmatprep.subr.bf16.mxu1 %v1327_v1 }
  0x42   : > { %418 = vmatpush2.bf16.msra.mxu0 %v1269_v50  ;;  %552 = vmatpush2.bf16.msra.mxu1 %v1270_v53  ;;  %v1293_v50 = vld [vmem:[%s1680_s1 + $0x148] sm:$0xff]   ;;  %v752_v53 = vld [vmem:[%s1441_s30 + $0x20] sm:$0x7] }
  0x43   : > { %419 = vmatprep.subr.bf16.mxu0 %v1327_v1  ;;  %553 = vmatprep.subr.bf16.mxu1 %v1327_v1  ;;  %v756_v57 = vpack.c.bf16 %v752_v53, %v752_v53 }
  0x46   : > { %420 = vmatpush2.bf16.msra.mxu0 %v1271_v54  ;;  %554 = vmatpush2.bf16.msra.mxu1 %v1272_v56  ;;  %v1295_v54 = vld [vmem:[%s1680_s1 + $0x140] sm:$0xff]   ;;  %v754_v56 = vpack.c.bf16 %v1477_v39, %v750_v52  ;;  %v1299_v39 = vld [vmem:[%s1680_s1 + $0x130] sm:$0xff]  }
  0x47   : > { %707 = vmatprep.subr.bf16.mxu0 %v1327_v1  ;;  %917 = vmatprep.subr.bf16.mxu1 %v1327_v1 }
  0x49   : > { %422 = vmatmul.mubr.bf16.vlgmr.msra.gmra.mxu0 %v280_v59  ;;  %556 = vmatmul.mubr.bf16.vlgmr.msra.gmra.mxu1 %v199_v60  ;;  %v1298_v59 = vld [vmem:[%s1680_s1 + $0x1ac] sm:$0xff]   ;;  %v790_v60 = vshrl.u32 %v754_v56, 16 }
  0x4a   : > { %708 = vmatpush1.bf16.msra.mxu0 %v1273_v61  ;;  %918 = vmatpush1.bf16.msra.mxu1 %v1274_v62  ;;  %v793_v61 = vshll.u32 %v754_v56, 16  ;;  %v798_v62 = vshrl.u32 %v756_v57, 16 }
  0x4b   : > { %709 = vmatprep.subr.bf16.mxu0 %v1327_v1  ;;  %919 = vmatprep.subr.bf16.mxu1 %v1327_v1  ;;  %v792_v2 = vrot.slane %v790_v60, 1 }
  0x4c   : > { %1167 = vmatprep.mubr.msk.bf16.mxu0 %vm381_vm1, %v612_v22  ;;  %1212 = vmatprep.mubr.msk.bf16.mxu1 %vm381_vm1, %v822_v34  ;;  %v795_v3 = vrot.slane %v793_v61, 2  ;;  %v800_v4 = vrot.slane %v798_v62, 1  ;;  %v1213_v22 = vld [vmem:[%s1681_s2] ss:$0 sm:$0xff] }
  0x4e   : > { %710 = vmatpush1.bf16.msra.mxu0 %v1275_v63  ;;  %920 = vmatpush1.bf16.msra.mxu1 %v1276_v0  ;;  %v801_v63 = vshll.u32 %v756_v57, 16  ;;  %v1300_v0 = vld [vmem:[%s1680_s1 + $0x1a4] sm:$0xff]   ;;  %v796_v8 = vor.u32 %v795_v3, %v792_v2 }
  0x4f   : > { %711 = vmatprep.subr.bf16.mxu0 %v1327_v1  ;;  %921 = vmatprep.subr.bf16.mxu1 %v1327_v1 }
  0x50   : > { %v803_v5 = vrot.slane %v801_v63, 2 }
  0x52   : > { %712 = vmatpush1.bf16.msra.mxu0 %v1277_v16  ;;  %922 = vmatpush1.bf16.msra.mxu1 %v1278_v19  ;;  %v804_v9 = vor.u32 %v803_v5, %v800_v4 }
  0x53   : > { %713 = vmatprep.subr.bf16.mxu0 %v1327_v1  ;;  %923 = vmatprep.subr.bf16.mxu1 %v1327_v1 }
  0x54   : > { %v805_v10 = vsel %vm788_vm4, %v796_v8, %v804_v9 }
  0x56   : > { %714 = vmatpush1.bf16.msra.mxu0 %v1279_v30  ;;  %924 = vmatpush1.bf16.msra.mxu1 %v1280_v33 }
  0x57   : > { %715 = vmatprep.subr.bf16.mxu0 %v1327_v1  ;;  %925 = vmatprep.subr.bf16.mxu1 %v1327_v1 }
  0x5a   : > { %716 = vmatpush1.bf16.msra.mxu0 %v1281_v35  ;;  %926 = vmatpush1.bf16.msra.mxu1 %v1282_v36 }
  0x5b   : > { %717 = vmatprep.subr.bf16.mxu0 %v1327_v1  ;;  %927 = vmatprep.subr.bf16.mxu1 %v1327_v1 }
  0x5e   : > { %718 = vmatpush1.bf16.msra.mxu0 %v1283_v37  ;;  %928 = vmatpush1.bf16.msra.mxu1 %v1284_v38 }
  0x5f   : > { %719 = vmatprep.subr.bf16.mxu0 %v1327_v1  ;;  %929 = vmatprep.subr.bf16.mxu1 %v1327_v1 }
  0x62   : > { %720 = vmatpush1.bf16.msra.mxu0 %v1285_v40  ;;  %930 = vmatpush1.bf16.msra.mxu1 %v1286_v41 }
  0x63   : > { %721 = vmatprep.subr.bf16.mxu0 %v1327_v1  ;;  %931 = vmatprep.subr.bf16.mxu1 %v1327_v1 }
  0x66   : > { %722 = vmatpush1.bf16.msra.mxu0 %v1287_v42  ;;  %932 = vmatpush1.bf16.msra.mxu1 %v1288_v43 }
  0x67   : > { %725 = vmatprep.subr.bf16.mxu0 %v1327_v1  ;;  %935 = vmatprep.subr.bf16.mxu1 %v1327_v1 }
  0x6a   : > { %726 = vmatpush2.bf16.msra.mxu0 %v705_v46  ;;  %936 = vmatpush2.bf16.msra.mxu1 %v915_v47 }
  0x6b   : > { %727 = vmatprep.subr.bf16.mxu0 %v1327_v1  ;;  %937 = vmatprep.subr.bf16.mxu1 %v1327_v1 }
  0x6e   : > { %728 = vmatpush2.bf16.msra.mxu0 %v1291_v48  ;;  %938 = vmatpush2.bf16.msra.mxu1 %v1292_v49 }
  0x6f   : > { %729 = vmatprep.subr.bf16.mxu0 %v1327_v1  ;;  %939 = vmatprep.subr.bf16.mxu1 %v1327_v1 }
  0x72   : > { %730 = vmatpush2.bf16.msra.mxu0 %v1293_v50  ;;  %940 = vmatpush2.bf16.msra.mxu1 %v1294_v51 }
  0x73   : > { %731 = vmatprep.subr.bf16.mxu0 %v1327_v1  ;;  %941 = vmatprep.subr.bf16.mxu1 %v1327_v1 }
  0x76   : > { %732 = vmatpush2.bf16.msra.mxu0 %v1295_v54  ;;  %942 = vmatpush2.bf16.msra.mxu1 %v1296_v55 }
  0x77   : > { %733 = vmatprep.subr.bf16.mxu0 %v1327_v1  ;;  %943 = vmatprep.subr.bf16.mxu1 %v1327_v1 }
  0x7a   : > { %734 = vmatpush2.bf16.msra.mxu0 %v1297_v58  ;;  %944 = vmatpush2.bf16.msra.mxu1 %v1298_v59 }
  0x7b   : > { %735 = vmatprep.subr.bf16.mxu0 %v1327_v1  ;;  %945 = vmatprep.subr.bf16.mxu1 %v1327_v1 }
  0x7e   : > { %736 = vmatpush2.bf16.msra.mxu0 %v1299_v39  ;;  %946 = vmatpush2.bf16.msra.mxu1 %v1300_v0 }
  0x7f   : > { %737 = vmatprep.subr.bf16.mxu0 %v1327_v1  ;;  %947 = vmatprep.subr.bf16.mxu1 %v1327_v1 }
  0x82   : > { %738 = vmatpush2.bf16.msra.mxu0 %v1301_v6  ;;  %948 = vmatpush2.bf16.msra.mxu1 %v1302_v7 }
  0x85   : > { %740 = vmatmul.mubr.bf16.vlgmr.msra.gmra.mxu0 %v1556_v29  ;;  %950 = vmatmul.mubr.bf16.vlgmr.msra.gmra.mxu1 %v805_v10 }
 0x109   : > { %v423_v11 = vpop.f32.mrf.mxu0  ;;  %v557_v12 = vpop.f32.mrf.mxu1 }
 0x10a   : > { %v558_v20 = vadd.f32 %v557_v12, %v423_v11 }
 0x10b   : > { %v425_v13 = vpop.f32.mrf.mxu0  ;;  %v559_v14 = vpop.f32.mrf.mxu1 }
 0x10d   : > { %v426_v15 = vpop.f32.mrf.mxu0  ;;  %v560_v16 = vpop.f32.mrf.mxu1 }
 0x10e   : > { %v561_v24 = vadd.f32 %v560_v16, %v426_v15 }
 0x10f   : > { %v428_v17 = vpop.f32.mrf.mxu0  ;;  %v562_v18 = vpop.f32.mrf.mxu1 }
 0x145   : > { %v741_v21 = vpop.f32.mrf.mxu0  ;;  %v951_v1 = vpop.f32.mrf.mxu1 }
 0x146   : > { %v748_v19 = vadd.f32 %v741_v21, %v558_v20 }
 0x147   : > { %v743_v23 = vpop.f32.mrf.mxu0  ;;  %v953_v26 = vpop.f32.mrf.mxu1 }
 0x148   : > { %v958_v25 = vadd.f32 %v951_v1, %v748_v19 }
 0x149   : > { %v744_v27 = vpop.f32.mrf.mxu0  ;;  %v954_v30 = vpop.f32.mrf.mxu1 }
 0x14a   : > { %v967_v28 = vadd.f32 %v1213_v22, %v958_v25  ;;  %v749_v29 = vadd.f32 %v744_v27, %v561_v24 }
 0x14b   : > { %v746_v31 = vpop.f32.mrf.mxu0  ;;  %v956_v34 = vpop.f32.mrf.mxu1 }
 0x14c   : > { %v969_v32 = vmax.f32 %v967_v28, 0.0  ;;  %v959_v33 = vadd.f32 %v954_v30, %v749_v29 }
 0x14e   : > { %971 = vst [vmem:[%s192_s6] sm:$0xff] %v969_v32  ;;  %v968_v35 = vadd.f32 %v1213_v22, %v959_v33 }
 0x150   : > { %v970_v36 = vmax.f32 %v968_v35, 0.0 }
 0x152   : > { %972 = vst [vmem:[%s192_s6 + $0x8] sm:$0xff] %v970_v36 }
 0x153 PF: > { %s13_s14 = sadd.s32 1, %s1325_s14   ;;  %s1683_s12 = smov %s1321_s13 }
 0x154   : > { %p10_p5 = scmp.ge.s32.totalorder %s13_s14, 6   ;;  %s1684_s13 = smov %s1686_s15 }
 0x156   :  { %12 = sbr.rel (!%p10_p5) target bundleno = 2 (0x2), region = 65 }

// kernel: encoder_forward.14
= control target key start
LH: loop header
LB: loop body
LE: loop exit
PB: predicated region body
PF: predicated region fallthrough
CT: control target
= control target key end

     0   :  { %s416_s6 = smov 0   ;;  %s548_s0 = inlined_call_operand.vmem [shape: f32[4,36,9,8], index: 0, kind: input, shape index: {}]   ;;  %s549_s1 = inlined_call_operand.vmem [shape: f32[4,8,8,8], index: 1, kind: output, shape index: {}]  }
   0x1 LB: > { %s322_s7 = sadd.s32 4294967295, %s404_s6   ;;  %p326_p0 = scmp.ge.s32.totalorder %s404_s6, 1  ;;  %s404_s6 = sphi %s416_s6, %s11_s6  }
   0x2   : > { %p87_p1 = scmp.lt.s32.totalorder %s404_s6, 5 }
   0x4   : > { %p88_p2 = pnand %p326_p0, %p87_p1 }
   0x5   : > { %p107_p3 = scmp.lt.s32.totalorder (!%p88_p2), %s322_s7, 3 }
   0x6   : > { %91 = sbr.rel (%p88_p2) target bundleno = 52 (0x34), region = 24 }
   0xb   : > { %s551_s7 = smov (!%p107_p3, %s322_s7), 3  ;;  %vm258_vm0 = vcmask 64512  }
   0xc   : > { %s389_s8 = smul.u32 576, %s551_s7  ;;  %s388_s12 = sshll.u32 %s551_s7, 6 }
   0xd   : > { %s502_s15 = scalar_lea.vmem %s549_s1, %s388_s12 }
   0xe   : > { %s430_s11 = scalar_lea.vmem %s548_s0, %s389_s8 }
   0xf   : > { %v117_v0 = vld [vmem:[%s430_s11] sm:$0xff]  ;;  %v330_v1 = vld [vmem:[%s430_s11 + $0x90] sm:$0xff] }
  0x10   : > { %v142_v2 = vld [vmem:[%s430_s11 + $0x1] sm:$0xff]  ;;  %v134_v3 = vmax.f32 %v117_v0, %v330_v1  ;;  %v362_v5 = vld [vmem:[%s430_s11 + $0x10] sm:$0xff] }
  0x11   : > { %v338_v4 = vld [vmem:[%s430_s11 + $0x120] sm:$0xff]  ;;  %v441_v7 = vld [vmem:[%s430_s11 + $0x11] sm:$0xff] }
  0x12   : > { %v438_v6 = vld [vmem:[%s430_s11 + $0xa0] sm:$0xff]  ;;  %v150_v8 = vmax.f32 %v134_v3, %v142_v2  ;;  %v346_v9 = vld [vmem:[%s430_s11 + $0x1b0] sm:$0xff] }
  0x13   : > { %v135_v10 = vmax.f32 %v362_v5, %v438_v6  ;;  %v339_v11 = vld [vmem:[%s430_s11 + $0x130] sm:$0xff]  ;;  %v363_v12 = vld [vmem:[%s430_s11 + $0x20] sm:$0xff] }
  0x14   : > { %v448_v13 = vld [vmem:[%s430_s11 + $0xb0] sm:$0xff]  ;;  %v451_v14 = vld [vmem:[%s430_s11 + $0x21] sm:$0xff]  ;;  %v167_v15 = vmax.f32 %v150_v8, %v338_v4 }
  0x15   : > { %v354_v16 = vld [vmem:[%s430_s11 + $0x121] sm:$0xff]  ;;  %v151_v17 = vmax.f32 %v135_v10, %v441_v7  ;;  %v136_v19 = vmax.f32 %v363_v12, %v448_v13  ;;  %v364_v21 = vld [vmem:[%s430_s11 + $0x30] sm:$0xff] }
  0x16   : > { %v347_v18 = vld [vmem:[%s430_s11 + $0x1c0] sm:$0xff]  ;;  %v463_v23 = vld [vmem:[%s430_s11 + $0x31] sm:$0xff]  ;;  %v184_v24 = vmax.f32 %v167_v15, %v346_v9 }
  0x17   : > { %v340_v20 = vld [vmem:[%s430_s11 + $0x140] sm:$0xff]  ;;  %v168_v25 = vmax.f32 %v151_v17, %v339_v11  ;;  %v355_v26 = vld [vmem:[%s430_s11 + $0x131] sm:$0xff]  ;;  %v152_v27 = vmax.f32 %v136_v19, %v451_v14 }
  0x18   : > { %v460_v22 = vld [vmem:[%s430_s11 + $0xc0] sm:$0xff]  ;;  %v348_v28 = vld [vmem:[%s430_s11 + $0x1d0] sm:$0xff]  ;;  %v200_v33 = vmax.f32 %v184_v24, %v354_v16 }
  0x19   : > { %v137_v29 = vmax.f32 %v364_v21, %v460_v22  ;;  %v341_v30 = vld [vmem:[%s430_s11 + $0x150] sm:$0xff]  ;;  %v365_v31 = vld [vmem:[%s430_s11 + $0x40] sm:$0xff]  ;;  %v185_v34 = vmax.f32 %v168_v25, %v347_v18  ;;  %v169_v35 = vmax.f32 %v152_v27, %v340_v20 }
  0x1a   : > { %v472_v32 = vld [vmem:[%s430_s11 + $0xd0] sm:$0xff]  ;;  %v356_v36 = vld [vmem:[%s430_s11 + $0x141] sm:$0xff]  ;;  %v217_v43 = vmax.f32 %v200_v33, %v362_v5 }
  0x1b   : > { %v153_v37 = vmax.f32 %v137_v29, %v463_v23  ;;  %v477_v38 = vld [vmem:[%s430_s11 + $0x41] sm:$0xff]  ;;  %v138_v40 = vmax.f32 %v365_v31, %v472_v32  ;;  %v366_v41 = vld [vmem:[%s430_s11 + $0x50] sm:$0xff]  ;;  %v201_v44 = vmax.f32 %v185_v34, %v355_v26  ;;  %v186_v45 = vmax.f32 %v169_v35, %v348_v28 }
  0x1c   : > { %v349_v39 = vld [vmem:[%s430_s11 + $0x1e0] sm:$0xff]  ;;  %v382_v48 = vld [vmem:[%s430_s11 + $0x51] sm:$0xff]  ;;  %v234_v54 = vmax.f32 %v217_v43, %v438_v6 }
  0x1d   : > { %v483_v42 = vld [vmem:[%s430_s11 + $0xe0] sm:$0xff]  ;;  %v170_v46 = vmax.f32 %v153_v37, %v341_v30  ;;  %v357_v49 = vld [vmem:[%s430_s11 + $0x151] sm:$0xff]  ;;  %v154_v50 = vmax.f32 %v138_v40, %v477_v38  ;;  %v218_v55 = vmax.f32 %v201_v44, %v363_v12  ;;  %v202_v56 = vmax.f32 %v186_v45, %v356_v36 }
  0x1e   : > { %v342_v47 = vld [vmem:[%s430_s11 + $0x160] sm:$0xff]  ;;  %v139_v51 = vmax.f32 %v366_v41, %v483_v42  ;;  %v493_v53 = vld [vmem:[%s430_s11 + $0xf0] sm:$0xff]  ;;  %v250_v3 = vmax.f32 %v234_v54, %v441_v7 }
  0x1f   : > { %v367_v52 = vld [vmem:[%s430_s11 + $0x60] sm:$0xff]  ;;  %v187_v57 = vmax.f32 %v170_v46, %v349_v39  ;;  %v350_v58 = vld [vmem:[%s430_s11 + $0x1f0] sm:$0xff]  ;;  %v171_v61 = vmax.f32 %v154_v50, %v342_v47  ;;  %v235_v4 = vmax.f32 %v218_v55, %v448_v13  ;;  %v219_v5 = vmax.f32 %v202_v56, %v364_v21 }
  0x20   : > { %v343_v59 = vld [vmem:[%s430_s11 + $0x170] sm:$0xff]  ;;  %v383_v60 = vld [vmem:[%s430_s11 + $0x61] sm:$0xff]  ;;  %v155_v63 = vmax.f32 %v139_v51, %v382_v48  ;;  %v140_v0 = vmax.f32 %v367_v52, %v493_v53  ;;  %259 = vst.msk [vmem:[%s502_s15] sm:$0xff] %vm258_vm0, %v250_v3 }
  0x21   : > { %v358_v62 = vld [vmem:[%s430_s11 + $0x161] sm:$0xff]  ;;  %v368_v1 = vld [vmem:[%s430_s11 + $0x70] sm:$0xff]  ;;  %v203_v6 = vmax.f32 %v187_v57, %v357_v49  ;;  %v188_v11 = vmax.f32 %v171_v61, %v350_v58  ;;  %v251_v7 = vmax.f32 %v235_v4, %v451_v14  ;;  %v236_v17 = vmax.f32 %v219_v5, %v460_v22 }
  0x22   : > { %v376_v2 = vld [vmem:[%s430_s11 + $0x100] sm:$0xff]  ;;  %v384_v10 = vld [vmem:[%s430_s11 + $0x71] sm:$0xff]  ;;  %v172_v12 = vmax.f32 %v155_v63, %v343_v59  ;;  %v156_v15 = vmax.f32 %v140_v0, %v383_v60 }
  0x23   : > { %v351_v8 = vld [vmem:[%s430_s11 + $0x200] sm:$0xff]  ;;  %v141_v16 = vmax.f32 %v368_v1, %v376_v2  ;;  %v220_v13 = vmax.f32 %v203_v6, %v365_v31  ;;  %v359_v18 = vld [vmem:[%s430_s11 + $0x171] sm:$0xff]  ;;  %v204_v21 = vmax.f32 %v188_v11, %v358_v62  ;;  %260 = vst.msk [vmem:[%s502_s15 + $0x8] sm:$0xff] %vm258_vm0, %v251_v7  ;;  %v252_v27 = vmax.f32 %v236_v17, %v463_v23 }
  0x24   : > { %v344_v9 = vld [vmem:[%s430_s11 + $0x180] sm:$0xff]  ;;  %v352_v19 = vld [vmem:[%s430_s11 + $0x210] sm:$0xff]  ;;  %v189_v24 = vmax.f32 %v172_v12, %v351_v8 }
  0x25   : > { %v345_v20 = vld [vmem:[%s430_s11 + $0x190] sm:$0xff]  ;;  %v173_v25 = vmax.f32 %v156_v15, %v344_v9  ;;  %v157_v26 = vmax.f32 %v141_v16, %v384_v10  ;;  %v237_v14 = vmax.f32 %v220_v13, %v472_v32  ;;  %v360_v28 = vld [vmem:[%s430_s11 + $0x181] sm:$0xff]  ;;  %v221_v29 = vmax.f32 %v204_v21, %v366_v41  ;;  %261 = vst.msk [vmem:[%s502_s15 + $0x10] sm:$0xff] %vm258_vm0, %v252_v27 }
  0x26   : > { %v353_v22 = vld [vmem:[%s430_s11 + $0x220] sm:$0xff]  ;;  %v205_v30 = vmax.f32 %v189_v24, %v359_v18  ;;  %v361_v35 = vld [vmem:[%s430_s11 + $0x191] sm:$0xff] }
  0x27   : > { %v190_v31 = vmax.f32 %v173_v25, %v352_v19  ;;  %v174_v33 = vmax.f32 %v157_v26, %v345_v20  ;;  %v253_v34 = vmax.f32 %v237_v14, %v477_v38  ;;  %v238_v36 = vmax.f32 %v221_v29, %v483_v42  ;;  %v369_v39 = vld [vmem:[%s430_s11 + $0x80] sm:$0xff]  ;;  %v377_v45 = vld [vmem:[%s430_s11 + $0x110] sm:$0xff] }
  0x28   : > { %v222_v23 = vmax.f32 %v205_v30, %v367_v52  ;;  %v385_v47 = vld [vmem:[%s430_s11 + $0x81] sm:$0xff] }
  0x29   : > { %v206_v37 = vmax.f32 %v190_v31, %v360_v28  ;;  %v191_v32 = vmax.f32 %v174_v33, %v353_v22  ;;  %262 = vst.msk [vmem:[%s502_s15 + $0x18] sm:$0xff] %vm258_vm0, %v253_v34  ;;  %v254_v40 = vmax.f32 %v238_v36, %v382_v48 }
  0x2a   : > { %v239_v41 = vmax.f32 %v222_v23, %v493_v53 }
  0x2b   : > { %v223_v43 = vmax.f32 %v206_v37, %v368_v1  ;;  %v207_v44 = vmax.f32 %v191_v32, %v361_v35  ;;  %263 = vst.msk [vmem:[%s502_s15 + $0x20] sm:$0xff] %vm258_vm0, %v254_v40 }
  0x2c   : > { %v255_v38 = vmax.f32 %v239_v41, %v383_v60 }
  0x2d   : > { %v240_v46 = vmax.f32 %v223_v43, %v376_v2  ;;  %v224_v42 = vmax.f32 %v207_v44, %v369_v39 }
  0x2e   : > { %264 = vst.msk [vmem:[%s502_s15 + $0x28] sm:$0xff] %vm258_vm0, %v255_v38 }
  0x2f   : > { %v256_v49 = vmax.f32 %v240_v46, %v384_v10  ;;  %v241_v50 = vmax.f32 %v224_v42, %v377_v45 }
  0x31   : > { %265 = vst.msk [vmem:[%s502_s15 + $0x30] sm:$0xff] %vm258_vm0, %v256_v49  ;;  %v257_v51 = vmax.f32 %v241_v50, %v385_v47 }
  0x33   : > { %266 = vst.msk [vmem:[%s502_s15 + $0x38] sm:$0xff] %vm258_vm0, %v257_v51 }
  0x34 PF: > { %s11_s6 = sadd.s32 1, %s404_s6  }
  0x35   : > { %p8_p4 = scmp.ge.s32.totalorder %s11_s6, 6  }
  0x37   :  { %10 = sbr.rel (!%p8_p4) target bundleno = 1 (0x1), region = 59 }

// kernel: encoder_forward.15
= control target key start
LH: loop header
LB: loop body
LE: loop exit
PB: predicated region body
PF: predicated region fallthrough
CT: control target
= control target key end

     0   :  { %s728_s12 = smov 0   ;;  %s730_s13 = smov 0   ;;  %s824_s0 = inlined_call_operand.vmem [shape: f32[4,10,80], index: 0, kind: input, shape index: {}]   ;;  %s825_s1 = inlined_call_operand.vmem [shape: bf16[3,80,64], index: 1, kind: input, shape index: {}]   ;;  %s826_s2 = inlined_call_operand.vmem [shape: f32[1,64], index: 2, kind: input, shape index: {}]   ;;  %s827_s3 = inlined_call_operand.vmem [shape: f32[4,8,64], index: 3, kind: output, shape index: {}]  }
   0x1   :  { %s732_s14 = smov 0  }
   0x2 LB: > { %s25_s15 = sadd.s32 1, %s700_s13  ;;  %p535_p0 = scmp.ge.s32.totalorder %s704_s14, 1  ;;  %s704_s14 = sphi %s732_s14, %s13_s14   ;;  %s700_s13 = sphi %s730_s13, %s829_s13   ;;  %s696_s12 = sphi %s728_s12, %s828_s12  }
   0x3   : > { %p27_p1 = scmp.ge.s32.totalorder %s25_s15, 4  ;;  %p151_p2 = scmp.lt.s32.totalorder %s704_s14, 5 }
   0x5   : > { %s831_s15 = smov (%p27_p1, %s25_s15), 0  ;;  %p152_p3 = pnand %p535_p0, %p151_p2 }
   0x6   : > { %p177_p4 = scmp.lt.s32.totalorder (!%p152_p3), %s696_s12, 3 }
   0x7   : > { %155 = sbr.rel (%p152_p3) target bundleno = 253 (0xfd), region = 32 }
   0xc   : > { %v667_v0 = vld [vmem:[%s825_s1 + $0x48] sm:$0xff]   ;;  %v706_v1 = vmov 0.0   ;;  %v668_v2 = vld [vmem:[%s825_s1 + $0x20] sm:$0xff]   ;;  %vm707_vm0 = vmmov 0   ;;  %v670_v4 = vld [vmem:[%s825_s1 + $0x18] sm:$0xff]   ;;  %s833_s12 = smov (!%p177_p4, %s696_s12), 3 }
   0xd   : > { %599 = vmatprep.subr.bf16.mxu0 %v706_v1  ;;  %613 = vmatprep.subr.bf16.mxu1 %v706_v1  ;;  %v669_v3 = vld [vmem:[%s825_s1 + $0x40] sm:$0xff]   ;;  %v671_v5 = vld [vmem:[%s825_s1 + $0x38] sm:$0xff]   ;;  %v672_v6 = vld [vmem:[%s825_s1 + $0x10] sm:$0xff]   ;;  %s580_s28 = sshll.u32 %s833_s12, 4  ;;  %vm245_vm1 = vcmask 654336   ;;  %s538_s29 = sshll.u32 %s833_s12, 3 }
   0xe   : > { %600 = vmatpush3.bf16.msra.mxu0 %v667_v0  ;;  %609 = vmatprep.mubr.msk.bf16.mxu0 %vm707_vm0, %v706_v1  ;;  %v673_v7 = vld [vmem:[%s825_s1 + $0x30] sm:$0xff]   ;;  %v674_v8 = vld [vmem:[%s825_s1 + $0x8] sm:$0xff]   ;;  %s778_s8 = scalar_lea.vmem %s824_s0, %s580_s28  ;;  %v676_v11 = vld [vmem:[%s825_s1] sm:$0xff]   ;;  %s188_s5 = scalar_lea.vmem %s827_s3, %s538_s29  ;;  %vm458_vm2 = vcmask 523264  }
   0xf   : > { %614 = vmatpush3.bf16.msra.mxu1 %v668_v2  ;;  %601 = vmatprep.subr.bf16.mxu0 %v706_v1  ;;  %v675_v9 = vld [vmem:[%s825_s1 + $0x28] sm:$0xff]   ;;  %v190_v12 = vld [vmem:[%s778_s8] sm:$0xff]  ;;  %v677_v15 = vld [vmem:[%s825_s1 + $0x70] sm:$0xff]  }
  0x10   : > { %615 = vmatprep.subr.bf16.mxu1 %v706_v1  ;;  %623 = vmatprep.mubr.msk.bf16.mxu1 %vm707_vm0, %v706_v1  ;;  %v202_v10 = vld [vmem:[%s778_s8 + $0x1] sm:$0xff]  ;;  %v191_v14 = vpack.c.bf16 %v190_v12, %v190_v12  ;;  %v680_v18 = vld [vmem:[%s825_s1 + $0x58] sm:$0xff]   ;;  %v681_v19 = vld [vmem:[%s825_s1 + $0x50] sm:$0xff]  }
  0x11   : > { %v203_v13 = vpack.c.bf16 %v202_v10, %v202_v10  ;;  %v678_v16 = vld [vmem:[%s825_s1 + $0x68] sm:$0xff]   ;;  %v679_v17 = vld [vmem:[%s825_s1 + $0x60] sm:$0xff]  }
  0x12   : > { %602 = vmatpush3.bf16.msra.mxu0 %v669_v3  ;;  %v362_v20 = vld [vmem:[%s778_s8 + $0x2] sm:$0xff]  ;;  %v577_v32 = vld [vmem:[%s826_s2] ss:$0 sm:$0xff] }
  0x13   : > { %616 = vmatpush3.bf16.msra.mxu1 %v670_v4  ;;  %603 = vmatprep.subr.bf16.mxu0 %v706_v1  ;;  %v363_v21 = vpack.c.bf16 %v362_v20, %v362_v20 }
  0x14   : > { %617 = vmatprep.subr.bf16.mxu1 %v706_v1 }
  0x16   : > { %604 = vmatpush3.bf16.msra.mxu0 %v671_v5 }
  0x17   : > { %618 = vmatpush3.bf16.msra.mxu1 %v672_v6  ;;  %605 = vmatprep.subr.bf16.mxu0 %v706_v1 }
  0x18   : > { %619 = vmatprep.subr.bf16.mxu1 %v706_v1 }
  0x1a   : > { %606 = vmatpush3.bf16.msra.mxu0 %v673_v7 }
  0x1b   : > { %620 = vmatpush3.bf16.msra.mxu1 %v674_v8  ;;  %607 = vmatprep.subr.bf16.mxu0 %v706_v1 }
  0x1c   : > { %621 = vmatprep.subr.bf16.mxu1 %v706_v1 }
  0x1e   : > { %608 = vmatpush3.bf16.msra.mxu0 %v675_v9 }
  0x1f   : > { %622 = vmatpush3.bf16.msra.mxu1 %v676_v11  ;;  %627 = vmatprep.subr.bf16.mxu0 %v706_v1 }
  0x21   : > { %610 = vmatmul.mubr.msk.bf16.vlgmr.msra.gmra.mxu0 %vm245_vm1, %v203_v13 }
  0x22   : > { %624 = vmatmul.mubr.msk.bf16.vlgmr.msra.gmra.mxu1 %vm245_vm1, %v191_v14  ;;  %628 = vmatpush3.bf16.msra.mxu0 %v677_v15 }
  0x23   : > { %629 = vmatprep.subr.bf16.mxu0 %v706_v1  ;;  %637 = vmatprep.mubr.msk.bf16.mxu0 %vm707_vm0, %v706_v1 }
  0x26   : > { %630 = vmatpush3.bf16.msra.mxu0 %v678_v16 }
  0x27   : > { %631 = vmatprep.subr.bf16.mxu0 %v706_v1 }
  0x2a   : > { %632 = vmatpush3.bf16.msra.mxu0 %v679_v17 }
  0x2b   : > { %633 = vmatprep.subr.bf16.mxu0 %v706_v1 }
  0x2e   : > { %634 = vmatpush3.bf16.msra.mxu0 %v680_v18 }
  0x2f   : > { %635 = vmatprep.subr.bf16.mxu0 %v706_v1 }
  0x32   : > { %636 = vmatpush3.bf16.msra.mxu0 %v681_v19 }
  0x35   : > { %638 = vmatmul.mubr.msk.bf16.vlgmr.msra.gmra.mxu0 %vm245_vm1, %v363_v21 }
  0xe1   : > { %v283_v22 = vpop.f32.mrf.mxu0 }
  0xe2   : > { %v356_v23 = vpop.f32.mrf.mxu1 }
  0xe3   : > { %v611_v24 = vpop.f32.mrf.mxu0  ;;  %v357_v30 = vadd.f32 %v356_v23, %v283_v22 }
  0xe4   : > { %v625_v25 = vpop.f32.mrf.mxu1 }
  0xe5   : > { %v286_v26 = vpop.f32.mrf.mxu0 }
  0xe6   : > { %v359_v27 = vpop.f32.mrf.mxu1 }
  0xe7   : > { %v612_v28 = vpop.f32.mrf.mxu0 }
  0xe8   : > { %v626_v29 = vpop.f32.mrf.mxu1 }
  0xf5   : > { %v442_v31 = vpop.f32.mrf.mxu0 }
  0xf6   : > { %v448_v33 = vadd.f32 %v442_v31, %v357_v30 }
  0xf7   : > { %v639_v34 = vpop.f32.mrf.mxu0 }
  0xf8   : > { %v456_v35 = vadd.f32 %v577_v32, %v448_v33 }
  0xf9   : > { %v445_v36 = vpop.f32.mrf.mxu0 }
  0xfa   : > { %v457_v37 = vmax.f32 %v456_v35, 0.0 }
  0xfb   : > { %v640_v38 = vpop.f32.mrf.mxu0 }
  0xfc   : > { %459 = vst.msk [vmem:[%s188_s5] sm:$0xff] %vm458_vm2, %v457_v37 }
  0xfd PF: > { %s13_s14 = sadd.s32 1, %s704_s14   ;;  %s828_s12 = smov %s700_s13 }
  0xfe   : > { %p10_p5 = scmp.ge.s32.totalorder %s13_s14, 6   ;;  %s829_s13 = smov %s831_s15 }
 0x100   :  { %12 = sbr.rel (!%p10_p5) target bundleno = 2 (0x2), region = 64 }

// kernel: encoder_forward.16
= control target key start
LH: loop header
LB: loop body
LE: loop exit
PB: predicated region body
PF: predicated region fallthrough
CT: control target
= control target key end

     0   :  { %s806_s15 = smov 0   ;;  %s808_s16 = smov 0   ;;  %s905_s0 = inlined_call_operand.vmem [shape: f32[4,10,80], index: 0, kind: input, shape index: {}]   ;;  %s906_s1 = inlined_call_operand.vmem [shape: bf16[3,80,64], index: 1, kind: input, shape index: {}]   ;;  %s907_s2 = inlined_call_operand.vmem [shape: f32[1,64], index: 2, kind: input, shape index: {}]   ;;  %s908_s3 = inlined_call_operand.vmem [shape: f32[4,8,64], index: 3, kind: input, shape index: {}]   ;;  %s909_s4 = inlined_call_operand.vmem [shape: f32[4,8,64], index: 4, kind: output, shape index: {}]  }
   0x1   :  { %s810_s17 = smov 0  }
   0x2 LB: > { %s26_s18 = sadd.s32 1, %s773_s16  ;;  %p607_p0 = scmp.ge.s32.totalorder %s777_s17, 1  ;;  %s777_s17 = sphi %s810_s17, %s14_s17   ;;  %s773_s16 = sphi %s808_s16, %s911_s16   ;;  %s769_s15 = sphi %s806_s15, %s910_s15  }
   0x3   : > { %p28_p1 = scmp.ge.s32.totalorder %s26_s18, 4  ;;  %p190_p2 = scmp.lt.s32.totalorder %s777_s17, 5 }
   0x5   : > { %s913_s18 = smov (%p28_p1, %s26_s18), 0  ;;  %p191_p3 = pnand %p607_p0, %p190_p2 }
   0x6   : > { %p225_p4 = scmp.lt.s32.totalorder (!%p191_p3), %s769_s15, 3 }
   0x7   : > { %194 = sbr.rel (%p191_p3) target bundleno = 255 (0xff), region = 36 }
   0xc   : > { %v740_v0 = vld [vmem:[%s906_s1 + $0x48] sm:$0xff]   ;;  %v779_v1 = vmov 0.0   ;;  %v741_v2 = vld [vmem:[%s906_s1 + $0x20] sm:$0xff]   ;;  %vm780_vm0 = vmmov 0   ;;  %v743_v4 = vld [vmem:[%s906_s1 + $0x18] sm:$0xff]   ;;  %s915_s15 = smov (!%p225_p4, %s769_s15), 3 }
   0xd   : > { %672 = vmatprep.subr.bf16.mxu0 %v779_v1  ;;  %686 = vmatprep.subr.bf16.mxu1 %v779_v1  ;;  %v742_v3 = vld [vmem:[%s906_s1 + $0x40] sm:$0xff]   ;;  %v744_v5 = vld [vmem:[%s906_s1 + $0x38] sm:$0xff]   ;;  %v745_v6 = vld [vmem:[%s906_s1 + $0x10] sm:$0xff]   ;;  %s653_s5 = sshll.u32 %s915_s15, 4  ;;  %vm300_vm1 = vcmask 654336   ;;  %vm515_vm2 = vcmask 523264  }
   0xe   : > { %673 = vmatpush3.bf16.msra.mxu0 %v740_v0  ;;  %682 = vmatprep.mubr.msk.bf16.mxu0 %vm780_vm0, %v779_v1  ;;  %v746_v7 = vld [vmem:[%s906_s1 + $0x30] sm:$0xff]   ;;  %v747_v8 = vld [vmem:[%s906_s1 + $0x8] sm:$0xff]   ;;  %s856_s12 = scalar_lea.vmem %s905_s0, %s653_s5  ;;  %v749_v11 = vld [vmem:[%s906_s1] sm:$0xff]   ;;  %s610_s5 = sshll.u32 %s915_s15, 3 }
   0xf   : > { %687 = vmatpush3.bf16.msra.mxu1 %v741_v2  ;;  %674 = vmatprep.subr.bf16.mxu0 %v779_v1  ;;  %v748_v9 = vld [vmem:[%s906_s1 + $0x28] sm:$0xff]   ;;  %v245_v12 = vld [vmem:[%s856_s12] sm:$0xff]  ;;  %v750_v15 = vld [vmem:[%s906_s1 + $0x70] sm:$0xff]   ;;  %s236_s8 = scalar_lea.vmem %s908_s3, %s610_s5  ;;  %s243_s15 = scalar_lea.vmem %s909_s4, %s610_s5 }
  0x10   : > { %688 = vmatprep.subr.bf16.mxu1 %v779_v1  ;;  %696 = vmatprep.mubr.msk.bf16.mxu1 %vm780_vm0, %v779_v1  ;;  %v257_v10 = vld [vmem:[%s856_s12 + $0x1] sm:$0xff]  ;;  %v246_v14 = vpack.c.bf16 %v245_v12, %v245_v12  ;;  %v753_v18 = vld [vmem:[%s906_s1 + $0x58] sm:$0xff]   ;;  %v754_v19 = vld [vmem:[%s906_s1 + $0x50] sm:$0xff]  }
  0x11   : > { %v258_v13 = vpack.c.bf16 %v257_v10, %v257_v10  ;;  %v751_v16 = vld [vmem:[%s906_s1 + $0x68] sm:$0xff]   ;;  %v752_v17 = vld [vmem:[%s906_s1 + $0x60] sm:$0xff]  }
  0x12   : > { %675 = vmatpush3.bf16.msra.mxu0 %v742_v3  ;;  %v417_v20 = vld [vmem:[%s856_s12 + $0x2] sm:$0xff]  ;;  %v650_v32 = vld [vmem:[%s907_s2] ss:$0 sm:$0xff] }
  0x13   : > { %689 = vmatpush3.bf16.msra.mxu1 %v743_v4  ;;  %676 = vmatprep.subr.bf16.mxu0 %v779_v1  ;;  %v418_v21 = vpack.c.bf16 %v417_v20, %v417_v20  ;;  %v512_v34 = vld [vmem:[%s236_s8] sm:$0xff] }
  0x14   : > { %690 = vmatprep.subr.bf16.mxu1 %v779_v1 }
  0x16   : > { %677 = vmatpush3.bf16.msra.mxu0 %v744_v5 }
  0x17   : > { %691 = vmatpush3.bf16.msra.mxu1 %v745_v6  ;;  %678 = vmatprep.subr.bf16.mxu0 %v779_v1 }
  0x18   : > { %692 = vmatprep.subr.bf16.mxu1 %v779_v1 }
  0x1a   : > { %679 = vmatpush3.bf16.msra.mxu0 %v746_v7 }
  0x1b   : > { %693 = vmatpush3.bf16.msra.mxu1 %v747_v8  ;;  %680 = vmatprep.subr.bf16.mxu0 %v779_v1 }
  0x1c   : > { %694 = vmatprep.subr.bf16.mxu1 %v779_v1 }
  0x1e   : > { %681 = vmatpush3.bf16.msra.mxu0 %v748_v9 }
  0x1f   : > { %695 = vmatpush3.bf16.msra.mxu1 %v749_v11  ;;  %700 = vmatprep.subr.bf16.mxu0 %v779_v1 }
  0x21   : > { %683 = vmatmul.mubr.msk.bf16.vlgmr.msra.gmra.mxu0 %vm300_vm1, %v258_v13 }
  0x22   : > { %697 = vmatmul.mubr.msk.bf16.vlgmr.msra.gmra.mxu1 %vm300_vm1, %v246_v14  ;;  %701 = vmatpush3.bf16.msra.mxu0 %v750_v15 }
  0x23   : > { %702 = vmatprep.subr.bf16.mxu0 %v779_v1  ;;  %710 = vmatprep.mubr.msk.bf16.mxu0 %vm780_vm0, %v779_v1 }
  0x26   : > { %703 = vmatpush3.bf16.msra.mxu0 %v751_v16 }
  0x27   : > { %704 = vmatprep.subr.bf16.mxu0 %v779_v1 }
  0x2a   : > { %705 = vmatpush3.bf16.msra.mxu0 %v752_v17 }
  0x2b   : > { %706 = vmatprep.subr.bf16.mxu0 %v779_v1 }
  0x2e   : > { %707 = vmatpush3.bf16.msra.mxu0 %v753_v18 }
  0x2f   : > { %708 = vmatprep.subr.bf16.mxu0 %v779_v1 }
  0x32   : > { %709 = vmatpush3.bf16.msra.mxu0 %v754_v19 }
  0x35   : > { %711 = vmatmul.mubr.msk.bf16.vlgmr.msra.gmra.mxu0 %vm300_vm1, %v418_v21 }
  0xe1   : > { %v338_v22 = vpop.f32.mrf.mxu0 }
  0xe2   : > { %v411_v23 = vpop.f32.mrf.mxu1 }
  0xe3   : > { %v684_v24 = vpop.f32.mrf.mxu0  ;;  %v412_v30 = vadd.f32 %v411_v23, %v338_v22 }
  0xe4   : > { %v698_v25 = vpop.f32.mrf.mxu1 }
  0xe5   : > { %v341_v26 = vpop.f32.mrf.mxu0 }
  0xe6   : > { %v414_v27 = vpop.f32.mrf.mxu1 }
  0xe7   : > { %v685_v28 = vpop.f32.mrf.mxu0 }
  0xe8   : > { %v699_v29 = vpop.f32.mrf.mxu1 }
  0xf5   : > { %v497_v31 = vpop.f32.mrf.mxu0 }
  0xf6   : > { %v503_v33 = vadd.f32 %v497_v31, %v412_v30 }
  0xf7   : > { %v712_v35 = vpop.f32.mrf.mxu0 }
  0xf8   : > { %v511_v36 = vadd.f32 %v650_v32, %v503_v33 }
  0xf9   : > { %v500_v37 = vpop.f32.mrf.mxu0 }
  0xfa   : > { %v513_v38 = vadd.f32 %v512_v34, %v511_v36 }
  0xfb   : > { %v713_v39 = vpop.f32.mrf.mxu0 }
  0xfc   : > { %v514_v40 = vmax.f32 %v513_v38, 0.0 }
  0xfe   : > { %516 = vst.msk [vmem:[%s243_s15] sm:$0xff] %vm515_vm2, %v514_v40 }
  0xff PF: > { %s14_s17 = sadd.s32 1, %s777_s17   ;;  %s910_s15 = smov %s773_s16 }
 0x100   : > { %p11_p5 = scmp.ge.s32.totalorder %s14_s17, 6   ;;  %s911_s16 = smov %s913_s18 }
 0x102   :  { %13 = sbr.rel (!%p11_p5) target bundleno = 2 (0x2), region = 71 }

// kernel: encoder_forward.17
= control target key start
LH: loop header
LB: loop body
LE: loop exit
PB: predicated region body
PF: predicated region fallthrough
CT: control target
= control target key end

     0   :  { %s500_s12 = smov 0   ;;  %s502_s13 = smov 0   ;;  %s560_s0 = inlined_call_operand.vmem [shape: f32[4,4,128], index: 0, kind: input, shape index: {}]   ;;  %s561_s1 = inlined_call_operand.vmem [shape: bf16[1,128,64], index: 1, kind: input, shape index: {}]   ;;  %s562_s2 = inlined_call_operand.vmem [shape: f32[1,64], index: 2, kind: input, shape index: {}]   ;;  %s563_s3 = inlined_call_operand.vmem [shape: f32[4,4,64], index: 3, kind: output, shape index: {}]  }
   0x1   :  { %s504_s14 = smov 0  }
   0x2 LB: > { %s25_s15 = sadd.s32 1, %s472_s13  ;;  %p377_p0 = scmp.ge.s32.totalorder %s476_s14, 1  ;;  %s476_s14 = sphi %s504_s14, %s13_s14   ;;  %s472_s13 = sphi %s502_s13, %s565_s13   ;;  %s468_s12 = sphi %s500_s12, %s564_s12  }
   0x3   : > { %p27_p1 = scmp.ge.s32.totalorder %s25_s15, 4  ;;  %p150_p2 = scmp.lt.s32.totalorder %s476_s14, 5 }
   0x5   : > { %s567_s15 = smov (%p27_p1, %s25_s15), 0  ;;  %p151_p3 = pnand %p377_p0, %p150_p2 }
   0x6   : > { %p175_p4 = scmp.lt.s32.totalorder (!%p151_p3), %s468_s12, 3 }
   0x7   : > { %154 = sbr.rel (%p151_p3) target bundleno = 244 (0xf4), region = 32 }
   0xc   : > { %v446_v0 = vld [vmem:[%s561_s1 + $0x38] sm:$0xff]   ;;  %v478_v1 = vmov 0.0   ;;  %v447_v2 = vld [vmem:[%s561_s1 + $0x30] sm:$0xff]   ;;  %vm479_vm0 = vmmov 0   ;;  %v448_v3 = vld [vmem:[%s561_s1 + $0x28] sm:$0xff]   ;;  %s569_s12 = smov (!%p175_p4, %s468_s12), 3 }
   0xd   : > { %400 = vmatprep.subr.bf16.mxu0 %v478_v1  ;;  %416 = vmatprep.mubr.msk.bf16.mxu0 %vm479_vm0, %v478_v1  ;;  %v449_v4 = vld [vmem:[%s561_s1 + $0x20] sm:$0xff]   ;;  %v450_v5 = vld [vmem:[%s561_s1 + $0x18] sm:$0xff]   ;;  %v451_v6 = vld [vmem:[%s561_s1 + $0x10] sm:$0xff]   ;;  %s378_s28 = sshll.u32 %s569_s12, 2  ;;  %vm300_vm1 = vcmask 519168  }
   0xe   : > { %401 = vmatpush3.bf16.msra.mxu0 %v446_v0  ;;  %v452_v7 = vld [vmem:[%s561_s1 + $0x8] sm:$0xff]   ;;  %s178_s6 = scalar_lea.vmem %s560_s0, %s378_s28  ;;  %v453_v8 = vld [vmem:[%s561_s1] sm:$0xff]   ;;  %s185_s16 = scalar_lea.vmem %s563_s3, %s378_s28 }
   0xf   : > { %402 = vmatprep.subr.bf16.mxu0 %v478_v1  ;;  %v187_v9 = vld [vmem:[%s178_s6] sm:$0xf] }
  0x10   : > { %v188_v10 = vpack.c.bf16 %v187_v9, %v187_v9  ;;  %v380_v11 = vld [vmem:[%s562_s2] ss:$0 sm:$0xff] }
  0x12   : > { %403 = vmatpush3.bf16.msra.mxu0 %v447_v2 }
  0x13   : > { %404 = vmatprep.subr.bf16.mxu0 %v478_v1 }
  0x16   : > { %405 = vmatpush3.bf16.msra.mxu0 %v448_v3 }
  0x17   : > { %406 = vmatprep.subr.bf16.mxu0 %v478_v1 }
  0x1a   : > { %407 = vmatpush3.bf16.msra.mxu0 %v449_v4 }
  0x1b   : > { %408 = vmatprep.subr.bf16.mxu0 %v478_v1 }
  0x1e   : > { %409 = vmatpush3.bf16.msra.mxu0 %v450_v5 }
  0x1f   : > { %410 = vmatprep.subr.bf16.mxu0 %v478_v1 }
  0x22   : > { %411 = vmatpush3.bf16.msra.mxu0 %v451_v6 }
  0x23   : > { %412 = vmatprep.subr.bf16.mxu0 %v478_v1 }
  0x26   : > { %413 = vmatpush3.bf16.msra.mxu0 %v452_v7 }
  0x27   : > { %414 = vmatprep.subr.bf16.mxu0 %v478_v1 }
  0x2a   : > { %415 = vmatpush3.bf16.msra.mxu0 %v453_v8 }
  0x2d   : > { %417 = vmatmul.mubr.bf16.vlgmr.msra.gmra.mxu0 %v188_v10 }
  0xed   : > { %v294_v12 = vpop.f32.mrf.mxu0 }
  0xee   : > { %v295_v13 = vadd.f32 %v380_v11, %v294_v12 }
  0xef   : > { %v418_v14 = vpop.f32.mrf.mxu0 }
  0xf0   : > { %301 = vst.msk [vmem:[%s185_s16] sm:$0xf] %vm300_vm1, %v295_v13 }
  0xf1   : > { %v297_v15 = vpop.f32.mrf.mxu0 }
  0xf3   : > { %v419_v16 = vpop.f32.mrf.mxu0 }
  0xf4 PF: > { %s13_s14 = sadd.s32 1, %s476_s14   ;;  %s564_s12 = smov %s472_s13 }
  0xf5   : > { %p10_p5 = scmp.ge.s32.totalorder %s13_s14, 6   ;;  %s565_s13 = smov %s567_s15 }
  0xf7   :  { %12 = sbr.rel (!%p10_p5) target bundleno = 2 (0x2), region = 62 }

// kernel: encoder_forward.18
= control target key start
LH: loop header
LB: loop body
LE: loop exit
PB: predicated region body
PF: predicated region fallthrough
CT: control target
= control target key end

     0   :  { %s687_s12 = smov 0   ;;  %s689_s13 = smov 0   ;;  %s819_s0 = inlined_call_operand.vmem [shape: f32[4,5,160], index: 0, kind: input, shape index: {}]   ;;  %s820_s1 = inlined_call_operand.vmem [shape: bf16[2,160,64], index: 1, kind: input, shape index: {}]   ;;  %s821_s2 = inlined_call_operand.vmem [shape: f32[1,64], index: 2, kind: input, shape index: {}]   ;;  %s822_s3 = inlined_call_operand.vmem [shape: f32[4,4,64], index: 3, kind: output, shape index: {}]  }
   0x1   :  { %s691_s14 = smov 0  }
   0x2 LB: > { %s25_s15 = sadd.s32 1, %s660_s13  ;;  %p547_p0 = scmp.ge.s32.totalorder %s664_s14, 1  ;;  %s664_s14 = sphi %s691_s14, %s13_s14   ;;  %s660_s13 = sphi %s689_s13, %s824_s13   ;;  %s656_s12 = sphi %s687_s12, %s823_s12  }
   0x3   : > { %p27_p1 = scmp.ge.s32.totalorder %s25_s15, 4  ;;  %p151_p2 = scmp.lt.s32.totalorder %s664_s14, 5 }
   0x5   : > { %s826_s15 = smov (%p27_p1, %s25_s15), 0  ;;  %p152_p3 = pnand %p547_p0, %p151_p2 }
   0x6   : > { %p177_p4 = scmp.lt.s32.totalorder (!%p152_p3), %s656_s12, 3 }
   0x7   : > { %155 = sbr.rel (%p152_p3) target bundleno = 253 (0xfd), region = 32 }
   0xc   : > { %v622_v0 = vld [vmem:[%s820_s1 + $0x88] sm:$0xff]   ;;  %v666_v1 = vmov 0   ;;  %v623_v2 = vld [vmem:[%s820_s1 + $0x38] sm:$0xff]   ;;  %v624_v3 = vld [vmem:[%s820_s1 + $0x80] sm:$0xff]   ;;  %s828_s12 = smov (!%p177_p4, %s656_s12), 3  ;;  %vm314_vm0 = vcmask 261120  }
   0xd   : > { %318 = vmatprep.subr.bf16.mxu0 %v666_v1  ;;  %421 = vmatprep.subr.bf16.mxu1 %v666_v1  ;;  %v625_v4 = vld [vmem:[%s820_s1 + $0x30] sm:$0xff]   ;;  %v626_v5 = vld [vmem:[%s820_s1 + $0x78] sm:$0xff]   ;;  %v627_v6 = vld [vmem:[%s820_s1 + $0x28] sm:$0xff]   ;;  %s596_s7 = sshll.u32 %s828_s12, 4  ;;  %s550_s17 = sshll.u32 %s828_s12, 2  ;;  %vm470_vm1 = vcmask 519168  }
   0xe   : > { %319 = vmatpush1.bf16.msra.mxu0 %v622_v0  ;;  %422 = vmatpush1.bf16.msra.mxu1 %v623_v2  ;;  %v628_v7 = vld [vmem:[%s820_s1 + $0x70] sm:$0xff]   ;;  %v629_v8 = vld [vmem:[%s820_s1 + $0x20] sm:$0xff]   ;;  %v630_v9 = vld [vmem:[%s820_s1 + $0x68] sm:$0xff]   ;;  %s755_s16 = scalar_lea.vmem %s819_s0, %s596_s7  ;;  %s188_s19 = scalar_lea.vmem %s822_s3, %s550_s17 }
   0xf   : > { %320 = vmatprep.subr.bf16.mxu0 %v666_v1  ;;  %423 = vmatprep.subr.bf16.mxu1 %v666_v1  ;;  %v631_v10 = vld [vmem:[%s820_s1 + $0x18] sm:$0xff]   ;;  %v632_v11 = vld [vmem:[%s820_s1 + $0x60] sm:$0xff]   ;;  %v633_v12 = vld [vmem:[%s820_s1 + $0x10] sm:$0xff]  }
  0x10   : > { %v215_v13 = vld [vmem:[%s755_s16 + $0x8] sm:$0x1e]  ;;  %v634_v17 = vld [vmem:[%s820_s1 + $0x58] sm:$0xff]   ;;  %v214_v18 = vld [vmem:[%s755_s16] sm:$0x1e] }
  0x11   : > { %v191_v14 = vld [vmem:[%s755_s16 + $0x8] sm:$0xf]  ;;  %v217_v15 = vpack.c.bf16 %v215_v13, %v215_v13  ;;  %v216_v23 = vpack.c.bf16 %v214_v18, %v214_v18  ;;  %v636_v24 = vld [vmem:[%s820_s1 + $0x50] sm:$0xff]   ;;  %v637_v25 = vld [vmem:[%s820_s1] sm:$0xff]  }
  0x12   : > { %321 = vmatpush1.bf16.msra.mxu0 %v624_v3  ;;  %424 = vmatpush1.bf16.msra.mxu1 %v625_v4  ;;  %v193_v16 = vpack.c.bf16 %v191_v14, %v191_v14  ;;  %v635_v19 = vld [vmem:[%s820_s1 + $0x8] sm:$0xff]   ;;  %v638_v28 = vld [vmem:[%s820_s1 + $0x98] sm:$0xff]   ;;  %v640_v32 = vld [vmem:[%s820_s1 + $0x90] sm:$0xff]  }
  0x13   : > { %322 = vmatprep.subr.bf16.mxu0 %v666_v1  ;;  %425 = vmatprep.subr.bf16.mxu1 %v666_v1  ;;  %v247_v20 = vshrl.u32 %v217_v15, 16  ;;  %v249_v21 = vshll.u32 %v217_v15, 16  ;;  %v242_v27 = vshll.u32 %v216_v23, 16  ;;  %v639_v29 = vld [vmem:[%s820_s1 + $0x48] sm:$0xff]   ;;  %v240_v30 = vshrl.u32 %v216_v23, 16  ;;  %v641_v33 = vld [vmem:[%s820_s1 + $0x40] sm:$0xff]  }
  0x14   : > { %592 = vmatprep.mubr.msk.bf16.mxu1 %vm314_vm0, %v193_v16  ;;  %v190_v34 = vld [vmem:[%s755_s16] sm:$0xf] }
  0x15   : > { %v251_v22 = vrot.slane %v249_v21, 1  ;;  %v244_v31 = vrot.slane %v242_v27, 1  ;;  %v192_v36 = vpack.c.bf16 %v190_v34, %v190_v34  ;;  %v593_v39 = vld [vmem:[%s821_s2] ss:$0 sm:$0xff] }
  0x16   : > { %323 = vmatpush1.bf16.msra.mxu0 %v626_v5  ;;  %426 = vmatpush1.bf16.msra.mxu1 %v627_v6 }
  0x17   : > { %324 = vmatprep.subr.bf16.mxu0 %v666_v1  ;;  %427 = vmatprep.subr.bf16.mxu1 %v666_v1  ;;  %v252_v26 = vor.u32 %v251_v22, %v247_v20  ;;  %v245_v35 = vor.u32 %v244_v31, %v240_v30 }
  0x19   : > { %581 = vmatprep.mubr.msk.bf16.mxu0 %vm314_vm0, %v252_v26 }
  0x1a   : > { %325 = vmatpush1.bf16.msra.mxu0 %v628_v7  ;;  %428 = vmatpush1.bf16.msra.mxu1 %v629_v8 }
  0x1b   : > { %326 = vmatprep.subr.bf16.mxu0 %v666_v1  ;;  %429 = vmatprep.subr.bf16.mxu1 %v666_v1 }
  0x1e   : > { %327 = vmatpush1.bf16.msra.mxu0 %v630_v9  ;;  %430 = vmatpush1.bf16.msra.mxu1 %v631_v10 }
  0x1f   : > { %328 = vmatprep.subr.bf16.mxu0 %v666_v1  ;;  %431 = vmatprep.subr.bf16.mxu1 %v666_v1 }
  0x22   : > { %329 = vmatpush1.bf16.msra.mxu0 %v632_v11  ;;  %432 = vmatpush1.bf16.msra.mxu1 %v633_v12 }
  0x23   : > { %330 = vmatprep.subr.bf16.mxu0 %v666_v1  ;;  %433 = vmatprep.subr.bf16.mxu1 %v666_v1 }
  0x26   : > { %331 = vmatpush1.bf16.msra.mxu0 %v634_v17  ;;  %434 = vmatpush1.bf16.msra.mxu1 %v635_v19 }
  0x27   : > { %332 = vmatprep.subr.bf16.mxu0 %v666_v1  ;;  %435 = vmatprep.subr.bf16.mxu1 %v666_v1 }
  0x2a   : > { %333 = vmatpush1.bf16.msra.mxu0 %v636_v24  ;;  %436 = vmatpush1.bf16.msra.mxu1 %v637_v25 }
  0x2b   : > { %346 = vmatprep.subr.bf16.mxu0 %v666_v1  ;;  %449 = vmatprep.subr.bf16.mxu1 %v666_v1 }
  0x2e   : > { %347 = vmatpush2.bf16.msra.mxu0 %v638_v28  ;;  %450 = vmatpush2.bf16.msra.mxu1 %v639_v29 }
  0x2f   : > { %348 = vmatprep.subr.bf16.mxu0 %v666_v1  ;;  %451 = vmatprep.subr.bf16.mxu1 %v666_v1 }
  0x32   : > { %349 = vmatpush2.bf16.msra.mxu0 %v640_v32  ;;  %452 = vmatpush2.bf16.msra.mxu1 %v641_v33 }
  0x35   : > { %351 = vmatmul.mubr.bf16.vlgmr.msra.gmra.mxu0 %v245_v35  ;;  %454 = vmatmul.mubr.bf16.vlgmr.msra.gmra.mxu1 %v192_v36 }
  0xf5   : > { %v352_v37 = vpop.f32.mrf.mxu0  ;;  %v455_v38 = vpop.f32.mrf.mxu1 }
  0xf6   : > { %v456_v40 = vadd.f32 %v455_v38, %v352_v37 }
  0xf7   : > { %v354_v41 = vpop.f32.mrf.mxu0  ;;  %v457_v42 = vpop.f32.mrf.mxu1 }
  0xf8   : > { %v468_v43 = vadd.f32 %v593_v39, %v456_v40 }
  0xf9   : > { %v355_v44 = vpop.f32.mrf.mxu0  ;;  %v458_v45 = vpop.f32.mrf.mxu1 }
  0xfa   : > { %v469_v46 = vmax.f32 %v468_v43, 0.0 }
  0xfb   : > { %v356_v47 = vpop.f32.mrf.mxu0  ;;  %v459_v48 = vpop.f32.mrf.mxu1 }
  0xfc   : > { %471 = vst.msk [vmem:[%s188_s19] sm:$0xf] %vm470_vm1, %v469_v46 }
  0xfd PF: > { %s13_s14 = sadd.s32 1, %s664_s14   ;;  %s823_s12 = smov %s660_s13 }
  0xfe   : > { %p10_p5 = scmp.ge.s32.totalorder %s13_s14, 6   ;;  %s824_s13 = smov %s826_s15 }
 0x100   :  { %12 = sbr.rel (!%p10_p5) target bundleno = 2 (0x2), region = 63 }

// kernel: encoder_forward.19
= control target key start
LH: loop header
LB: loop body
LE: loop exit
PB: predicated region body
PF: predicated region fallthrough
CT: control target
= control target key end

     0   :  { %s844_s15 = smov 0   ;;  %s846_s16 = smov 0   ;;  %s977_s0 = inlined_call_operand.vmem [shape: f32[4,6,96], index: 0, kind: input, shape index: {}]   ;;  %s978_s1 = inlined_call_operand.vmem [shape: bf16[3,96,64], index: 1, kind: input, shape index: {}]   ;;  %s979_s2 = inlined_call_operand.vmem [shape: f32[1,64], index: 2, kind: input, shape index: {}]   ;;  %s980_s3 = inlined_call_operand.vmem [shape: f32[4,4,64], index: 3, kind: input, shape index: {}]   ;;  %s981_s4 = inlined_call_operand.vmem [shape: f32[4,4,64], index: 4, kind: output, shape index: {}]  }
   0x1   :  { %s848_s17 = smov 0  }
   0x2 LB: > { %s26_s18 = sadd.s32 1, %s811_s16  ;;  %p628_p0 = scmp.ge.s32.totalorder %s815_s17, 1  ;;  %s815_s17 = sphi %s848_s17, %s14_s17   ;;  %s811_s16 = sphi %s846_s16, %s983_s16   ;;  %s807_s15 = sphi %s844_s15, %s982_s15  }
   0x3   : > { %p28_p1 = scmp.ge.s32.totalorder %s26_s18, 4  ;;  %p189_p2 = scmp.lt.s32.totalorder %s815_s17, 5 }
   0x5   : > { %s985_s18 = smov (%p28_p1, %s26_s18), 0  ;;  %p190_p3 = pnand %p628_p0, %p189_p2 }
   0x6   : > { %p223_p4 = scmp.lt.s32.totalorder (!%p190_p3), %s807_s15, 3 }
   0x7   : > { %193 = sbr.rel (%p190_p3) target bundleno = 263 (0x107), region = 36 }
   0xc   : > { %v775_v0 = vld [vmem:[%s978_s1 + $0x58] sm:$0xff]   ;;  %v817_v1 = vmov 0.0   ;;  %v776_v2 = vld [vmem:[%s978_s1 + $0x28] sm:$0xff]   ;;  %v777_v3 = vld [vmem:[%s978_s1 + $0x50] sm:$0xff]   ;;  %vm818_vm0 = vmmov 0   ;;  %s987_s15 = smov (!%p223_p4, %s807_s15), 3 }
   0xd   : > { %701 = vmatprep.subr.bf16.mxu0 %v817_v1  ;;  %717 = vmatprep.subr.bf16.mxu1 %v817_v1  ;;  %v778_v4 = vld [vmem:[%s978_s1 + $0x20] sm:$0xff]   ;;  %v779_v5 = vld [vmem:[%s978_s1 + $0x48] sm:$0xff]   ;;  %v780_v6 = vld [vmem:[%s978_s1 + $0x18] sm:$0xff]   ;;  %s629_s9 = sshll.u32 %s987_s15, 3  ;;  %vm307_vm1 = vcmask 785408   ;;  %s630_s11 = sshll.u32 %s987_s15, 2 }
   0xe   : > { %702 = vmatpush3.bf16.msra.mxu0 %v775_v0  ;;  %713 = vmatprep.mubr.msk.bf16.mxu0 %vm818_vm0, %v817_v1  ;;  %v781_v7 = vld [vmem:[%s978_s1 + $0x40] sm:$0xff]   ;;  %v782_v8 = vld [vmem:[%s978_s1 + $0x10] sm:$0xff]   ;;  %v783_v9 = vld [vmem:[%s978_s1 + $0x38] sm:$0xff]   ;;  %s915_s20 = scalar_lea.vmem %s977_s0, %s629_s9  ;;  %s233_s14 = scalar_lea.vmem %s980_s3, %s630_s11  ;;  %vm536_vm2 = vcmask 519168  }
   0xf   : > { %718 = vmatpush3.bf16.msra.mxu1 %v776_v2  ;;  %703 = vmatprep.subr.bf16.mxu0 %v817_v1  ;;  %v784_v10 = vld [vmem:[%s978_s1 + $0x8] sm:$0xff]   ;;  %v785_v11 = vld [vmem:[%s978_s1 + $0x30] sm:$0xff]   ;;  %v256_v12 = vld [vmem:[%s915_s20 + $0x1] sm:$0xf]  ;;  %s240_s15 = scalar_lea.vmem %s981_s4, %s630_s11 }
  0x10   : > { %719 = vmatprep.subr.bf16.mxu1 %v817_v1  ;;  %729 = vmatprep.mubr.msk.bf16.mxu1 %vm818_vm0, %v817_v1  ;;  %v786_v13 = vld [vmem:[%s978_s1] sm:$0xff]   ;;  %v257_v15 = vpack.c.bf16 %v256_v12, %v256_v12  ;;  %v787_v17 = vld [vmem:[%s978_s1 + $0x88] sm:$0xff]   ;;  %v789_v19 = vld [vmem:[%s978_s1 + $0x78] sm:$0xff]  }
  0x11   : > { %v242_v14 = vld [vmem:[%s915_s20] sm:$0xf]  ;;  %v790_v20 = vld [vmem:[%s978_s1 + $0x70] sm:$0xff]   ;;  %v791_v21 = vld [vmem:[%s978_s1 + $0x68] sm:$0xff]  }
  0x12   : > { %704 = vmatpush3.bf16.msra.mxu0 %v777_v3  ;;  %v243_v16 = vpack.c.bf16 %v242_v14, %v242_v14  ;;  %v788_v18 = vld [vmem:[%s978_s1 + $0x80] sm:$0xff]  }
  0x13   : > { %720 = vmatpush3.bf16.msra.mxu1 %v778_v4  ;;  %705 = vmatprep.subr.bf16.mxu0 %v817_v1  ;;  %v792_v22 = vld [vmem:[%s978_s1 + $0x60] sm:$0xff]  }
  0x14   : > { %721 = vmatprep.subr.bf16.mxu1 %v817_v1  ;;  %v430_v23 = vld [vmem:[%s915_s20 + $0x2] sm:$0xf]  ;;  %v677_v35 = vld [vmem:[%s979_s2] ss:$0 sm:$0xff] }
  0x15   : > { %v431_v24 = vpack.c.bf16 %v430_v23, %v430_v23  ;;  %v533_v37 = vld [vmem:[%s233_s14] sm:$0xf] }
  0x16   : > { %706 = vmatpush3.bf16.msra.mxu0 %v779_v5 }
  0x17   : > { %722 = vmatpush3.bf16.msra.mxu1 %v780_v6  ;;  %707 = vmatprep.subr.bf16.mxu0 %v817_v1 }
  0x18   : > { %723 = vmatprep.subr.bf16.mxu1 %v817_v1 }
  0x1a   : > { %708 = vmatpush3.bf16.msra.mxu0 %v781_v7 }
  0x1b   : > { %724 = vmatpush3.bf16.msra.mxu1 %v782_v8  ;;  %709 = vmatprep.subr.bf16.mxu0 %v817_v1 }
  0x1c   : > { %725 = vmatprep.subr.bf16.mxu1 %v817_v1 }
  0x1e   : > { %710 = vmatpush3.bf16.msra.mxu0 %v783_v9 }
  0x1f   : > { %726 = vmatpush3.bf16.msra.mxu1 %v784_v10  ;;  %711 = vmatprep.subr.bf16.mxu0 %v817_v1 }
  0x20   : > { %727 = vmatprep.subr.bf16.mxu1 %v817_v1 }
  0x22   : > { %712 = vmatpush3.bf16.msra.mxu0 %v785_v11 }
  0x23   : > { %728 = vmatpush3.bf16.msra.mxu1 %v786_v13  ;;  %733 = vmatprep.subr.bf16.mxu0 %v817_v1 }
  0x25   : > { %714 = vmatmul.mubr.msk.bf16.vlgmr.msra.gmra.mxu0 %vm307_vm1, %v257_v15 }
  0x26   : > { %730 = vmatmul.mubr.msk.bf16.vlgmr.msra.gmra.mxu1 %vm307_vm1, %v243_v16  ;;  %734 = vmatpush3.bf16.msra.mxu0 %v787_v17 }
  0x27   : > { %735 = vmatprep.subr.bf16.mxu0 %v817_v1  ;;  %745 = vmatprep.mubr.msk.bf16.mxu0 %vm818_vm0, %v817_v1 }
  0x2a   : > { %736 = vmatpush3.bf16.msra.mxu0 %v788_v18 }
  0x2b   : > { %737 = vmatprep.subr.bf16.mxu0 %v817_v1 }
  0x2e   : > { %738 = vmatpush3.bf16.msra.mxu0 %v789_v19 }
  0x2f   : > { %739 = vmatprep.subr.bf16.mxu0 %v817_v1 }
  0x32   : > { %740 = vmatpush3.bf16.msra.mxu0 %v790_v20 }
  0x33   : > { %741 = vmatprep.subr.bf16.mxu0 %v817_v1 }
  0x36   : > { %742 = vmatpush3.bf16.msra.mxu0 %v791_v21 }
  0x37   : > { %743 = vmatprep.subr.bf16.mxu0 %v817_v1 }
  0x3a   : > { %744 = vmatpush3.bf16.msra.mxu0 %v792_v22 }
  0x3d   : > { %746 = vmatmul.mubr.msk.bf16.vlgmr.msra.gmra.mxu0 %vm307_vm1, %v431_v24 }
  0xe5   : > { %v345_v25 = vpop.f32.mrf.mxu0 }
  0xe6   : > { %v424_v26 = vpop.f32.mrf.mxu1 }
  0xe7   : > { %v715_v27 = vpop.f32.mrf.mxu0  ;;  %v425_v33 = vadd.f32 %v424_v26, %v345_v25 }
  0xe8   : > { %v731_v28 = vpop.f32.mrf.mxu1 }
  0xe9   : > { %v348_v29 = vpop.f32.mrf.mxu0 }
  0xea   : > { %v427_v30 = vpop.f32.mrf.mxu1 }
  0xeb   : > { %v716_v31 = vpop.f32.mrf.mxu0 }
  0xec   : > { %v732_v32 = vpop.f32.mrf.mxu1 }
  0xfd   : > { %v518_v34 = vpop.f32.mrf.mxu0 }
  0xfe   : > { %v524_v36 = vadd.f32 %v518_v34, %v425_v33 }
  0xff   : > { %v747_v38 = vpop.f32.mrf.mxu0 }
 0x100   : > { %v532_v39 = vadd.f32 %v677_v35, %v524_v36 }
 0x101   : > { %v521_v40 = vpop.f32.mrf.mxu0 }
 0x102   : > { %v534_v41 = vadd.f32 %v533_v37, %v532_v39 }
 0x103   : > { %v748_v42 = vpop.f32.mrf.mxu0 }
 0x104   : > { %v535_v43 = vmax.f32 %v534_v41, 0.0 }
 0x106   : > { %537 = vst.msk [vmem:[%s240_s15] sm:$0xf] %vm536_vm2, %v535_v43 }
 0x107 PF: > { %s14_s17 = sadd.s32 1, %s815_s17   ;;  %s982_s15 = smov %s811_s16 }
 0x108   : > { %p11_p5 = scmp.ge.s32.totalorder %s14_s17, 6   ;;  %s983_s16 = smov %s985_s18 }
 0x10a   :  { %13 = sbr.rel (!%p11_p5) target bundleno = 2 (0x2), region = 71 }

// kernel: encoder_forward.21
= control target key start
LH: loop header
LB: loop body
LE: loop exit
PB: predicated region body
PF: predicated region fallthrough
CT: control target
= control target key end

     0   :  { %s737_s12 = smov 0   ;;  %s739_s13 = smov 0   ;;  %s879_s0 = inlined_call_operand.vmem [shape: f32[4,3,192], index: 0, kind: input, shape index: {}]   ;;  %s880_s1 = inlined_call_operand.vmem [shape: bf16[2,192,64], index: 1, kind: input, shape index: {}]   ;;  %s881_s2 = inlined_call_operand.vmem [shape: f32[1,64], index: 2, kind: input, shape index: {}]   ;;  %s882_s3 = inlined_call_operand.vmem [shape: f32[4,2,64], index: 3, kind: output, shape index: {}]  }
   0x1   :  { %s741_s14 = smov 0  }
   0x2 LB: > { %s25_s15 = sadd.s32 1, %s710_s13  ;;  %p583_p0 = scmp.ge.s32.totalorder %s714_s14, 1  ;;  %s714_s14 = sphi %s741_s14, %s13_s14   ;;  %s710_s13 = sphi %s739_s13, %s884_s13   ;;  %s706_s12 = sphi %s737_s12, %s883_s12  }
   0x3   : > { %p27_p1 = scmp.ge.s32.totalorder %s25_s15, 4  ;;  %p151_p2 = scmp.lt.s32.totalorder %s714_s14, 5 }
   0x5   : > { %s886_s15 = smov (%p27_p1, %s25_s15), 0  ;;  %p152_p3 = pnand %p583_p0, %p151_p2 }
   0x6   : > { %p177_p4 = scmp.lt.s32.totalorder (!%p152_p3), %s706_s12, 3 }
   0x7   : > { %155 = sbr.rel (%p152_p3) target bundleno = 261 (0x105), region = 32 }
   0xc   : > { %v666_v0 = vld [vmem:[%s880_s1 + $0x98] sm:$0xff]   ;;  %v716_v1 = vmov 0   ;;  %v668_v3 = vld [vmem:[%s880_s1 + $0x90] sm:$0xff]   ;;  %v670_v5 = vld [vmem:[%s880_s1 + $0x88] sm:$0xff]   ;;  %s888_s12 = smov (!%p177_p4, %s706_s12), 3  ;;  %vm338_vm0 = vcmask 523264  }
   0xd   : > { %342 = vmatprep.subr.bf16.mxu0 %v716_v1  ;;  %457 = vmatprep.subr.bf16.mxu1 %v716_v1  ;;  %v667_v2 = vld [vmem:[%s880_s1 + $0x38] sm:$0xff]   ;;  %v669_v4 = vld [vmem:[%s880_s1 + $0x30] sm:$0xff]   ;;  %v671_v6 = vld [vmem:[%s880_s1 + $0x28] sm:$0xff]   ;;  %s640_s11 = sshll.u32 %s888_s12, 3  ;;  %s586_s24 = sshll.u32 %s888_s12, 1  ;;  %vm506_vm1 = vcmask 517120  }
   0xe   : > { %343 = vmatpush1.bf16.msra.mxu0 %v666_v0  ;;  %458 = vmatpush1.bf16.msra.mxu1 %v667_v2  ;;  %v672_v7 = vld [vmem:[%s880_s1 + $0x80] sm:$0xff]   ;;  %v674_v9 = vld [vmem:[%s880_s1 + $0x78] sm:$0xff]   ;;  %v676_v11 = vld [vmem:[%s880_s1 + $0x70] sm:$0xff]   ;;  %s181_s20 = scalar_lea.vmem %s879_s0, %s640_s11  ;;  %s188_s27 = scalar_lea.vmem %s882_s3, %s586_s24 }
   0xf   : > { %344 = vmatprep.subr.bf16.mxu0 %v716_v1  ;;  %459 = vmatprep.subr.bf16.mxu1 %v716_v1  ;;  %v673_v8 = vld [vmem:[%s880_s1 + $0x20] sm:$0xff]   ;;  %v675_v10 = vld [vmem:[%s880_s1 + $0x18] sm:$0xff]   ;;  %v677_v12 = vld [vmem:[%s880_s1 + $0x10] sm:$0xff]  }
  0x10   : > { %v678_v13 = vld [vmem:[%s880_s1 + $0x68] sm:$0xff]   ;;  %v220_v15 = vld [vmem:[%s181_s20] sm:$0x66]  ;;  %v682_v25 = vld [vmem:[%s880_s1 + $0xb8] sm:$0xff]  }
  0x11   : > { %v679_v14 = vld [vmem:[%s880_s1 + $0x8] sm:$0xff]   ;;  %v190_v16 = vld [vmem:[%s181_s20] sm:$0x33]  ;;  %v222_v17 = vcombine.high %v220_v15, %v220_v15  ;;  %v683_v26 = vld [vmem:[%s880_s1 + $0x58] sm:$0xff]   ;;  %v224_v29 = vpack.c.bf16 %v220_v15, %v220_v15 }
  0x12   : > { %345 = vmatpush1.bf16.msra.mxu0 %v668_v3  ;;  %460 = vmatpush1.bf16.msra.mxu1 %v669_v4  ;;  %v192_v18 = vcombine.high %v190_v16, %v190_v16  ;;  %v680_v19 = vld [vmem:[%s880_s1 + $0x60] sm:$0xff]   ;;  %v684_v30 = vld [vmem:[%s880_s1 + $0xb0] sm:$0xff]   ;;  %v686_v33 = vld [vmem:[%s880_s1 + $0xa8] sm:$0xff]   ;;  %v194_v40 = vpack.c.bf16 %v190_v16, %v190_v16 }
  0x13   : > { %346 = vmatprep.subr.bf16.mxu0 %v716_v1  ;;  %461 = vmatprep.subr.bf16.mxu1 %v716_v1  ;;  %v681_v20 = vld [vmem:[%s880_s1] sm:$0xff]   ;;  %v225_v21 = vpack.c.bf16 %v222_v17, %v222_v17  ;;  %v685_v31 = vld [vmem:[%s880_s1 + $0x50] sm:$0xff]   ;;  %v254_v32 = vshll.u32 %v224_v29, 16  ;;  %v687_v34 = vld [vmem:[%s880_s1 + $0x48] sm:$0xff]   ;;  %v252_v35 = vshrl.u32 %v224_v29, 16 }
  0x14   : > { %v195_v22 = vpack.c.bf16 %v192_v18, %v192_v18  ;;  %v688_v37 = vld [vmem:[%s880_s1 + $0xa0] sm:$0xff]  }
  0x15   : > { %v259_v23 = vshrl.u32 %v225_v21, 16  ;;  %v261_v24 = vshll.u32 %v225_v21, 16  ;;  %v256_v36 = vrot.slane %v254_v32, 1  ;;  %v689_v38 = vld [vmem:[%s880_s1 + $0x40] sm:$0xff]  }
  0x16   : > { %347 = vmatpush1.bf16.msra.mxu0 %v670_v5  ;;  %462 = vmatpush1.bf16.msra.mxu1 %v671_v6  ;;  %v637_v43 = vld [vmem:[%s881_s2] ss:$0 sm:$0xff] }
  0x17   : > { %348 = vmatprep.subr.bf16.mxu0 %v716_v1  ;;  %463 = vmatprep.subr.bf16.mxu1 %v716_v1  ;;  %v263_v27 = vrot.slane %v261_v24, 1  ;;  %v257_v39 = vor.u32 %v256_v36, %v252_v35 }
  0x18   : > { %636 = vmatprep.mubr.msk.bf16.mxu1 %vm338_vm0, %v195_v22 }
  0x19   : > { %v264_v28 = vor.u32 %v263_v27, %v259_v23 }
  0x1a   : > { %349 = vmatpush1.bf16.msra.mxu0 %v672_v7  ;;  %464 = vmatpush1.bf16.msra.mxu1 %v673_v8 }
  0x1b   : > { %350 = vmatprep.subr.bf16.mxu0 %v716_v1  ;;  %465 = vmatprep.subr.bf16.mxu1 %v716_v1 }
  0x1c   : > { %623 = vmatprep.mubr.msk.bf16.mxu0 %vm338_vm0, %v264_v28 }
  0x1e   : > { %351 = vmatpush1.bf16.msra.mxu0 %v674_v9  ;;  %466 = vmatpush1.bf16.msra.mxu1 %v675_v10 }
  0x1f   : > { %352 = vmatprep.subr.bf16.mxu0 %v716_v1  ;;  %467 = vmatprep.subr.bf16.mxu1 %v716_v1 }
  0x22   : > { %353 = vmatpush1.bf16.msra.mxu0 %v676_v11  ;;  %468 = vmatpush1.bf16.msra.mxu1 %v677_v12 }
  0x23   : > { %354 = vmatprep.subr.bf16.mxu0 %v716_v1  ;;  %469 = vmatprep.subr.bf16.mxu1 %v716_v1 }
  0x26   : > { %355 = vmatpush1.bf16.msra.mxu0 %v678_v13  ;;  %470 = vmatpush1.bf16.msra.mxu1 %v679_v14 }
  0x27   : > { %356 = vmatprep.subr.bf16.mxu0 %v716_v1  ;;  %471 = vmatprep.subr.bf16.mxu1 %v716_v1 }
  0x2a   : > { %357 = vmatpush1.bf16.msra.mxu0 %v680_v19  ;;  %472 = vmatpush1.bf16.msra.mxu1 %v681_v20 }
  0x2b   : > { %366 = vmatprep.subr.bf16.mxu0 %v716_v1  ;;  %481 = vmatprep.subr.bf16.mxu1 %v716_v1 }
  0x2e   : > { %367 = vmatpush2.bf16.msra.mxu0 %v682_v25  ;;  %482 = vmatpush2.bf16.msra.mxu1 %v683_v26 }
  0x2f   : > { %368 = vmatprep.subr.bf16.mxu0 %v716_v1  ;;  %483 = vmatprep.subr.bf16.mxu1 %v716_v1 }
  0x32   : > { %369 = vmatpush2.bf16.msra.mxu0 %v684_v30  ;;  %484 = vmatpush2.bf16.msra.mxu1 %v685_v31 }
  0x33   : > { %370 = vmatprep.subr.bf16.mxu0 %v716_v1  ;;  %485 = vmatprep.subr.bf16.mxu1 %v716_v1 }
  0x36   : > { %371 = vmatpush2.bf16.msra.mxu0 %v686_v33  ;;  %486 = vmatpush2.bf16.msra.mxu1 %v687_v34 }
  0x37   : > { %372 = vmatprep.subr.bf16.mxu0 %v716_v1  ;;  %487 = vmatprep.subr.bf16.mxu1 %v716_v1 }
  0x3a   : > { %373 = vmatpush2.bf16.msra.mxu0 %v688_v37  ;;  %488 = vmatpush2.bf16.msra.mxu1 %v689_v38 }
  0x3d   : > { %375 = vmatmul.mubr.bf16.vlgmr.msra.gmra.mxu0 %v257_v39  ;;  %490 = vmatmul.mubr.bf16.vlgmr.msra.gmra.mxu1 %v194_v40 }
  0xfd   : > { %v376_v41 = vpop.f32.mrf.mxu0  ;;  %v491_v42 = vpop.f32.mrf.mxu1 }
  0xfe   : > { %v492_v44 = vadd.f32 %v491_v42, %v376_v41 }
  0xff   : > { %v378_v45 = vpop.f32.mrf.mxu0  ;;  %v493_v46 = vpop.f32.mrf.mxu1 }
 0x100   : > { %v504_v47 = vadd.f32 %v637_v43, %v492_v44 }
 0x101   : > { %v379_v48 = vpop.f32.mrf.mxu0  ;;  %v494_v49 = vpop.f32.mrf.mxu1 }
 0x102   : > { %v505_v50 = vmax.f32 %v504_v47, 0.0 }
 0x103   : > { %v380_v51 = vpop.f32.mrf.mxu0  ;;  %v495_v52 = vpop.f32.mrf.mxu1 }
 0x104   : > { %507 = vst.msk [vmem:[%s188_s27] sm:$0x3] %vm506_vm1, %v505_v50 }
 0x105 PF: > { %s13_s14 = sadd.s32 1, %s714_s14   ;;  %s883_s12 = smov %s710_s13 }
 0x106   : > { %p10_p5 = scmp.ge.s32.totalorder %s13_s14, 6   ;;  %s884_s13 = smov %s886_s15 }
 0x108   :  { %12 = sbr.rel (!%p10_p5) target bundleno = 2 (0x2), region = 63 }

// kernel: encoder_forward.20
= control target key start
LH: loop header
LB: loop body
LE: loop exit
PB: predicated region body
PF: predicated region fallthrough
CT: control target
= control target key end

     0   :  { %s500_s12 = smov 0   ;;  %s502_s13 = smov 0   ;;  %s560_s0 = inlined_call_operand.vmem [shape: f32[4,2,128], index: 0, kind: input, shape index: {}]   ;;  %s561_s1 = inlined_call_operand.vmem [shape: bf16[1,128,64], index: 1, kind: input, shape index: {}]   ;;  %s562_s2 = inlined_call_operand.vmem [shape: f32[1,64], index: 2, kind: input, shape index: {}]   ;;  %s563_s3 = inlined_call_operand.vmem [shape: f32[4,2,64], index: 3, kind: output, shape index: {}]  }
   0x1   :  { %s504_s14 = smov 0  }
   0x2 LB: > { %s25_s15 = sadd.s32 1, %s472_s13  ;;  %p377_p0 = scmp.ge.s32.totalorder %s476_s14, 1  ;;  %s476_s14 = sphi %s504_s14, %s13_s14   ;;  %s472_s13 = sphi %s502_s13, %s565_s13   ;;  %s468_s12 = sphi %s500_s12, %s564_s12  }
   0x3   : > { %p27_p1 = scmp.ge.s32.totalorder %s25_s15, 4  ;;  %p150_p2 = scmp.lt.s32.totalorder %s476_s14, 5 }
   0x5   : > { %s567_s15 = smov (%p27_p1, %s25_s15), 0  ;;  %p151_p3 = pnand %p377_p0, %p150_p2 }
   0x6   : > { %p175_p4 = scmp.lt.s32.totalorder (!%p151_p3), %s468_s12, 3 }
   0x7   : > { %154 = sbr.rel (%p151_p3) target bundleno = 244 (0xf4), region = 32 }
   0xc   : > { %v446_v0 = vld [vmem:[%s561_s1 + $0x38] sm:$0xff]   ;;  %v478_v1 = vmov 0.0   ;;  %v447_v2 = vld [vmem:[%s561_s1 + $0x30] sm:$0xff]   ;;  %vm479_vm0 = vmmov 0   ;;  %v448_v3 = vld [vmem:[%s561_s1 + $0x28] sm:$0xff]   ;;  %s569_s12 = smov (!%p175_p4, %s468_s12), 3 }
   0xd   : > { %400 = vmatprep.subr.bf16.mxu0 %v478_v1  ;;  %416 = vmatprep.mubr.msk.bf16.mxu0 %vm479_vm0, %v478_v1  ;;  %v449_v4 = vld [vmem:[%s561_s1 + $0x20] sm:$0xff]   ;;  %v450_v5 = vld [vmem:[%s561_s1 + $0x18] sm:$0xff]   ;;  %v451_v6 = vld [vmem:[%s561_s1 + $0x10] sm:$0xff]   ;;  %s378_s28 = sshll.u32 %s569_s12, 1  ;;  %vm300_vm1 = vcmask 517120  }
   0xe   : > { %401 = vmatpush3.bf16.msra.mxu0 %v446_v0  ;;  %v452_v7 = vld [vmem:[%s561_s1 + $0x8] sm:$0xff]   ;;  %s178_s6 = scalar_lea.vmem %s560_s0, %s378_s28  ;;  %v453_v8 = vld [vmem:[%s561_s1] sm:$0xff]   ;;  %s185_s16 = scalar_lea.vmem %s563_s3, %s378_s28 }
   0xf   : > { %402 = vmatprep.subr.bf16.mxu0 %v478_v1  ;;  %v187_v9 = vld [vmem:[%s178_s6] sm:$0x3] }
  0x10   : > { %v188_v10 = vpack.c.bf16 %v187_v9, %v187_v9  ;;  %v380_v11 = vld [vmem:[%s562_s2] ss:$0 sm:$0xff] }
  0x12   : > { %403 = vmatpush3.bf16.msra.mxu0 %v447_v2 }
  0x13   : > { %404 = vmatprep.subr.bf16.mxu0 %v478_v1 }
  0x16   : > { %405 = vmatpush3.bf16.msra.mxu0 %v448_v3 }
  0x17   : > { %406 = vmatprep.subr.bf16.mxu0 %v478_v1 }
  0x1a   : > { %407 = vmatpush3.bf16.msra.mxu0 %v449_v4 }
  0x1b   : > { %408 = vmatprep.subr.bf16.mxu0 %v478_v1 }
  0x1e   : > { %409 = vmatpush3.bf16.msra.mxu0 %v450_v5 }
  0x1f   : > { %410 = vmatprep.subr.bf16.mxu0 %v478_v1 }
  0x22   : > { %411 = vmatpush3.bf16.msra.mxu0 %v451_v6 }
  0x23   : > { %412 = vmatprep.subr.bf16.mxu0 %v478_v1 }
  0x26   : > { %413 = vmatpush3.bf16.msra.mxu0 %v452_v7 }
  0x27   : > { %414 = vmatprep.subr.bf16.mxu0 %v478_v1 }
  0x2a   : > { %415 = vmatpush3.bf16.msra.mxu0 %v453_v8 }
  0x2d   : > { %417 = vmatmul.mubr.bf16.vlgmr.msra.gmra.mxu0 %v188_v10 }
  0xed   : > { %v294_v12 = vpop.f32.mrf.mxu0 }
  0xee   : > { %v295_v13 = vadd.f32 %v380_v11, %v294_v12 }
  0xef   : > { %v418_v14 = vpop.f32.mrf.mxu0 }
  0xf0   : > { %301 = vst.msk [vmem:[%s185_s16] sm:$0x3] %vm300_vm1, %v295_v13 }
  0xf1   : > { %v297_v15 = vpop.f32.mrf.mxu0 }
  0xf3   : > { %v419_v16 = vpop.f32.mrf.mxu0 }
  0xf4 PF: > { %s13_s14 = sadd.s32 1, %s476_s14   ;;  %s564_s12 = smov %s472_s13 }
  0xf5   : > { %p10_p5 = scmp.ge.s32.totalorder %s13_s14, 6   ;;  %s565_s13 = smov %s567_s15 }
  0xf7   :  { %12 = sbr.rel (!%p10_p5) target bundleno = 2 (0x2), region = 62 }

// kernel: encoder_forward.22
= control target key start
LH: loop header
LB: loop body
LE: loop exit
PB: predicated region body
PF: predicated region fallthrough
CT: control target
= control target key end

     0   :  { %s917_s15 = smov 0   ;;  %s919_s16 = smov 0   ;;  %s1071_s0 = inlined_call_operand.vmem [shape: f32[4,4,128], index: 0, kind: input, shape index: {}]   ;;  %s1072_s1 = inlined_call_operand.vmem [shape: bf16[3,128,64], index: 1, kind: input, shape index: {}]   ;;  %s1073_s2 = inlined_call_operand.vmem [shape: f32[1,64], index: 2, kind: input, shape index: {}]   ;;  %s1074_s3 = inlined_call_operand.vmem [shape: f32[4,2,64], index: 3, kind: input, shape index: {}]   ;;  %s1075_s4 = inlined_call_operand.vmem [shape: f32[4,2,64], index: 4, kind: output, shape index: {}]  }
   0x1   :  { %s921_s17 = smov 0  }
   0x2 LB: > { %s26_s18 = sadd.s32 1, %s884_s16  ;;  %p666_p0 = scmp.ge.s32.totalorder %s888_s17, 1  ;;  %s888_s17 = sphi %s921_s17, %s14_s17   ;;  %s884_s16 = sphi %s919_s16, %s1077_s16   ;;  %s880_s15 = sphi %s917_s15, %s1076_s15  }
   0x3   : > { %p28_p1 = scmp.ge.s32.totalorder %s26_s18, 4  ;;  %p189_p2 = scmp.lt.s32.totalorder %s888_s17, 5 }
   0x5   : > { %s1079_s18 = smov (%p28_p1, %s26_s18), 0  ;;  %p190_p3 = pnand %p666_p0, %p189_p2 }
   0x6   : > { %p223_p4 = scmp.lt.s32.totalorder (!%p190_p3), %s880_s15, 3 }
   0x7   : > { %193 = sbr.rel (%p190_p3) target bundleno = 279 (0x117), region = 36 }
   0xc   : > { %v842_v0 = vld [vmem:[%s1072_s1 + $0x78] sm:$0xff]   ;;  %v890_v1 = vmov 0.0   ;;  %v844_v3 = vld [vmem:[%s1072_s1 + $0x70] sm:$0xff]   ;;  %vm891_vm0 = vmmov 0   ;;  %v846_v5 = vld [vmem:[%s1072_s1 + $0x68] sm:$0xff]   ;;  %s1081_s15 = smov (!%p223_p4, %s880_s15), 3 }
   0xd   : > { %756 = vmatprep.subr.bf16.mxu0 %v890_v1  ;;  %776 = vmatprep.subr.bf16.mxu1 %v890_v1  ;;  %v843_v2 = vld [vmem:[%s1072_s1 + $0x38] sm:$0xff]   ;;  %v845_v4 = vld [vmem:[%s1072_s1 + $0x30] sm:$0xff]   ;;  %v847_v6 = vld [vmem:[%s1072_s1 + $0x28] sm:$0xff]   ;;  %s667_s21 = sshll.u32 %s1081_s15, 2  ;;  %s668_s27 = sshll.u32 %s1081_s15, 1  ;;  %vm574_vm1 = vcmask 517120  }
   0xe   : > { %757 = vmatpush3.bf16.msra.mxu0 %v842_v0  ;;  %772 = vmatprep.mubr.msk.bf16.mxu0 %vm891_vm0, %v890_v1  ;;  %v848_v7 = vld [vmem:[%s1072_s1 + $0x60] sm:$0xff]   ;;  %v850_v9 = vld [vmem:[%s1072_s1 + $0x58] sm:$0xff]   ;;  %v852_v11 = vld [vmem:[%s1072_s1 + $0x50] sm:$0xff]   ;;  %s1004_s28 = scalar_lea.vmem %s1071_s0, %s667_s21  ;;  %s233_s5 = scalar_lea.vmem %s1074_s3, %s668_s27 }
   0xf   : > { %777 = vmatpush3.bf16.msra.mxu1 %v843_v2  ;;  %758 = vmatprep.subr.bf16.mxu0 %v890_v1  ;;  %v849_v8 = vld [vmem:[%s1072_s1 + $0x20] sm:$0xff]   ;;  %v851_v10 = vld [vmem:[%s1072_s1 + $0x18] sm:$0xff]   ;;  %v853_v12 = vld [vmem:[%s1072_s1 + $0x10] sm:$0xff]   ;;  %s240_s15 = scalar_lea.vmem %s1075_s4, %s668_s27 }
  0x10   : > { %778 = vmatprep.subr.bf16.mxu1 %v890_v1  ;;  %792 = vmatprep.mubr.msk.bf16.mxu1 %vm891_vm0, %v890_v1  ;;  %v854_v13 = vld [vmem:[%s1072_s1 + $0x48] sm:$0xff]   ;;  %v856_v15 = vld [vmem:[%s1072_s1 + $0x40] sm:$0xff]   ;;  %v858_v21 = vld [vmem:[%s1072_s1 + $0xb8] sm:$0xff]  }
  0x11   : > { %v855_v14 = vld [vmem:[%s1072_s1 + $0x8] sm:$0xff]   ;;  %v260_v16 = vld [vmem:[%s1004_s28 + $0x1] sm:$0x3]  ;;  %v859_v22 = vld [vmem:[%s1072_s1 + $0xb0] sm:$0xff]  }
  0x12   : > { %759 = vmatpush3.bf16.msra.mxu0 %v844_v3  ;;  %v857_v17 = vld [vmem:[%s1072_s1] sm:$0xff]   ;;  %v261_v19 = vpack.c.bf16 %v260_v16, %v260_v16  ;;  %v860_v23 = vld [vmem:[%s1072_s1 + $0xa8] sm:$0xff]   ;;  %v862_v25 = vld [vmem:[%s1072_s1 + $0x98] sm:$0xff]  }
  0x13   : > { %779 = vmatpush3.bf16.msra.mxu1 %v845_v4  ;;  %760 = vmatprep.subr.bf16.mxu0 %v890_v1  ;;  %v242_v18 = vld [vmem:[%s1004_s28] sm:$0x3]  ;;  %v863_v26 = vld [vmem:[%s1072_s1 + $0x90] sm:$0xff]   ;;  %v864_v27 = vld [vmem:[%s1072_s1 + $0x88] sm:$0xff]  }
  0x14   : > { %780 = vmatprep.subr.bf16.mxu1 %v890_v1  ;;  %v243_v20 = vpack.c.bf16 %v242_v18, %v242_v18  ;;  %v861_v24 = vld [vmem:[%s1072_s1 + $0xa0] sm:$0xff]  }
  0x15   : > { %v865_v28 = vld [vmem:[%s1072_s1 + $0x80] sm:$0xff]  }
  0x16   : > { %761 = vmatpush3.bf16.msra.mxu0 %v846_v5  ;;  %v455_v29 = vld [vmem:[%s1004_s28 + $0x2] sm:$0x3]  ;;  %v726_v41 = vld [vmem:[%s1073_s2] ss:$0 sm:$0xff] }
  0x17   : > { %781 = vmatpush3.bf16.msra.mxu1 %v847_v6  ;;  %762 = vmatprep.subr.bf16.mxu0 %v890_v1  ;;  %v456_v30 = vpack.c.bf16 %v455_v29, %v455_v29  ;;  %v571_v43 = vld [vmem:[%s233_s5] sm:$0x3] }
  0x18   : > { %782 = vmatprep.subr.bf16.mxu1 %v890_v1 }
  0x1a   : > { %763 = vmatpush3.bf16.msra.mxu0 %v848_v7 }
  0x1b   : > { %783 = vmatpush3.bf16.msra.mxu1 %v849_v8  ;;  %764 = vmatprep.subr.bf16.mxu0 %v890_v1 }
  0x1c   : > { %784 = vmatprep.subr.bf16.mxu1 %v890_v1 }
  0x1e   : > { %765 = vmatpush3.bf16.msra.mxu0 %v850_v9 }
  0x1f   : > { %785 = vmatpush3.bf16.msra.mxu1 %v851_v10  ;;  %766 = vmatprep.subr.bf16.mxu0 %v890_v1 }
  0x20   : > { %786 = vmatprep.subr.bf16.mxu1 %v890_v1 }
  0x22   : > { %767 = vmatpush3.bf16.msra.mxu0 %v852_v11 }
  0x23   : > { %787 = vmatpush3.bf16.msra.mxu1 %v853_v12  ;;  %768 = vmatprep.subr.bf16.mxu0 %v890_v1 }
  0x24   : > { %788 = vmatprep.subr.bf16.mxu1 %v890_v1 }
  0x26   : > { %769 = vmatpush3.bf16.msra.mxu0 %v854_v13 }
  0x27   : > { %789 = vmatpush3.bf16.msra.mxu1 %v855_v14  ;;  %770 = vmatprep.subr.bf16.mxu0 %v890_v1 }
  0x28   : > { %790 = vmatprep.subr.bf16.mxu1 %v890_v1 }
  0x2a   : > { %771 = vmatpush3.bf16.msra.mxu0 %v856_v15 }
  0x2b   : > { %791 = vmatpush3.bf16.msra.mxu1 %v857_v17  ;;  %796 = vmatprep.subr.bf16.mxu0 %v890_v1 }
  0x2d   : > { %773 = vmatmul.mubr.bf16.vlgmr.msra.gmra.mxu0 %v261_v19 }
  0x2e   : > { %793 = vmatmul.mubr.bf16.vlgmr.msra.gmra.mxu1 %v243_v20  ;;  %797 = vmatpush3.bf16.msra.mxu0 %v858_v21 }
  0x2f   : > { %798 = vmatprep.subr.bf16.mxu0 %v890_v1  ;;  %812 = vmatprep.mubr.msk.bf16.mxu0 %vm891_vm0, %v890_v1 }
  0x32   : > { %799 = vmatpush3.bf16.msra.mxu0 %v859_v22 }
  0x33   : > { %800 = vmatprep.subr.bf16.mxu0 %v890_v1 }
  0x36   : > { %801 = vmatpush3.bf16.msra.mxu0 %v860_v23 }
  0x37   : > { %802 = vmatprep.subr.bf16.mxu0 %v890_v1 }
  0x3a   : > { %803 = vmatpush3.bf16.msra.mxu0 %v861_v24 }
  0x3b   : > { %804 = vmatprep.subr.bf16.mxu0 %v890_v1 }
  0x3e   : > { %805 = vmatpush3.bf16.msra.mxu0 %v862_v25 }
  0x3f   : > { %806 = vmatprep.subr.bf16.mxu0 %v890_v1 }
  0x42   : > { %807 = vmatpush3.bf16.msra.mxu0 %v863_v26 }
  0x43   : > { %808 = vmatprep.subr.bf16.mxu0 %v890_v1 }
  0x46   : > { %809 = vmatpush3.bf16.msra.mxu0 %v864_v27 }
  0x47   : > { %810 = vmatprep.subr.bf16.mxu0 %v890_v1 }
  0x4a   : > { %811 = vmatpush3.bf16.msra.mxu0 %v865_v28 }
  0x4d   : > { %813 = vmatmul.mubr.bf16.vlgmr.msra.gmra.mxu0 %v456_v30 }
  0xed   : > { %v361_v31 = vpop.f32.mrf.mxu0 }
  0xee   : > { %v449_v32 = vpop.f32.mrf.mxu1 }
  0xef   : > { %v774_v33 = vpop.f32.mrf.mxu0  ;;  %v450_v39 = vadd.f32 %v449_v32, %v361_v31 }
  0xf0   : > { %v794_v34 = vpop.f32.mrf.mxu1 }
  0xf1   : > { %v364_v35 = vpop.f32.mrf.mxu0 }
  0xf2   : > { %v452_v36 = vpop.f32.mrf.mxu1 }
  0xf3   : > { %v775_v37 = vpop.f32.mrf.mxu0 }
  0xf4   : > { %v795_v38 = vpop.f32.mrf.mxu1 }
 0x10d   : > { %v556_v40 = vpop.f32.mrf.mxu0 }
 0x10e   : > { %v562_v42 = vadd.f32 %v556_v40, %v450_v39 }
 0x10f   : > { %v814_v44 = vpop.f32.mrf.mxu0 }
 0x110   : > { %v570_v45 = vadd.f32 %v726_v41, %v562_v42 }
 0x111   : > { %v559_v46 = vpop.f32.mrf.mxu0 }
 0x112   : > { %v572_v47 = vadd.f32 %v571_v43, %v570_v45 }
 0x113   : > { %v815_v48 = vpop.f32.mrf.mxu0 }
 0x114   : > { %v573_v49 = vmax.f32 %v572_v47, 0.0 }
 0x116   : > { %575 = vst.msk [vmem:[%s240_s15] sm:$0x3] %vm574_vm1, %v573_v49 }
 0x117 PF: > { %s14_s17 = sadd.s32 1, %s888_s17   ;;  %s1076_s15 = smov %s884_s16 }
 0x118   : > { %p11_p5 = scmp.ge.s32.totalorder %s14_s17, 6   ;;  %s1077_s16 = smov %s1079_s18 }
 0x11a   :  { %13 = sbr.rel (!%p11_p5) target bundleno = 2 (0x2), region = 71 }

// kernel: encoder_forward.24
= control target key start
LH: loop header
LB: loop body
LE: loop exit
PB: predicated region body
PF: predicated region fallthrough
CT: control target
= control target key end

     0   :  { %s843_s12 = smov 0   ;;  %s845_s13 = smov 0   ;;  %s983_s0 = inlined_call_operand.vmem [shape: f32[4,2,256], index: 0, kind: input, shape index: {}]   ;;  %s984_s1 = inlined_call_operand.vmem [shape: bf16[2,256,64], index: 1, kind: input, shape index: {}]   ;;  %s985_s2 = inlined_call_operand.vmem [shape: f32[1,64], index: 2, kind: input, shape index: {}]   ;;  %s986_s3 = inlined_call_operand.vmem [shape: f32[4,1,64], index: 3, kind: output, shape index: {}]  }
   0x1   :  { %s847_s14 = smov 0  }
   0x2 LB: > { %s25_s15 = sadd.s32 1, %s817_s13  ;;  %p628_p0 = scmp.ge.s32.totalorder %s821_s14, 1  ;;  %s821_s14 = sphi %s847_s14, %s13_s14   ;;  %s817_s13 = sphi %s845_s13, %s988_s13   ;;  %s813_s12 = sphi %s843_s12, %s987_s12  }
   0x3   : > { %p27_p1 = scmp.ge.s32.totalorder %s25_s15, 4  ;;  %p151_p2 = scmp.lt.s32.totalorder %s821_s14, 5 }
   0x5   : > { %s990_s15 = smov (%p27_p1, %s25_s15), 0  ;;  %p152_p3 = pnand %p628_p0, %p151_p2 }
   0x6   : > { %p176_p4 = scmp.lt.s32.totalorder (!%p152_p3), %s813_s12, 3 }
   0x7   : > { %155 = sbr.rel (%p152_p3) target bundleno = 251 (0xfb), region = 32 }
   0xc   : > { %v767_v0 = vld [vmem:[%s984_s1 + $0xf8] sm:$0xff]   ;;  %v771_v4 = vld [vmem:[%s984_s1 + $0xf0] sm:$0xff]   ;;  %v775_v8 = vld [vmem:[%s984_s1 + $0xe8] sm:$0xff]   ;;  %v190_v21 = vlaneseq  ;;  %s992_s12 = smov (!%p176_p4, %s813_s12), 3  ;;  %vm557_vm0 = vcmask 516096  }
   0xd   : > { %v768_v1 = vld [vmem:[%s984_s1 + $0x78] sm:$0xff]   ;;  %699 = vmatprep.subr.bf16.mxu0 %v767_v0  ;;  %v772_v5 = vld [vmem:[%s984_s1 + $0x70] sm:$0xff]   ;;  %v776_v9 = vld [vmem:[%s984_s1 + $0x68] sm:$0xff]   ;;  %s698_s24 = sshll.u32 %s992_s12, 2  ;;  %s186_s19 = scalar_lea.vmem %s986_s3, %s992_s12 }
   0xe   : > { %v769_v2 = vld [vmem:[%s984_s1 + $0xb8] sm:$0xff]   ;;  %721 = vmatprep.subr.bf16.mxu1 %v768_v1  ;;  %v773_v6 = vld [vmem:[%s984_s1 + $0xb0] sm:$0xff]   ;;  %v777_v10 = vld [vmem:[%s984_s1 + $0xa8] sm:$0xff]   ;;  %v191_v26 = vshrl.u32 %v190_v21, 7  ;;  %s180_s6 = scalar_lea.vmem %s983_s0, %s698_s24 }
   0xf   : > { %v770_v3 = vld [vmem:[%s984_s1 + $0x38] sm:$0xff]   ;;  %700 = vmatpush3.bf16.msra.mxu0 %v769_v2  ;;  %v774_v7 = vld [vmem:[%s984_s1 + $0x30] sm:$0xff]   ;;  %v778_v11 = vld [vmem:[%s984_s1 + $0x28] sm:$0xff]  }
  0x10   : > { %722 = vmatpush3.bf16.msra.mxu1 %v770_v3  ;;  %701 = vmatprep.subr.bf16.mxu0 %v771_v4  ;;  %v779_v12 = vld [vmem:[%s984_s1 + $0xe0] sm:$0xff]   ;;  %v783_v16 = vld [vmem:[%s984_s1 + $0xd8] sm:$0xff]   ;;  %v787_v20 = vld [vmem:[%s984_s1 + $0xd0] sm:$0xff]   ;;  %v192_v31 = vsub.s32 0, %v191_v26  ;;  %v196_v33 = vsub.s32 1, %v191_v26 }
  0x11   : > { %723 = vmatprep.subr.bf16.mxu1 %v772_v5  ;;  %v780_v13 = vld [vmem:[%s984_s1 + $0x60] sm:$0xff]   ;;  %v784_v17 = vld [vmem:[%s984_s1 + $0x58] sm:$0xff]   ;;  %v788_v22 = vld [vmem:[%s984_s1 + $0x50] sm:$0xff]  }
  0x12   : > { %v781_v14 = vld [vmem:[%s984_s1 + $0xa0] sm:$0xff]   ;;  %v785_v18 = vld [vmem:[%s984_s1 + $0x98] sm:$0xff]   ;;  %v789_v23 = vld [vmem:[%s984_s1 + $0x90] sm:$0xff]  }
  0x13   : > { %702 = vmatpush3.bf16.msra.mxu0 %v773_v6  ;;  %v782_v15 = vld [vmem:[%s984_s1 + $0x20] sm:$0xff]   ;;  %v786_v19 = vld [vmem:[%s984_s1 + $0x18] sm:$0xff]   ;;  %v790_v24 = vld [vmem:[%s984_s1 + $0x10] sm:$0xff]  }
  0x14   : > { %724 = vmatpush3.bf16.msra.mxu1 %v774_v7  ;;  %703 = vmatprep.subr.bf16.mxu0 %v775_v8  ;;  %v791_v25 = vld [vmem:[%s984_s1 + $0xc8] sm:$0xff]   ;;  %v795_v30 = vld [vmem:[%s984_s1 + $0xc0] sm:$0xff]  }
  0x15   : > { %725 = vmatprep.subr.bf16.mxu1 %v776_v9  ;;  %v792_v27 = vld [vmem:[%s984_s1 + $0x48] sm:$0xff]   ;;  %v796_v32 = vld [vmem:[%s984_s1 + $0x40] sm:$0xff]  }
  0x16   : > { %v793_v28 = vld [vmem:[%s984_s1 + $0x88] sm:$0xff]   ;;  %v797_v34 = vld [vmem:[%s984_s1 + $0x80] sm:$0xff]  }
  0x17   : > { %704 = vmatpush3.bf16.msra.mxu0 %v777_v10  ;;  %v794_v29 = vld [vmem:[%s984_s1 + $0x8] sm:$0xff]   ;;  %v798_v35 = vld [vmem:[%s984_s1] sm:$0xff]  }
  0x18   : > { %726 = vmatpush3.bf16.msra.mxu1 %v778_v11  ;;  %705 = vmatprep.subr.bf16.mxu0 %v779_v12  ;;  %v631_v36 = vld [vmem:[%s180_s6 + $0x1] ss:$2 sm:$0x3]  ;;  %v188_v37 = vld [vmem:[%s180_s6] ss:$2 sm:$0x3] }
  0x19   : > { %727 = vmatprep.subr.bf16.mxu1 %v780_v13  ;;  %v240_v38 = vrot.slane %v631_v36, %v192_v31  ;;  %v244_v39 = vrot.slane %v631_v36, %v196_v33  ;;  %v193_v40 = vrot.slane %v188_v37, %v192_v31  ;;  %v197_v41 = vrot.slane %v188_v37, %v196_v33  ;;  %v554_v52 = vld [vmem:[%s985_s2] sm:$0x1] }
  0x1b   : > { %706 = vmatpush3.bf16.msra.mxu0 %v781_v14  ;;  %v247_v42 = vpack.c.bf16 %v240_v38, %v240_v38  ;;  %v248_v43 = vpack.c.bf16 %v244_v39, %v244_v39  ;;  %v200_v44 = vpack.c.bf16 %v193_v40, %v193_v40  ;;  %v201_v45 = vpack.c.bf16 %v197_v41, %v197_v41 }
  0x1c   : > { %728 = vmatpush3.bf16.msra.mxu1 %v782_v15  ;;  %707 = vmatprep.subr.bf16.mxu0 %v783_v16 }
  0x1d   : > { %729 = vmatprep.subr.bf16.mxu1 %v784_v17  ;;  %410 = vmatprep.mubr.bf16.mxu0 %v248_v43 }
  0x1e   : > { %546 = vmatprep.mubr.bf16.mxu1 %v201_v45 }
  0x1f   : > { %708 = vmatpush3.bf16.msra.mxu0 %v785_v18 }
  0x20   : > { %730 = vmatpush3.bf16.msra.mxu1 %v786_v19  ;;  %709 = vmatprep.subr.bf16.mxu0 %v787_v20 }
  0x21   : > { %731 = vmatprep.subr.bf16.mxu1 %v788_v22 }
  0x23   : > { %710 = vmatpush3.bf16.msra.mxu0 %v789_v23 }
  0x24   : > { %732 = vmatpush3.bf16.msra.mxu1 %v790_v24  ;;  %711 = vmatprep.subr.bf16.mxu0 %v791_v25 }
  0x25   : > { %733 = vmatprep.subr.bf16.mxu1 %v792_v27 }
  0x27   : > { %712 = vmatpush3.bf16.msra.mxu0 %v793_v28 }
  0x28   : > { %734 = vmatpush3.bf16.msra.mxu1 %v794_v29  ;;  %713 = vmatprep.subr.bf16.mxu0 %v795_v30 }
  0x29   : > { %735 = vmatprep.subr.bf16.mxu1 %v796_v32 }
  0x2b   : > { %714 = vmatpush3.bf16.msra.mxu0 %v797_v34 }
  0x2c   : > { %736 = vmatpush3.bf16.msra.mxu1 %v798_v35 }
  0x2e   : > { %411 = vmatmul.mubr.bf16.vlgmr.msra.gmra.mxu0 %v247_v42 }
  0x2f   : > { %547 = vmatmul.mubr.bf16.vlgmr.msra.gmra.mxu1 %v200_v44 }
  0xee   : > { %v715_v46 = vpop.f32.mrf.mxu0 }
  0xef   : > { %v737_v47 = vpop.f32.mrf.mxu1 }
  0xf0   : > { %v716_v48 = vpop.f32.mrf.mxu0 }
  0xf1   : > { %v738_v49 = vpop.f32.mrf.mxu1  ;;  %v717_v50 = vadd.f32 %v716_v48, %v715_v46 }
  0xf2   : > { %v739_v51 = vadd.f32 %v738_v49, %v737_v47  ;;  %v718_v53 = vpop.f32.mrf.mxu0 }
  0xf3   : > { %v740_v54 = vpop.f32.mrf.mxu1 }
  0xf4   : > { %v549_v55 = vadd.f32 %v739_v51, %v717_v50  ;;  %v719_v56 = vpop.f32.mrf.mxu0 }
  0xf5   : > { %v741_v57 = vpop.f32.mrf.mxu1 }
  0xf6   : > { %v555_v58 = vadd.f32 %v554_v52, %v549_v55 }
  0xf8   : > { %v556_v59 = vmax.f32 %v555_v58, 0.0 }
  0xfa   : > { %558 = vst.msk [vmem:[%s186_s19] sm:$0x1] %vm557_vm0, %v556_v59 }
  0xfb PF: > { %s13_s14 = sadd.s32 1, %s821_s14   ;;  %s987_s12 = smov %s817_s13 }
  0xfc   : > { %p10_p5 = scmp.ge.s32.totalorder %s13_s14, 6   ;;  %s988_s13 = smov %s990_s15 }
  0xfe   :  { %12 = sbr.rel (!%p10_p5) target bundleno = 2 (0x2), region = 64 }

// kernel: encoder_forward.23
= control target key start
LH: loop header
LB: loop body
LE: loop exit
PB: predicated region body
PF: predicated region fallthrough
CT: control target
= control target key end

     0   :  { %s477_s12 = smov 0   ;;  %s479_s13 = smov 0   ;;  %s541_s0 = inlined_call_operand.vmem [shape: f32[4,1,128], index: 0, kind: input, shape index: {}]   ;;  %s542_s1 = inlined_call_operand.vmem [shape: bf16[1,128,64], index: 1, kind: input, shape index: {}]   ;;  %s543_s2 = inlined_call_operand.vmem [shape: f32[1,64], index: 2, kind: input, shape index: {}]   ;;  %s544_s3 = inlined_call_operand.vmem [shape: f32[4,1,64], index: 3, kind: output, shape index: {}]  }
   0x1   :  { %s481_s14 = smov 0  }
   0x2 LB: > { %s25_s15 = sadd.s32 1, %s449_s13  ;;  %p357_p0 = scmp.ge.s32.totalorder %s453_s14, 1  ;;  %s453_s14 = sphi %s481_s14, %s13_s14   ;;  %s449_s13 = sphi %s479_s13, %s546_s13   ;;  %s445_s12 = sphi %s477_s12, %s545_s12  }
   0x3   : > { %p27_p1 = scmp.ge.s32.totalorder %s25_s15, 4  ;;  %p149_p2 = scmp.lt.s32.totalorder %s453_s14, 5 }
   0x5   : > { %s548_s15 = smov (%p27_p1, %s25_s15), 0  ;;  %p150_p3 = pnand %p357_p0, %p149_p2 }
   0x6   : > { %p172_p4 = scmp.lt.s32.totalorder (!%p150_p3), %s445_s12, 3 }
   0x7   : > { %153 = sbr.rel (%p150_p3) target bundleno = 244 (0xf4), region = 32 }
   0xc   : > { %v423_v0 = vld [vmem:[%s542_s1 + $0x38] sm:$0xff]   ;;  %v455_v1 = vmov 0.0   ;;  %v424_v2 = vld [vmem:[%s542_s1 + $0x30] sm:$0xff]   ;;  %vm456_vm0 = vmmov 0   ;;  %v425_v3 = vld [vmem:[%s542_s1 + $0x28] sm:$0xff]   ;;  %s550_s12 = smov (!%p172_p4, %s445_s12), 3 }
   0xd   : > { %377 = vmatprep.subr.bf16.mxu0 %v455_v1  ;;  %393 = vmatprep.mubr.msk.bf16.mxu0 %vm456_vm0, %v455_v1  ;;  %v426_v4 = vld [vmem:[%s542_s1 + $0x20] sm:$0xff]   ;;  %v427_v5 = vld [vmem:[%s542_s1 + $0x18] sm:$0xff]   ;;  %v428_v6 = vld [vmem:[%s542_s1 + $0x10] sm:$0xff]   ;;  %s174_s5 = scalar_lea.vmem %s541_s0, %s550_s12  ;;  %s180_s16 = scalar_lea.vmem %s544_s3, %s550_s12  ;;  %vm289_vm1 = vcmask 516096  }
   0xe   : > { %378 = vmatpush3.bf16.msra.mxu0 %v423_v0  ;;  %v429_v7 = vld [vmem:[%s542_s1 + $0x8] sm:$0xff]   ;;  %v430_v8 = vld [vmem:[%s542_s1] sm:$0xff]  }
   0xf   : > { %379 = vmatprep.subr.bf16.mxu0 %v455_v1  ;;  %v182_v9 = vld [vmem:[%s174_s5] sm:$0x1] }
  0x10   : > { %v183_v10 = vpack.c.bf16 %v182_v9, %v182_v9  ;;  %v200_v11 = vld [vmem:[%s543_s2] sm:$0x1] }
  0x12   : > { %380 = vmatpush3.bf16.msra.mxu0 %v424_v2 }
  0x13   : > { %381 = vmatprep.subr.bf16.mxu0 %v455_v1 }
  0x16   : > { %382 = vmatpush3.bf16.msra.mxu0 %v425_v3 }
  0x17   : > { %383 = vmatprep.subr.bf16.mxu0 %v455_v1 }
  0x1a   : > { %384 = vmatpush3.bf16.msra.mxu0 %v426_v4 }
  0x1b   : > { %385 = vmatprep.subr.bf16.mxu0 %v455_v1 }
  0x1e   : > { %386 = vmatpush3.bf16.msra.mxu0 %v427_v5 }
  0x1f   : > { %387 = vmatprep.subr.bf16.mxu0 %v455_v1 }
  0x22   : > { %388 = vmatpush3.bf16.msra.mxu0 %v428_v6 }
  0x23   : > { %389 = vmatprep.subr.bf16.mxu0 %v455_v1 }
  0x26   : > { %390 = vmatpush3.bf16.msra.mxu0 %v429_v7 }
  0x27   : > { %391 = vmatprep.subr.bf16.mxu0 %v455_v1 }
  0x2a   : > { %392 = vmatpush3.bf16.msra.mxu0 %v430_v8 }
  0x2d   : > { %394 = vmatmul.mubr.bf16.vlgmr.msra.gmra.mxu0 %v183_v10 }
  0xed   : > { %v283_v12 = vpop.f32.mrf.mxu0 }
  0xee   : > { %v284_v13 = vadd.f32 %v283_v12, %v200_v11 }
  0xef   : > { %v395_v14 = vpop.f32.mrf.mxu0 }
  0xf0   : > { %290 = vst.msk [vmem:[%s180_s16] sm:$0x1] %vm289_vm1, %v284_v13 }
  0xf1   : > { %v286_v15 = vpop.f32.mrf.mxu0 }
  0xf3   : > { %v396_v16 = vpop.f32.mrf.mxu0 }
  0xf4 PF: > { %s13_s14 = sadd.s32 1, %s453_s14   ;;  %s545_s12 = smov %s449_s13 }
  0xf5   : > { %p10_p5 = scmp.ge.s32.totalorder %s13_s14, 6   ;;  %s546_s13 = smov %s548_s15 }
  0xf7   :  { %12 = sbr.rel (!%p10_p5) target bundleno = 2 (0x2), region = 62 }

// kernel: encoder_forward.25
= control target key start
LH: loop header
LB: loop body
LE: loop exit
PB: predicated region body
PF: predicated region fallthrough
CT: control target
= control target key end

     0   :  { %9 = vsyncpa [#allocation3], 0  ;;  %s1355_s0 = inlined_call_operand.vmem [shape: f32[4,3,192], index: 0, kind: input, shape index: {}]   ;;  %s1356_s1 = inlined_call_operand.vmem [shape: bf16[3,192,64], index: 1, kind: input, shape index: {}]   ;;  %s1357_s2 = inlined_call_operand.vmem [shape: f32[1,64], index: 2, kind: input, shape index: {}]   ;;  %s1358_s3 = inlined_call_operand.vmem [shape: f32[4,1,64], index: 3, kind: input, shape index: {}]   ;;  %s1359_s4 = inlined_call_operand.hbm [shape: f32[4,1,64], index: 4, kind: output, shape index: {}]  }
   0x1   :  { %11 = vsyncpa [#allocation3 + $0x1], 0  ;;  %s1094_s15 = smov 0   ;;  %s1096_s16 = smov 0  }
   0x2   :  { %s1098_s17 = smov 0   ;;  %s1100_s18 = smov 0  }
   0x3   :  { %s1102_s19 = smov 0   ;;  %s1104_s20 = smov 0  }
   0x4 LB: > { %s797_s21 = sadd.s32 4294967295, %s1065_s20   ;;  %s798_s22 = sadd.s32 4294967294, %s1065_s20   ;;  %s1065_s20 = sphi %s1104_s20, %s17_s20   ;;  %s1061_s19 = sphi %s1102_s19, %s1366_s19   ;;  %s1057_s18 = sphi %s1100_s18, %s1365_s18   ;;  %s1053_s17 = sphi %s1098_s17, %s1364_s17   ;;  %s1049_s16 = sphi %s1096_s16, %s1363_s16   ;;  %s1045_s15 = sphi %s1094_s15, %s1362_s15  }
   0x5   : > { %s29_s23 = sadd.s32 1, %s1061_s19  ;;  %s134_s24 = sadd.s32 1, %s1053_s17 }
   0x6   : > { %p31_p0 = scmp.ge.s32.totalorder %s29_s23, 4  ;;  %p144_p1 = scmp.ne.s32.totalorder %s1053_s17, %s1049_s16 }
   0x7   : > { %p145_p2 = scmp.eq.s32.totalorder %s797_s21, 3  ;;  %p150_p3 = scmp.ne.s32.totalorder %s1049_s16, %s1045_s15 }
   0x8   : > { %s1368_s23 = smov (%p31_p0, %s29_s23), 0  ;;  %p151_p5 = scmp.eq.s32.totalorder %s798_s22, 3 }
   0x9   : > { %p1134_p4 = por %p145_p2, %p144_p1  ;;  %s129_s26 = ssub.s32 %s1061_s19, %s1368_s23 }
   0xa   : > { %p801_p6 = scmp.ge.s32.totalorder %s1065_s20, 1  ;;  %p132_p7 = scmp.eq.s32.totalorder %s129_s26, 0 }
   0xb   : > { %p1141_p8 = por %p151_p5, %p150_p3  ;;  %p192_p9 = scmp.lt.s32.totalorder %s1065_s20, 5 }
   0xc   : > { %s1147_s28 = scalar_select %p132_p7, %s1053_s17, %s134_s24  }
   0xd   : > { %p193_p10 = pnand %p801_p6, %p192_p9 }
   0xe   : > { %p223_p11 = scmp.lt.s32.totalorder (!%p193_p10), %s1057_s18, 3  ;;  %s221_s30 = sand.u32 (!%p193_p10), 1, %s1049_s16  }
   0xf   : > { %196 = sbr.rel (%p193_p10) target bundleno = 331 (0x14b), region = 36  ;;  %s222_s11 = scalar_lea.vmem (!%p193_p10), [#allocation2], %s221_s30 }
  0x10   : > { %s721_s12 = sshll.u32 (!%p193_p10), %s222_s11, 4  ;;  %s708_s22 = scalar_lea.sflag (!%p193_p10), [#allocation3], %s221_s30  ;;  %s722_s12 = int_to_ptr.vmem [resolvable:$true] %s721_s12 }
  0x11   : > { %s989_s24 = scalar_lea.vmem (!%p193_p10), %s722_s12, 16  ;;  %s1068_s26 = smov (!%p193_p10), [#allocation2]  }
  0x12   : > { %p990_p12 = scmp.ne.s32.totalorder (!%p193_p10), %s722_s12, %s989_s24 }
  0x14   : > { %v953_v0 = vld [vmem:[%s1356_s1 + $0x98] sm:$0xff]   ;;  %v1067_v1 = vmov 0   ;;  %v955_v3 = vld [vmem:[%s1356_s1 + $0x90] sm:$0xff]   ;;  %v957_v5 = vld [vmem:[%s1356_s1 + $0x88] sm:$0xff]   ;;  %v237_v9 = vlaneseq  ;;  %s1186_s5 = scalar_select %p223_p11, %s1057_s18, 3  ;;  %vm385_vm0 = vcmask 523264  }
  0x15   : > { %389 = vmatprep.subr.bf16.mxu0 %v1067_v1  ;;  %504 = vmatprep.subr.bf16.mxu1 %v1067_v1  ;;  %v954_v2 = vld [vmem:[%s1356_s1 + $0x38] sm:$0xff]   ;;  %v956_v4 = vld [vmem:[%s1356_s1 + $0x30] sm:$0xff]   ;;  %v958_v6 = vld [vmem:[%s1356_s1 + $0x28] sm:$0xff]   ;;  %vm705_vm1 = vcmask 516096   ;;  %p991_p13 = pnand %p990_p12, %p1134_p4 }
  0x16   : > { %390 = vmatpush1.bf16.msra.mxu0 %v953_v0  ;;  %505 = vmatpush1.bf16.msra.mxu1 %v954_v2  ;;  %v959_v7 = vld [vmem:[%s1356_s1 + $0x80] sm:$0xff]   ;;  %v961_v10 = vld [vmem:[%s1356_s1 + $0x78] sm:$0xff]   ;;  %v238_v12 = vshrl.u32 %v237_v9, 7  ;;  %v963_v13 = vld [vmem:[%s1356_s1 + $0x70] sm:$0xff]   ;;  %s896_s10 = sshll.u32 %s1186_s5, 3  ;;  %s233_s8 = scalar_lea.vmem %s1358_s3, %s1186_s5 }
  0x17   : > { %391 = vmatprep.subr.bf16.mxu0 %v1067_v1  ;;  %506 = vmatprep.subr.bf16.mxu1 %v1067_v1  ;;  %v960_v8 = vld [vmem:[%s1356_s1 + $0x20] sm:$0xff]   ;;  %v962_v11 = vld [vmem:[%s1356_s1 + $0x18] sm:$0xff]   ;;  %v964_v14 = vld [vmem:[%s1356_s1 + $0x10] sm:$0xff]   ;;  %s1205_s21 = scalar_lea.vmem %s1355_s0, %s896_s10  ;;  %p992_p0 = pneg %p991_p13 }
  0x18   : > { %v243_v15 = vsub.s32 1, %v238_v12  ;;  %v965_v16 = vld [vmem:[%s1356_s1 + $0x68] sm:$0xff]   ;;  %v804_v18 = vld [vmem:[%s1205_s21 + $0x1] ss:$4 sm:$0x3]  ;;  %v969_v26 = vld [vmem:[%s1356_s1 + $0xb8] sm:$0xff]  }
  0x19   : > { %v966_v17 = vld [vmem:[%s1356_s1 + $0x8] sm:$0xff]   ;;  %v967_v19 = vld [vmem:[%s1356_s1 + $0x60] sm:$0xff]   ;;  %v970_v27 = vld [vmem:[%s1356_s1 + $0x58] sm:$0xff]   ;;  %v239_v30 = vsub.s32 0, %v238_v12 }
  0x1a   : > { %392 = vmatpush1.bf16.msra.mxu0 %v955_v3  ;;  %507 = vmatpush1.bf16.msra.mxu1 %v956_v4  ;;  %v283_v20 = vrot.slane %v804_v18, %v243_v15  ;;  %v235_v21 = vld [vmem:[%s1205_s21] ss:$4 sm:$0x3]  ;;  %v971_v28 = vld [vmem:[%s1356_s1 + $0xb0] sm:$0xff]   ;;  %v973_v31 = vld [vmem:[%s1356_s1 + $0xa8] sm:$0xff]  }
  0x1b   : > { %393 = vmatprep.subr.bf16.mxu0 %v1067_v1  ;;  %508 = vmatprep.subr.bf16.mxu1 %v1067_v1  ;;  %v244_v22 = vrot.slane %v235_v21, %v243_v15  ;;  %v968_v23 = vld [vmem:[%s1356_s1] sm:$0xff]   ;;  %v972_v29 = vld [vmem:[%s1356_s1 + $0x50] sm:$0xff]   ;;  %v974_v32 = vld [vmem:[%s1356_s1 + $0x48] sm:$0xff]   ;;  %v279_v34 = vrot.slane %v804_v18, %v239_v30  ;;  %v240_v36 = vrot.slane %v235_v21, %v239_v30 }
  0x1c   : > { %v287_v24 = vpack.c.bf16 %v283_v20, %v283_v20  ;;  %v855_v33 = vld [vmem:[%s1205_s21 + $0x2] ss:$4 sm:$0x3]  ;;  %v977_v41 = vld [vmem:[%s1356_s1 + $0xf8] sm:$0xff]   ;;  %v978_v43 = vld [vmem:[%s1356_s1 + $0xf0] sm:$0xff]   ;;  %s893_s21 = sshll.u32 %s1057_s18, 4 }
  0x1d   : > { %v248_v25 = vpack.c.bf16 %v244_v22, %v244_v22  ;;  %v975_v35 = vld [vmem:[%s1356_s1 + $0xa0] sm:$0xff]   ;;  %v554_v38 = vrot.slane %v855_v33, %v243_v15  ;;  %v286_v39 = vpack.c.bf16 %v279_v34, %v279_v34  ;;  %v247_v40 = vpack.c.bf16 %v240_v36, %v240_v36  ;;  %v979_v44 = vld [vmem:[%s1356_s1 + $0xe8] sm:$0xff]   ;;  %v981_v46 = vld [vmem:[%s1356_s1 + $0xd8] sm:$0xff]   ;;  %s719_s14 = scalar_lea.hbm %s1359_s4, %s893_s21  ;;  %s993_s18 = sshll.u32 %s1068_s26, 4  ;;  %s994_s18 = int_to_ptr.vmem [resolvable:$false] %s993_s18 }
  0x1e   : > { %394 = vmatpush1.bf16.msra.mxu0 %v957_v5  ;;  %509 = vmatpush1.bf16.msra.mxu1 %v958_v6  ;;  %v976_v37 = vld [vmem:[%s1356_s1 + $0x40] sm:$0xff]   ;;  %v982_v47 = vld [vmem:[%s1356_s1 + $0xd0] sm:$0xff]   ;;  %v983_v48 = vld [vmem:[%s1356_s1 + $0xc8] sm:$0xff]   ;;  %v550_v53 = vrot.slane %v855_v33, %v239_v30  ;;  %s995_s29 = scalar_lea.vmem %s994_s18, 32  ;;  %p996_p1 = scmp.lt.s32.totalorder %s722_s12, %s994_s18 }
  0x1f   : > { %395 = vmatprep.subr.bf16.mxu0 %v1067_v1  ;;  %510 = vmatprep.subr.bf16.mxu1 %v1067_v1  ;;  %v558_v42 = vpack.c.bf16 %v554_v38, %v554_v38  ;;  %v980_v45 = vld [vmem:[%s1356_s1 + $0xe0] sm:$0xff]   ;;  %v985_v50 = vld [vmem:[%s1356_s1 + $0x118] sm:$0xff]   ;;  %v986_v51 = vld [vmem:[%s1356_s1 + $0x110] sm:$0xff]   ;;  %p997_p2 = scmp.lt.s32.totalorder %s995_s29, %s989_s24 }
  0x20   : > { %841 = vmatprep.mubr.msk.bf16.mxu0 %vm385_vm0, %v287_v24  ;;  %854 = vmatprep.mubr.msk.bf16.mxu1 %vm385_vm0, %v248_v25  ;;  %v984_v49 = vld [vmem:[%s1356_s1 + $0xc0] sm:$0xff]   ;;  %v987_v52 = vld [vmem:[%s1356_s1 + $0x108] sm:$0xff]   ;;  %v557_v55 = vpack.c.bf16 %v550_v53, %v550_v53 }
  0x21   : > { %v988_v54 = vld [vmem:[%s1356_s1 + $0x100] sm:$0xff]   ;;  %p998_p3 = por %p997_p2, %p996_p1 }
  0x22   : > { %396 = vmatpush1.bf16.msra.mxu0 %v959_v7  ;;  %511 = vmatpush1.bf16.msra.mxu1 %v960_v8  ;;  %v702_v4 = vld [vmem:[%s233_s8] sm:$0x1] }
  0x23   : > { %397 = vmatprep.subr.bf16.mxu0 %v1067_v1  ;;  %512 = vmatprep.subr.bf16.mxu1 %v1067_v1  ;;  %p999_p5 = pnand %p998_p3, %p992_p0 }
  0x26   : > { %398 = vmatpush1.bf16.msra.mxu0 %v961_v10  ;;  %513 = vmatpush1.bf16.msra.mxu1 %v962_v11 }
  0x27   : > { %399 = vmatprep.subr.bf16.mxu0 %v1067_v1  ;;  %514 = vmatprep.subr.bf16.mxu1 %v1067_v1 }
  0x2a   : > { %400 = vmatpush1.bf16.msra.mxu0 %v963_v13  ;;  %515 = vmatpush1.bf16.msra.mxu1 %v964_v14 }
  0x2b   : > { %401 = vmatprep.subr.bf16.mxu0 %v1067_v1  ;;  %516 = vmatprep.subr.bf16.mxu1 %v1067_v1 }
  0x2e   : > { %402 = vmatpush1.bf16.msra.mxu0 %v965_v16  ;;  %517 = vmatpush1.bf16.msra.mxu1 %v966_v17 }
  0x2f   : > { %403 = vmatprep.subr.bf16.mxu0 %v1067_v1  ;;  %518 = vmatprep.subr.bf16.mxu1 %v1067_v1 }
  0x32   : > { %404 = vmatpush1.bf16.msra.mxu0 %v967_v19  ;;  %519 = vmatpush1.bf16.msra.mxu1 %v968_v23 }
  0x33   : > { %413 = vmatprep.subr.bf16.mxu0 %v1067_v1  ;;  %528 = vmatprep.subr.bf16.mxu1 %v1067_v1 }
  0x36   : > { %414 = vmatpush2.bf16.msra.mxu0 %v969_v26  ;;  %529 = vmatpush2.bf16.msra.mxu1 %v970_v27 }
  0x37   : > { %415 = vmatprep.subr.bf16.mxu0 %v1067_v1  ;;  %530 = vmatprep.subr.bf16.mxu1 %v1067_v1 }
  0x3a   : > { %416 = vmatpush2.bf16.msra.mxu0 %v971_v28  ;;  %531 = vmatpush2.bf16.msra.mxu1 %v972_v29 }
  0x3b   : > { %417 = vmatprep.subr.bf16.mxu0 %v1067_v1  ;;  %532 = vmatprep.subr.bf16.mxu1 %v1067_v1 }
  0x3e   : > { %418 = vmatpush2.bf16.msra.mxu0 %v973_v31  ;;  %533 = vmatpush2.bf16.msra.mxu1 %v974_v32 }
  0x3f   : > { %419 = vmatprep.subr.bf16.mxu0 %v1067_v1  ;;  %534 = vmatprep.subr.bf16.mxu1 %v1067_v1 }
  0x42   : > { %420 = vmatpush2.bf16.msra.mxu0 %v975_v35  ;;  %535 = vmatpush2.bf16.msra.mxu1 %v976_v37 }
  0x43   : > { %659 = vmatprep.subr.bf16.mxu0 %v1067_v1 }
  0x45   : > { %422 = vmatmul.mubr.bf16.vlgmr.msra.gmra.mxu0 %v286_v39  ;;  %537 = vmatmul.mubr.bf16.vlgmr.msra.gmra.mxu1 %v247_v40 }
  0x46   : > { %660 = vmatpush1.bf16.msra.mxu0 %v977_v41  ;;  %892 = vmatprep.mubr.msk.bf16.mxu0 %vm385_vm0, %v558_v42 }
  0x47   : > { %661 = vmatprep.subr.bf16.mxu0 %v1067_v1 }
  0x4a   : > { %662 = vmatpush1.bf16.msra.mxu0 %v978_v43 }
  0x4b   : > { %663 = vmatprep.subr.bf16.mxu0 %v1067_v1 }
  0x4e   : > { %664 = vmatpush1.bf16.msra.mxu0 %v979_v44 }
  0x4f   : > { %665 = vmatprep.subr.bf16.mxu0 %v1067_v1 }
  0x52   : > { %666 = vmatpush1.bf16.msra.mxu0 %v980_v45 }
  0x53   : > { %667 = vmatprep.subr.bf16.mxu0 %v1067_v1 }
  0x56   : > { %668 = vmatpush1.bf16.msra.mxu0 %v981_v46 }
  0x57   : > { %669 = vmatprep.subr.bf16.mxu0 %v1067_v1 }
  0x5a   : > { %670 = vmatpush1.bf16.msra.mxu0 %v982_v47 }
  0x5b   : > { %671 = vmatprep.subr.bf16.mxu0 %v1067_v1 }
  0x5e   : > { %672 = vmatpush1.bf16.msra.mxu0 %v983_v48 }
  0x5f   : > { %673 = vmatprep.subr.bf16.mxu0 %v1067_v1 }
  0x62   : > { %674 = vmatpush1.bf16.msra.mxu0 %v984_v49 }
  0x63   : > { %683 = vmatprep.subr.bf16.mxu0 %v1067_v1 }
  0x66   : > { %684 = vmatpush2.bf16.msra.mxu0 %v985_v50 }
  0x67   : > { %685 = vmatprep.subr.bf16.mxu0 %v1067_v1 }
  0x6a   : > { %686 = vmatpush2.bf16.msra.mxu0 %v986_v51 }
  0x6b   : > { %687 = vmatprep.subr.bf16.mxu0 %v1067_v1 }
  0x6e   : > { %688 = vmatpush2.bf16.msra.mxu0 %v987_v52 }
  0x6f   : > { %689 = vmatprep.subr.bf16.mxu0 %v1067_v1  ;;  %v700_v1 = vld [vmem:[%s1357_s2] sm:$0x1] }
  0x72   : > { %690 = vmatpush2.bf16.msra.mxu0 %v988_v54 }
  0x75   : > { %692 = vmatmul.mubr.bf16.vlgmr.msra.gmra.mxu0 %v557_v55 }
 0x105   : > { %v423_v56 = vpop.f32.mrf.mxu0  ;;  %v538_v57 = vpop.f32.mrf.mxu1 }
 0x106   : > { %v539_v0 = vadd.f32 %v538_v57, %v423_v56 }
 0x107   : > { %v425_v58 = vpop.f32.mrf.mxu0  ;;  %v540_v59 = vpop.f32.mrf.mxu1 }
 0x109   : > { %v426_v60 = vpop.f32.mrf.mxu0  ;;  %v541_v61 = vpop.f32.mrf.mxu1 }
 0x10b   : > { %v427_v62 = vpop.f32.mrf.mxu0  ;;  %v542_v63 = vpop.f32.mrf.mxu1 }
 0x135   : > { %v693_v2 = vpop.f32.mrf.mxu0 }
 0x136   : > { %v699_v3 = vadd.f32 %v693_v2, %v539_v0 }
 0x137   : > { %v695_v5 = vpop.f32.mrf.mxu0 }
 0x138   : > { %v701_v6 = vadd.f32 %v700_v1, %v699_v3 }
 0x139   : > { %v696_v7 = vpop.f32.mrf.mxu0 }
 0x13a   : > { %v703_v8 = vadd.f32 %v702_v4, %v701_v6 }
 0x13b   : > { %v697_v9 = vpop.f32.mrf.mxu0 }
 0x13c   : > { %v704_v10 = vmax.f32 %v703_v8, 0.0 }
 0x13e   : > { %706 = vst.msk [vmem:[%s222_s11] sm:$0x1] %vm705_vm1, %v704_v10 }
 0x13f   : > { %1002 = shalt.err (!%p999_p5)
}
 0x140   : > { %s1003_s6 = scalar_lea.hbm %s719_s14, 16  ;;  %s1007_s8 = scalar_lea.hbm %s1359_s4, 64 }
 0x141   : > { %p1004_p6 = scmp.ne.s32.totalorder %s719_s14, %s1003_s6  ;;  %p1008_p10 = scmp.lt.s32.totalorder %s719_s14, %s1359_s4 }
 0x142   : > { %p1009_p11 = scmp.lt.s32.totalorder %s1007_s8, %s1003_s6 }
 0x143   : > { %p1005_p7 = pnand %p1004_p6, %p1134_p4 }
 0x144   : > { %p1010_p12 = por %p1009_p11, %p1008_p10 }
 0x145   : > { %p1006_p9 = pneg %p1005_p7 }
 0x147   : > { %p1011_p13 = pnand %p1010_p12, %p1006_p9 }
 0x149   : > { %1014 = shalt.err (!%p1011_p13)
}
 0x14a   : > { %897 = dma.vmem_to_hbm [thread:$0]  (%p1134_p4), %s722_s12, 16, %s719_s14, %s708_s22  }
 0x14b PF: > { %p903_p0 = scmp.ge.s32.totalorder %s1065_s20, 2  ;;  %s733_s21 = sand.u32 1, %s1045_s15  }
 0x14c   : > { %s734_s11 = scalar_lea.sflag [#allocation3], %s733_s21 }
 0x14d   : > { %p900_p1 = pnand %p903_p0, %p1141_p8 }
 0x14f   : > { %p901_p2 = pneg %p900_p1 }
 0x151   : > { %1040 = dma.done.wait (%p901_p2), %s734_s11, 16  }
 0x152   : > { %1042 = vsyncadd (%p901_p2), %s734_s11, 4294967280  ;;  %s17_s20 = sadd.s32 1, %s1065_s20   ;;  %s1362_s15 = smov %s1049_s16 }
 0x153   : > { %p14_p3 = scmp.ge.s32.totalorder %s17_s20, 6   ;;  %s1363_s16 = smov %s1053_s17 }
 0x154   : > { %s1364_s17 = smov %s1147_s28  ;;  %s1365_s18 = smov %s1061_s19 }
 0x155   : > { %s1366_s19 = smov %s1368_s23  ;;  %16 = sbr.rel (!%p14_p3) target bundleno = 4 (0x4), region = 78 }
 0x15a   :  { %738 = vsyncpa [#allocation3], 1 }
 0x15b   :  { %740 = vsyncpa [#allocation3 + $0x1], 1 }

</bundles_post_ra>
